<compile_context>
chip_gen: v7x
topology: tpu7x:2x2x1
jax: 0.10.0
libtpu: 0.0.40
codegen_flags: <defaults>
</compile_context>

<pallas_src>
import numpy as np
import jax
import jax.numpy as jnp
from jax.experimental import pallas as pl


# --------------------------------------------------------------------------- #
# Fused kernel: 4x (conv3x3 + folded BN + ReLU + maxpool2x2)  +  compute_score #
# --------------------------------------------------------------------------- #

def make_protonet_kernel(row_counts, conv_dtype):
    """Builds the single fused kernel.

    Activation layout inside the kernel (per layer):
        Aext[1 + n*Hp + hp, ci*Wp + wp] = x_zero_padded[n, ci, hp, wp]   (f32)
    rows = (image, padded row), cols = (channel, padded col), plus one extra zero row
    at top and bottom so the three kh-shifted conv operands are plain static slices
    Aext[kh : kh+R].

    Per layer:
        Y  = sum_kh Aext[kh:kh+R] @ B[kh]          # conv (kw taps folded into B)
        Y  = relu(Y + bias_row)                    # folded eval-mode BN bias
        Zc = max(Y @ SelCol[0], Y @ SelCol[1])     # pool max over dw, repack cols
        A' = max(SelRow[0] @ Zc, SelRow[1] @ Zc)   # pool max over dh, repack rows
    Unselected rows/cols of the 0/1 selection matrices come out exactly 0, which
    rebuilds the next layer's zero padding with no masking.  The last layer's
    selection matrices emit the compact (N, feat_dim) feature matrix directly.
    """
    n_layers = len(row_counts)

    def kernel(*refs):
        a_ref = refs[0]
        layer_refs = refs[1:1 + 4 * n_layers]
        msup_ref = refs[1 + 4 * n_layers]
        mqry_ref = refs[2 + 4 * n_layers]
        z_ref = refs[3 + 4 * n_layers]
        score_ref = refs[4 + 4 * n_layers]

        a = a_ref[...]                                          # (R1+2, C1*Wp1) f32
        for l in range(n_layers):
            b_ref, bias_ref, selc_ref, selr_ref = layer_refs[4 * l: 4 * l + 4]
            r = row_counts[l]
            # conv: 3 row-shifted matmuls (bf16 operands, f32 accumulation on MXU)
            y = jnp.dot(a[0:r, :].astype(conv_dtype), b_ref[0],
                        preferred_element_type=jnp.float32)
            y += jnp.dot(a[1:r + 1, :].astype(conv_dtype), b_ref[1],
                         preferred_element_type=jnp.float32)
            y += jnp.dot(a[2:r + 2, :].astype(conv_dtype), b_ref[2],
                         preferred_element_type=jnp.float32)
            # folded eval-mode BN bias + ReLU (f32, VPU)
            y = jnp.maximum(y + bias_ref[...], 0.0)
            # 2x2 max-pool + repack via exact 0/1 selection matmuls (f32)
            zc = jnp.maximum(
                jnp.dot(y, selc_ref[0], preferred_element_type=jnp.float32),
                jnp.dot(y, selc_ref[1], preferred_element_type=jnp.float32))
            a = jnp.maximum(
                jnp.dot(selr_ref[0], zc, preferred_element_type=jnp.float32),
                jnp.dot(selr_ref[1], zc, preferred_element_type=jnp.float32))

        z = a                                                   # (N, feat_dim) f32
        z_ref[...] = z                                          # ProtoNet.forward(x)

        # ---- fused ProtoNet.compute_score ----
        proto = jnp.dot(msup_ref[...], z, preferred_element_type=jnp.float32)  # (n_way, D)
        zq = jnp.dot(mqry_ref[...], z, preferred_element_type=jnp.float32)     # (Q, D)
        qp = jax.lax.dot_general(zq, proto, (((1,), (1,)), ((), ())),
                                 preferred_element_type=jnp.float32)           # (Q, n_way)
        qn = jnp.sum(zq * zq, axis=-1, keepdims=True)                          # (Q, 1)
        pn = jnp.sum(proto * proto, axis=-1)[None, :]                          # (1, n_way)
        score_ref[...] = 2.0 * qp - qn - pn

    return kernel


# --------------------------------------------------------------------------- #
# Host-side, one-time parameter preparation                                    #
# --------------------------------------------------------------------------- #

def _fold_bn(w_hwio, gamma, beta, mean, var, eps=1e-5):
    """Eval-mode BN fold: scale into weights, bias = beta - scale*mean."""
    scale = gamma / np.sqrt(var + eps)
    return w_hwio * scale[None, None, None, :], beta - scale * mean


def _build_layer_constants(w_hwio, bias, N, H, W, last):
    """Per-block matrices used in-kernel: conv B[kh], bias row, pool selections."""
    KH, KW, Ci, Co = w_hwio.shape
    Hp, Wp = H + 2, W + 2
    Ho, Wo = H // 2, W // 2
    R = N * Hp

    # B[kh] maps input cols (ci, wp) -> conv-output cols (co, w_out); the kw taps live
    # in the sparsity pattern, so the conv is just 3 row-shifted matmuls.
    B = np.zeros((3, Ci * Wp, Co * W), np.float32)
    co_cols = np.arange(Co) * W
    for kh in range(KH):
        for kw in range(KW):
            for ci in range(Ci):
                for w_out in range(W):
                    B[kh, ci * Wp + w_out + kw, co_cols + w_out] = w_hwio[kh, kw, ci, :]

    bias_row = np.repeat(np.asarray(bias, np.float32), W)[None, :]          # (1, Co*W)

    if last:
        # Final block: pooled spatial is 1x1 -> selections directly emit the compact
        # (N, Co) feature matrix (same order as torch .view(N, -1)).
        assert Ho == 1 and Wo == 1, "final-layer helper assumes 1x1 spatial output"
        sel_cols = np.zeros((2, Co * W, Co), np.float32)
        sel_rows = np.zeros((2, N, R), np.float32)
        for d in range(2):
            for co in range(Co):
                sel_cols[d, co * W + d, co] = 1.0
            for n in range(N):
                sel_rows[d, n, n * Hp + d + 1] = 1.0
    else:
        Hp2, Wp2 = Ho + 2, Wo + 2
        sel_cols = np.zeros((2, Co * W, Co * Wp2), np.float32)
        sel_rows = np.zeros((2, N * Hp2 + 2, R), np.float32)
        for d in range(2):
            for co in range(Co):
                for wo in range(Wo):
                    sel_cols[d, co * W + 2 * wo + d, co * Wp2 + wo + 1] = 1.0
            for n in range(N):
                for ho in range(Ho):
                    sel_rows[d, 1 + n * Hp2 + ho + 1, n * Hp + 2 * ho + d + 1] = 1.0
    return B, bias_row, sel_cols, sel_rows


def prepare_network(params, N, H, W, n_way, n_support, n_query,
                    conv_dtype=jnp.bfloat16, eps=1e-5):
    """Fold BN, build per-layer conv/pool matrices and the episode matrices."""
    operands, row_counts = [], []
    h, w = H, W
    for li, (wt, gamma, beta, mean, var) in enumerate(params):
        wt, gamma, beta, mean, var = (np.asarray(a, np.float32) for a in
                                      (wt, gamma, beta, mean, var))
        w_f, b_f = _fold_bn(wt, gamma, beta, mean, var, eps)
        last = li == len(params) - 1
        B, bias_row, sel_cols, sel_rows = _build_layer_constants(w_f, b_f, N, h, w, last)
        row_counts.append(N * (h + 2))
        operands += [jnp.asarray(B, conv_dtype),            # conv weights -> bf16 MXU
                     jnp.asarray(bias_row, jnp.float32),
                     jnp.asarray(sel_cols, jnp.float32),    # exact 0/1 -> keep f32
                     jnp.asarray(sel_rows, jnp.float32)]
        h, w = h // 2, w // 2
    assert h == 1 and w == 1, "expected the Conv-4 stack to end at 1x1 spatial"
    feat_dim = int(params[-1][0].shape[-1]) * h * w

    S, Q = n_support, n_query
    msup = np.zeros((n_way, N), np.float32)        # support mean (1/S entries)
    mqry = np.zeros((n_way * Q, N), np.float32)    # query row selection
    for c in range(n_way):
        msup[c, c * (S + Q): c * (S + Q) + S] = 1.0 / S
        for q in range(Q):
            mqry[c * Q + q, c * (S + Q) + S + q] = 1.0
    operands += [jnp.asarray(msup), jnp.asarray(mqry)]

    return dict(operands=operands, row_counts=tuple(row_counts), feat_dim=feat_dim,
                n_way=n_way, q_total=n_way * Q, conv_dtype=conv_dtype)


# --------------------------------------------------------------------------- #
# Wrapper                                                                      #
# --------------------------------------------------------------------------- #

def protonet_forward(x, net):
    """ProtoNet.forward(x) (features z) and ProtoNet.compute_score(z) fused into one
    pallas_call.  x: (N, C, H, W) float32 with N = n_way*(n_support+n_query) in
    episode order (class-major)."""
    N, C, H, W = x.shape
    Hp, Wp = H + 2, W + 2
    # Only XLA-side prep: pad + lay the raw input out as (rows=(n,h), cols=(c,w)) plus
    # one extra zero row at each end.  This replaces the old 36x im2col expansion.
    xp = jnp.pad(x.astype(jnp.float32), ((0, 0), (0, 0), (1, 1), (1, 1)))
    a1 = jnp.transpose(xp, (0, 2, 1, 3)).reshape(N * Hp, C * Wp)
    a1ext = jnp.pad(a1, ((1, 1), (0, 0)))                          # (N*Hp + 2, C*Wp)

    kernel = make_protonet_kernel(net["row_counts"], net["conv_dtype"])
    out_shape = (
        jax.ShapeDtypeStruct((N, net["feat_dim"]), jnp.float32),            # z
        jax.ShapeDtypeStruct((net["q_total"], net["n_way"]), jnp.float32),  # scores
    )
    # Single invocation, no grid: every operand is a whole-array VMEM block.
    z, scores = pl.pallas_call(kernel, out_shape=out_shape)(a1ext, *net["operands"])
    return z, scores


# --------------------------------------------------------------------------- #
# Params & independent pure-f32 references                                     #
# --------------------------------------------------------------------------- #

def init_params(key, channels=(3, 8, 8, 8, 8)):
    """Conv-4 style feature extractor params (HWIO conv weights + eval-mode BN stats)."""
    params = []
    for i in range(len(channels) - 1):
        cin, cout = channels[i], channels[i + 1]
        key, k1, k2, k3, k4, k5 = jax.random.split(key, 6)
        w = 0.1 * jax.random.normal(k1, (3, 3, cin, cout), jnp.float32)
        gamma = 1.0 + 0.1 * jax.random.normal(k2, (cout,), jnp.float32)
        beta = 0.1 * jax.random.normal(k3, (cout,), jnp.float32)
        mean = 0.1 * jax.random.normal(k4, (cout,), jnp.float32)
        var = jax.random.uniform(k5, (cout,), jnp.float32, minval=0.5, maxval=1.5)
        params.append((w, gamma, beta, mean, var))
    return params


def reference_forward(x, params, eps=1e-5):
    """Independent f32 reference: lax.conv + eval-mode BN + ReLU + 2x2 maxpool."""
    h = jnp.transpose(x, (0, 2, 3, 1)).astype(jnp.float32)          # NHWC
    for (w, gamma, beta, mean, var) in params:
        y = jax.lax.conv_general_dilated(
            h, w, (1, 1), 'SAME', dimension_numbers=('NHWC', 'HWIO', 'NHWC'),
            precision=jax.lax.Precision.HIGHEST)
        scale = gamma / jnp.sqrt(var + eps)
        y = y * scale + (beta - scale * mean)
        y = jnp.maximum(y, 0.0)
        h = jax.lax.reduce_window(y, -jnp.inf, jax.lax.max,
                                  (1, 2, 2, 1), (1, 2, 2, 1), 'VALID')
    h = jnp.transpose(h, (0, 3, 1, 2))                               # back to NCHW
    return h.reshape(h.shape[0], -1)


def reference_score(z_all, n_way, n_support, n_query):
    z = z_all.reshape(n_way, n_support + n_query, -1)
    proto = jnp.mean(z[:, :n_support], axis=1)
    zq = z[:, n_support:].reshape(n_way * n_query, -1)
    return -jnp.sum((zq[:, None, :] - proto[None, :, :]) ** 2, axis=-1)


# --------------------------------------------------------------------------- #
# main                                                                         #
# --------------------------------------------------------------------------- #

if __name__ == "__main__":
    key = jax.random.PRNGKey(0)
    n_way, n_support, n_query = 3, 2, 2
    N = n_way * (n_support + n_query)                       # 12 images per episode
    key, kx, kp = jax.random.split(key, 3)
    x = jax.random.normal(kx, (N, 3, 16, 16), jnp.float32)  # NCHW, as PyTorch
    params = init_params(kp)
    net = prepare_network(params, N, 16, 16, n_way, n_support, n_query)

    run = jax.jit(lambda xx: protonet_forward(xx, net))
    z, scores = run(x)                   # z == ProtoNet.forward, scores == compute_score
    jax.block_until_ready((z, scores))

    z_ref = reference_forward(x, params)
    s_ref = reference_score(z_ref, n_way, n_support, n_query)
    np.testing.assert_allclose(np.asarray(z), np.asarray(z_ref), atol=2e-2, rtol=2e-2)
    np.testing.assert_allclose(np.asarray(scores), np.asarray(s_ref), atol=2e-2, rtol=5e-2)
    print("KERNEL_OK")
</pallas_src>

<mosaic_0001>
module attributes {stable_mosaic.version = 11 : i64} {
  func.func @kernel(%arg0: memref<218x54xf32, #tpu.memory_space<vmem>>, %arg1: memref<3x54x128xbf16, #tpu.memory_space<vmem>>, %arg2: memref<1x128xf32, #tpu.memory_space<vmem>>, %arg3: memref<2x128x80xf32, #tpu.memory_space<vmem>>, %arg4: memref<2x122x216xf32, #tpu.memory_space<vmem>>, %arg5: memref<3x80x64xbf16, #tpu.memory_space<vmem>>, %arg6: memref<1x64xf32, #tpu.memory_space<vmem>>, %arg7: memref<2x64x48xf32, #tpu.memory_space<vmem>>, %arg8: memref<2x74x120xf32, #tpu.memory_space<vmem>>, %arg9: memref<3x48x32xbf16, #tpu.memory_space<vmem>>, %arg10: memref<1x32xf32, #tpu.memory_space<vmem>>, %arg11: memref<2x32x32xf32, #tpu.memory_space<vmem>>, %arg12: memref<2x50x72xf32, #tpu.memory_space<vmem>>, %arg13: memref<3x32x16xbf16, #tpu.memory_space<vmem>>, %arg14: memref<1x16xf32, #tpu.memory_space<vmem>>, %arg15: memref<2x16x8xf32, #tpu.memory_space<vmem>>, %arg16: memref<2x12x48xf32, #tpu.memory_space<vmem>>, %arg17: memref<3x12xf32, #tpu.memory_space<vmem>>, %arg18: memref<6x12xf32, #tpu.memory_space<vmem>>, %arg19: memref<12x8xf32, #tpu.memory_space<vmem>>, %arg20: memref<6x3xf32, #tpu.memory_space<vmem>>) attributes {dimension_semantics = [], scalar_prefetch = 0 : i64, scratch_operands = 0 : i64, tpu.core_type = #tpu.core_type<tc>} {
    %c0 = arith.constant 0 : index
    %c0_0 = arith.constant 0 : index
    %0 = vector.load %arg0[%c0, %c0_0] : memref<218x54xf32, #tpu.memory_space<vmem>>, vector<218x54xf32>
    %1 = vector.extract_strided_slice %0 {offsets = [0, 0], sizes = [216, 54], strides = [1, 1]} : vector<218x54xf32> to vector<216x54xf32>
    %2 = arith.truncf %1 : vector<216x54xf32> to vector<216x54xbf16>
    %c0_1 = arith.constant 0 : index
    %c0_2 = arith.constant 0 : index
    %c0_3 = arith.constant 0 : index
    %3 = vector.load %arg1[%c0_1, %c0_2, %c0_3] : memref<3x54x128xbf16, #tpu.memory_space<vmem>>, vector<1x54x128xbf16>
    %4 = vector.shape_cast %3 : vector<1x54x128xbf16> to vector<54x128xbf16>
    %cst = arith.constant dense<0.000000e+00> : vector<216x128xf32>
    %5 = tpu.matmul %2, %4, %cst {dimension_numbers = #tpu.dot_dimension_numbers<[1], [0], [0], [1], [0, 0, 1, 1], [], []>} : vector<216x54xbf16>, vector<54x128xbf16>, vector<216x128xf32> -> vector<216x128xf32>
    %6 = vector.extract_strided_slice %0 {offsets = [1, 0], sizes = [216, 54], strides = [1, 1]} : vector<218x54xf32> to vector<216x54xf32>
    %7 = arith.truncf %6 : vector<216x54xf32> to vector<216x54xbf16>
    %c1 = arith.constant 1 : index
    %c0_4 = arith.constant 0 : index
    %c0_5 = arith.constant 0 : index
    %8 = vector.load %arg1[%c1, %c0_4, %c0_5] : memref<3x54x128xbf16, #tpu.memory_space<vmem>>, vector<1x54x128xbf16>
    %9 = vector.shape_cast %8 : vector<1x54x128xbf16> to vector<54x128xbf16>
    %cst_6 = arith.constant dense<0.000000e+00> : vector<216x128xf32>
    %10 = tpu.matmul %7, %9, %cst_6 {dimension_numbers = #tpu.dot_dimension_numbers<[1], [0], [0], [1], [0, 0, 1, 1], [], []>} : vector<216x54xbf16>, vector<54x128xbf16>, vector<216x128xf32> -> vector<216x128xf32>
    %11 = arith.addf %5, %10 : vector<216x128xf32>
    %12 = vector.extract_strided_slice %0 {offsets = [2, 0], sizes = [216, 54], strides = [1, 1]} : vector<218x54xf32> to vector<216x54xf32>
    %13 = arith.truncf %12 : vector<216x54xf32> to vector<216x54xbf16>
    %c2 = arith.constant 2 : index
    %c0_7 = arith.constant 0 : index
    %c0_8 = arith.constant 0 : index
    %14 = vector.load %arg1[%c2, %c0_7, %c0_8] : memref<3x54x128xbf16, #tpu.memory_space<vmem>>, vector<1x54x128xbf16>
    %15 = vector.shape_cast %14 : vector<1x54x128xbf16> to vector<54x128xbf16>
    %cst_9 = arith.constant dense<0.000000e+00> : vector<216x128xf32>
    %16 = tpu.matmul %13, %15, %cst_9 {dimension_numbers = #tpu.dot_dimension_numbers<[1], [0], [0], [1], [0, 0, 1, 1], [], []>} : vector<216x54xbf16>, vector<54x128xbf16>, vector<216x128xf32> -> vector<216x128xf32>
    %17 = arith.addf %11, %16 : vector<216x128xf32>
    %c0_10 = arith.constant 0 : index
    %c0_11 = arith.constant 0 : index
    %18 = vector.load %arg2[%c0_10, %c0_11] : memref<1x128xf32, #tpu.memory_space<vmem>>, vector<1x128xf32>
    %19 = vector.broadcast %18 : vector<1x128xf32> to vector<216x128xf32>
    %20 = arith.addf %17, %19 : vector<216x128xf32>
    %cst_12 = arith.constant 0.000000e+00 : f32
    %21 = vector.broadcast %cst_12 : f32 to vector<216x128xf32>
    %22 = arith.maximumf %20, %21 : vector<216x128xf32>
    %c0_13 = arith.constant 0 : index
    %c0_14 = arith.constant 0 : index
    %c0_15 = arith.constant 0 : index
    %23 = vector.load %arg3[%c0_13, %c0_14, %c0_15] : memref<2x128x80xf32, #tpu.memory_space<vmem>>, vector<1x128x80xf32>
    %24 = vector.shape_cast %23 : vector<1x128x80xf32> to vector<128x80xf32>
    %cst_16 = arith.constant dense<0.000000e+00> : vector<216x80xf32>
    %25 = tpu.matmul %22, %24, %cst_16 {dimension_numbers = #tpu.dot_dimension_numbers<[1], [0], [0], [1], [0, 0, 1, 1], [], []>} : vector<216x128xf32>, vector<128x80xf32>, vector<216x80xf32> -> vector<216x80xf32>
    %c1_17 = arith.constant 1 : index
    %c0_18 = arith.constant 0 : index
    %c0_19 = arith.constant 0 : index
    %26 = vector.load %arg3[%c1_17, %c0_18, %c0_19] : memref<2x128x80xf32, #tpu.memory_space<vmem>>, vector<1x128x80xf32>
    %27 = vector.shape_cast %26 : vector<1x128x80xf32> to vector<128x80xf32>
    %cst_20 = arith.constant dense<0.000000e+00> : vector<216x80xf32>
    %28 = tpu.matmul %22, %27, %cst_20 {dimension_numbers = #tpu.dot_dimension_numbers<[1], [0], [0], [1], [0, 0, 1, 1], [], []>} : vector<216x128xf32>, vector<128x80xf32>, vector<216x80xf32> -> vector<216x80xf32>
    %29 = arith.maximumf %25, %28 : vector<216x80xf32>
    %c0_21 = arith.constant 0 : index
    %c0_22 = arith.constant 0 : index
    %c0_23 = arith.constant 0 : index
    %30 = vector.load %arg4[%c0_21, %c0_22, %c0_23] : memref<2x122x216xf32, #tpu.memory_space<vmem>>, vector<1x122x216xf32>
    %31 = vector.shape_cast %30 : vector<1x122x216xf32> to vector<122x216xf32>
    %cst_24 = arith.constant dense<0.000000e+00> : vector<122x80xf32>
    %32 = tpu.matmul %31, %29, %cst_24 {dimension_numbers = #tpu.dot_dimension_numbers<[1], [0], [0], [1], [0, 0, 1, 1], [], []>} : vector<122x216xf32>, vector<216x80xf32>, vector<122x80xf32> -> vector<122x80xf32>
    %c1_25 = arith.constant 1 : index
    %c0_26 = arith.constant 0 : index
    %c0_27 = arith.constant 0 : index
    %33 = vector.load %arg4[%c1_25, %c0_26, %c0_27] : memref<2x122x216xf32, #tpu.memory_space<vmem>>, vector<1x122x216xf32>
    %34 = vector.shape_cast %33 : vector<1x122x216xf32> to vector<122x216xf32>
    %cst_28 = arith.constant dense<0.000000e+00> : vector<122x80xf32>
    %35 = tpu.matmul %34, %29, %cst_28 {dimension_numbers = #tpu.dot_dimension_numbers<[1], [0], [0], [1], [0, 0, 1, 1], [], []>} : vector<122x216xf32>, vector<216x80xf32>, vector<122x80xf32> -> vector<122x80xf32>
    %36 = arith.maximumf %32, %35 : vector<122x80xf32>
    %37 = vector.extract_strided_slice %36 {offsets = [0, 0], sizes = [120, 80], strides = [1, 1]} : vector<122x80xf32> to vector<120x80xf32>
    %38 = arith.truncf %37 : vector<120x80xf32> to vector<120x80xbf16>
    %c0_29 = arith.constant 0 : index
    %c0_30 = arith.constant 0 : index
    %c0_31 = arith.constant 0 : index
    %39 = vector.load %arg5[%c0_29, %c0_30, %c0_31] : memref<3x80x64xbf16, #tpu.memory_space<vmem>>, vector<1x80x64xbf16>
    %40 = vector.shape_cast %39 : vector<1x80x64xbf16> to vector<80x64xbf16>
    %cst_32 = arith.constant dense<0.000000e+00> : vector<120x64xf32>
    %41 = tpu.matmul %38, %40, %cst_32 {dimension_numbers = #tpu.dot_dimension_numbers<[1], [0], [0], [1], [0, 0, 1, 1], [], []>} : vector<120x80xbf16>, vector<80x64xbf16>, vector<120x64xf32> -> vector<120x64xf32>
    %42 = vector.extract_strided_slice %36 {offsets = [1, 0], sizes = [120, 80], strides = [1, 1]} : vector<122x80xf32> to vector<120x80xf32>
    %43 = arith.truncf %42 : vector<120x80xf32> to vector<120x80xbf16>
    %c1_33 = arith.constant 1 : index
    %c0_34 = arith.constant 0 : index
    %c0_35 = arith.constant 0 : index
    %44 = vector.load %arg5[%c1_33, %c0_34, %c0_35] : memref<3x80x64xbf16, #tpu.memory_space<vmem>>, vector<1x80x64xbf16>
    %45 = vector.shape_cast %44 : vector<1x80x64xbf16> to vector<80x64xbf16>
    %cst_36 = arith.constant dense<0.000000e+00> : vector<120x64xf32>
    %46 = tpu.matmul %43, %45, %cst_36 {dimension_numbers = #tpu.dot_dimension_numbers<[1], [0], [0], [1], [0, 0, 1, 1], [], []>} : vector<120x80xbf16>, vector<80x64xbf16>, vector<120x64xf32> -> vector<120x64xf32>
    %47 = arith.addf %41, %46 : vector<120x64xf32>
    %48 = vector.extract_strided_slice %36 {offsets = [2, 0], sizes = [120, 80], strides = [1, 1]} : vector<122x80xf32> to vector<120x80xf32>
    %49 = arith.truncf %48 : vector<120x80xf32> to vector<120x80xbf16>
    %c2_37 = arith.constant 2 : index
    %c0_38 = arith.constant 0 : index
    %c0_39 = arith.constant 0 : index
    %50 = vector.load %arg5[%c2_37, %c0_38, %c0_39] : memref<3x80x64xbf16, #tpu.memory_space<vmem>>, vector<1x80x64xbf16>
    %51 = vector.shape_cast %50 : vector<1x80x64xbf16> to vector<80x64xbf16>
    %cst_40 = arith.constant dense<0.000000e+00> : vector<120x64xf32>
    %52 = tpu.matmul %49, %51, %cst_40 {dimension_numbers = #tpu.dot_dimension_numbers<[1], [0], [0], [1], [0, 0, 1, 1], [], []>} : vector<120x80xbf16>, vector<80x64xbf16>, vector<120x64xf32> -> vector<120x64xf32>
    %53 = arith.addf %47, %52 : vector<120x64xf32>
    %c0_41 = arith.constant 0 : index
    %c0_42 = arith.constant 0 : index
    %54 = vector.load %arg6[%c0_41, %c0_42] : memref<1x64xf32, #tpu.memory_space<vmem>>, vector<1x64xf32>
    %55 = vector.broadcast %54 : vector<1x64xf32> to vector<120x64xf32>
    %56 = arith.addf %53, %55 : vector<120x64xf32>
    %cst_43 = arith.constant 0.000000e+00 : f32
    %57 = vector.broadcast %cst_43 : f32 to vector<120x64xf32>
    %58 = arith.maximumf %56, %57 : vector<120x64xf32>
    %c0_44 = arith.constant 0 : index
    %c0_45 = arith.constant 0 : index
    %c0_46 = arith.constant 0 : index
    %59 = vector.load %arg7[%c0_44, %c0_45, %c0_46] : memref<2x64x48xf32, #tpu.memory_space<vmem>>, vector<1x64x48xf32>
    %60 = vector.shape_cast %59 : vector<1x64x48xf32> to vector<64x48xf32>
    %cst_47 = arith.constant dense<0.000000e+00> : vector<120x48xf32>
    %61 = tpu.matmul %58, %60, %cst_47 {dimension_numbers = #tpu.dot_dimension_numbers<[1], [0], [0], [1], [0, 0, 1, 1], [], []>} : vector<120x64xf32>, vector<64x48xf32>, vector<120x48xf32> -> vector<120x48xf32>
    %c1_48 = arith.constant 1 : index
    %c0_49 = arith.constant 0 : index
    %c0_50 = arith.constant 0 : index
    %62 = vector.load %arg7[%c1_48, %c0_49, %c0_50] : memref<2x64x48xf32, #tpu.memory_space<vmem>>, vector<1x64x48xf32>
    %63 = vector.shape_cast %62 : vector<1x64x48xf32> to vector<64x48xf32>
    %cst_51 = arith.constant dense<0.000000e+00> : vector<120x48xf32>
    %64 = tpu.matmul %58, %63, %cst_51 {dimension_numbers = #tpu.dot_dimension_numbers<[1], [0], [0], [1], [0, 0, 1, 1], [], []>} : vector<120x64xf32>, vector<64x48xf32>, vector<120x48xf32> -> vector<120x48xf32>
    %65 = arith.maximumf %61, %64 : vector<120x48xf32>
    %c0_52 = arith.constant 0 : index
    %c0_53 = arith.constant 0 : index
    %c0_54 = arith.constant 0 : index
    %66 = vector.load %arg8[%c0_52, %c0_53, %c0_54] : memref<2x74x120xf32, #tpu.memory_space<vmem>>, vector<1x74x120xf32>
    %67 = vector.shape_cast %66 : vector<1x74x120xf32> to vector<74x120xf32>
    %cst_55 = arith.constant dense<0.000000e+00> : vector<74x48xf32>
    %68 = tpu.matmul %67, %65, %cst_55 {dimension_numbers = #tpu.dot_dimension_numbers<[1], [0], [0], [1], [0, 0, 1, 1], [], []>} : vector<74x120xf32>, vector<120x48xf32>, vector<74x48xf32> -> vector<74x48xf32>
    %c1_56 = arith.constant 1 : index
    %c0_57 = arith.constant 0 : index
    %c0_58 = arith.constant 0 : index
    %69 = vector.load %arg8[%c1_56, %c0_57, %c0_58] : memref<2x74x120xf32, #tpu.memory_space<vmem>>, vector<1x74x120xf32>
    %70 = vector.shape_cast %69 : vector<1x74x120xf32> to vector<74x120xf32>
    %cst_59 = arith.constant dense<0.000000e+00> : vector<74x48xf32>
    %71 = tpu.matmul %70, %65, %cst_59 {dimension_numbers = #tpu.dot_dimension_numbers<[1], [0], [0], [1], [0, 0, 1, 1], [], []>} : vector<74x120xf32>, vector<120x48xf32>, vector<74x48xf32> -> vector<74x48xf32>
    %72 = arith.maximumf %68, %71 : vector<74x48xf32>
    %73 = vector.extract_strided_slice %72 {offsets = [0, 0], sizes = [72, 48], strides = [1, 1]} : vector<74x48xf32> to vector<72x48xf32>
    %74 = arith.truncf %73 : vector<72x48xf32> to vector<72x48xbf16>
    %c0_60 = arith.constant 0 : index
    %c0_61 = arith.constant 0 : index
    %c0_62 = arith.constant 0 : index
    %75 = vector.load %arg9[%c0_60, %c0_61, %c0_62] : memref<3x48x32xbf16, #tpu.memory_space<vmem>>, vector<1x48x32xbf16>
    %76 = vector.shape_cast %75 : vector<1x48x32xbf16> to vector<48x32xbf16>
    %cst_63 = arith.constant dense<0.000000e+00> : vector<72x32xf32>
    %77 = tpu.matmul %74, %76, %cst_63 {dimension_numbers = #tpu.dot_dimension_numbers<[1], [0], [0], [1], [0, 0, 1, 1], [], []>} : vector<72x48xbf16>, vector<48x32xbf16>, vector<72x32xf32> -> vector<72x32xf32>
    %78 = vector.extract_strided_slice %72 {offsets = [1, 0], sizes = [72, 48], strides = [1, 1]} : vector<74x48xf32> to vector<72x48xf32>
    %79 = arith.truncf %78 : vector<72x48xf32> to vector<72x48xbf16>
    %c1_64 = arith.constant 1 : index
    %c0_65 = arith.constant 0 : index
    %c0_66 = arith.constant 0 : index
    %80 = vector.load %arg9[%c1_64, %c0_65, %c0_66] : memref<3x48x32xbf16, #tpu.memory_space<vmem>>, vector<1x48x32xbf16>
    %81 = vector.shape_cast %80 : vector<1x48x32xbf16> to vector<48x32xbf16>
    %cst_67 = arith.constant dense<0.000000e+00> : vector<72x32xf32>
    %82 = tpu.matmul %79, %81, %cst_67 {dimension_numbers = #tpu.dot_dimension_numbers<[1], [0], [0], [1], [0, 0, 1, 1], [], []>} : vector<72x48xbf16>, vector<48x32xbf16>, vector<72x32xf32> -> vector<72x32xf32>
    %83 = arith.addf %77, %82 : vector<72x32xf32>
    %84 = vector.extract_strided_slice %72 {offsets = [2, 0], sizes = [72, 48], strides = [1, 1]} : vector<74x48xf32> to vector<72x48xf32>
    %85 = arith.truncf %84 : vector<72x48xf32> to vector<72x48xbf16>
    %c2_68 = arith.constant 2 : index
    %c0_69 = arith.constant 0 : index
    %c0_70 = arith.constant 0 : index
    %86 = vector.load %arg9[%c2_68, %c0_69, %c0_70] : memref<3x48x32xbf16, #tpu.memory_space<vmem>>, vector<1x48x32xbf16>
    %87 = vector.shape_cast %86 : vector<1x48x32xbf16> to vector<48x32xbf16>
    %cst_71 = arith.constant dense<0.000000e+00> : vector<72x32xf32>
    %88 = tpu.matmul %85, %87, %cst_71 {dimension_numbers = #tpu.dot_dimension_numbers<[1], [0], [0], [1], [0, 0, 1, 1], [], []>} : vector<72x48xbf16>, vector<48x32xbf16>, vector<72x32xf32> -> vector<72x32xf32>
    %89 = arith.addf %83, %88 : vector<72x32xf32>
    %c0_72 = arith.constant 0 : index
    %c0_73 = arith.constant 0 : index
    %90 = vector.load %arg10[%c0_72, %c0_73] : memref<1x32xf32, #tpu.memory_space<vmem>>, vector<1x32xf32>
    %91 = vector.broadcast %90 : vector<1x32xf32> to vector<72x32xf32>
    %92 = arith.addf %89, %91 : vector<72x32xf32>
    %cst_74 = arith.constant 0.000000e+00 : f32
    %93 = vector.broadcast %cst_74 : f32 to vector<72x32xf32>
    %94 = arith.maximumf %92, %93 : vector<72x32xf32>
    %c0_75 = arith.constant 0 : index
    %c0_76 = arith.constant 0 : index
    %c0_77 = arith.constant 0 : index
    %95 = vector.load %arg11[%c0_75, %c0_76, %c0_77] : memref<2x32x32xf32, #tpu.memory_space<vmem>>, vector<1x32x32xf32>
    %96 = vector.shape_cast %95 : vector<1x32x32xf32> to vector<32x32xf32>
    %cst_78 = arith.constant dense<0.000000e+00> : vector<72x32xf32>
    %97 = tpu.matmul %94, %96, %cst_78 {dimension_numbers = #tpu.dot_dimension_numbers<[1], [0], [0], [1], [0, 0, 1, 1], [], []>} : vector<72x32xf32>, vector<32x32xf32>, vector<72x32xf32> -> vector<72x32xf32>
    %c1_79 = arith.constant 1 : index
    %c0_80 = arith.constant 0 : index
    %c0_81 = arith.constant 0 : index
    %98 = vector.load %arg11[%c1_79, %c0_80, %c0_81] : memref<2x32x32xf32, #tpu.memory_space<vmem>>, vector<1x32x32xf32>
    %99 = vector.shape_cast %98 : vector<1x32x32xf32> to vector<32x32xf32>
    %cst_82 = arith.constant dense<0.000000e+00> : vector<72x32xf32>
    %100 = tpu.matmul %94, %99, %cst_82 {dimension_numbers = #tpu.dot_dimension_numbers<[1], [0], [0], [1], [0, 0, 1, 1], [], []>} : vector<72x32xf32>, vector<32x32xf32>, vector<72x32xf32> -> vector<72x32xf32>
    %101 = arith.maximumf %97, %100 : vector<72x32xf32>
    %c0_83 = arith.constant 0 : index
    %c0_84 = arith.constant 0 : index
    %c0_85 = arith.constant 0 : index
    %102 = vector.load %arg12[%c0_83, %c0_84, %c0_85] : memref<2x50x72xf32, #tpu.memory_space<vmem>>, vector<1x50x72xf32>
    %103 = vector.shape_cast %102 : vector<1x50x72xf32> to vector<50x72xf32>
    %cst_86 = arith.constant dense<0.000000e+00> : vector<50x32xf32>
    %104 = tpu.matmul %103, %101, %cst_86 {dimension_numbers = #tpu.dot_dimension_numbers<[1], [0], [0], [1], [0, 0, 1, 1], [], []>} : vector<50x72xf32>, vector<72x32xf32>, vector<50x32xf32> -> vector<50x32xf32>
    %c1_87 = arith.constant 1 : index
    %c0_88 = arith.constant 0 : index
    %c0_89 = arith.constant 0 : index
    %105 = vector.load %arg12[%c1_87, %c0_88, %c0_89] : memref<2x50x72xf32, #tpu.memory_space<vmem>>, vector<1x50x72xf32>
    %106 = vector.shape_cast %105 : vector<1x50x72xf32> to vector<50x72xf32>
    %cst_90 = arith.constant dense<0.000000e+00> : vector<50x32xf32>
    %107 = tpu.matmul %106, %101, %cst_90 {dimension_numbers = #tpu.dot_dimension_numbers<[1], [0], [0], [1], [0, 0, 1, 1], [], []>} : vector<50x72xf32>, vector<72x32xf32>, vector<50x32xf32> -> vector<50x32xf32>
    %108 = arith.maximumf %104, %107 : vector<50x32xf32>
    %109 = vector.extract_strided_slice %108 {offsets = [0, 0], sizes = [48, 32], strides = [1, 1]} : vector<50x32xf32> to vector<48x32xf32>
    %110 = arith.truncf %109 : vector<48x32xf32> to vector<48x32xbf16>
    %c0_91 = arith.constant 0 : index
    %c0_92 = arith.constant 0 : index
    %c0_93 = arith.constant 0 : index
    %111 = vector.load %arg13[%c0_91, %c0_92, %c0_93] : memref<3x32x16xbf16, #tpu.memory_space<vmem>>, vector<1x32x16xbf16>
    %112 = vector.shape_cast %111 : vector<1x32x16xbf16> to vector<32x16xbf16>
    %cst_94 = arith.constant dense<0.000000e+00> : vector<48x16xf32>
    %113 = tpu.matmul %110, %112, %cst_94 {dimension_numbers = #tpu.dot_dimension_numbers<[1], [0], [0], [1], [0, 0, 1, 1], [], []>} : vector<48x32xbf16>, vector<32x16xbf16>, vector<48x16xf32> -> vector<48x16xf32>
    %114 = vector.extract_strided_slice %108 {offsets = [1, 0], sizes = [48, 32], strides = [1, 1]} : vector<50x32xf32> to vector<48x32xf32>
    %115 = arith.truncf %114 : vector<48x32xf32> to vector<48x32xbf16>
    %c1_95 = arith.constant 1 : index
    %c0_96 = arith.constant 0 : index
    %c0_97 = arith.constant 0 : index
    %116 = vector.load %arg13[%c1_95, %c0_96, %c0_97] : memref<3x32x16xbf16, #tpu.memory_space<vmem>>, vector<1x32x16xbf16>
    %117 = vector.shape_cast %116 : vector<1x32x16xbf16> to vector<32x16xbf16>
    %cst_98 = arith.constant dense<0.000000e+00> : vector<48x16xf32>
    %118 = tpu.matmul %115, %117, %cst_98 {dimension_numbers = #tpu.dot_dimension_numbers<[1], [0], [0], [1], [0, 0, 1, 1], [], []>} : vector<48x32xbf16>, vector<32x16xbf16>, vector<48x16xf32> -> vector<48x16xf32>
    %119 = arith.addf %113, %118 : vector<48x16xf32>
    %120 = vector.extract_strided_slice %108 {offsets = [2, 0], sizes = [48, 32], strides = [1, 1]} : vector<50x32xf32> to vector<48x32xf32>
    %121 = arith.truncf %120 : vector<48x32xf32> to vector<48x32xbf16>
    %c2_99 = arith.constant 2 : index
    %c0_100 = arith.constant 0 : index
    %c0_101 = arith.constant 0 : index
    %122 = vector.load %arg13[%c2_99, %c0_100, %c0_101] : memref<3x32x16xbf16, #tpu.memory_space<vmem>>, vector<1x32x16xbf16>
    %123 = vector.shape_cast %122 : vector<1x32x16xbf16> to vector<32x16xbf16>
    %cst_102 = arith.constant dense<0.000000e+00> : vector<48x16xf32>
    %124 = tpu.matmul %121, %123, %cst_102 {dimension_numbers = #tpu.dot_dimension_numbers<[1], [0], [0], [1], [0, 0, 1, 1], [], []>} : vector<48x32xbf16>, vector<32x16xbf16>, vector<48x16xf32> -> vector<48x16xf32>
    %125 = arith.addf %119, %124 : vector<48x16xf32>
    %c0_103 = arith.constant 0 : index
    %c0_104 = arith.constant 0 : index
    %126 = vector.load %arg14[%c0_103, %c0_104] : memref<1x16xf32, #tpu.memory_space<vmem>>, vector<1x16xf32>
    %127 = vector.broadcast %126 : vector<1x16xf32> to vector<48x16xf32>
    %128 = arith.addf %125, %127 : vector<48x16xf32>
    %cst_105 = arith.constant 0.000000e+00 : f32
    %129 = vector.broadcast %cst_105 : f32 to vector<48x16xf32>
    %130 = arith.maximumf %128, %129 : vector<48x16xf32>
    %c0_106 = arith.constant 0 : index
    %c0_107 = arith.constant 0 : index
    %c0_108 = arith.constant 0 : index
    %131 = vector.load %arg15[%c0_106, %c0_107, %c0_108] : memref<2x16x8xf32, #tpu.memory_space<vmem>>, vector<1x16x8xf32>
    %132 = vector.shape_cast %131 : vector<1x16x8xf32> to vector<16x8xf32>
    %cst_109 = arith.constant dense<0.000000e+00> : vector<48x8xf32>
    %133 = tpu.matmul %130, %132, %cst_109 {dimension_numbers = #tpu.dot_dimension_numbers<[1], [0], [0], [1], [0, 0, 1, 1], [], []>} : vector<48x16xf32>, vector<16x8xf32>, vector<48x8xf32> -> vector<48x8xf32>
    %c1_110 = arith.constant 1 : index
    %c0_111 = arith.constant 0 : index
    %c0_112 = arith.constant 0 : index
    %134 = vector.load %arg15[%c1_110, %c0_111, %c0_112] : memref<2x16x8xf32, #tpu.memory_space<vmem>>, vector<1x16x8xf32>
    %135 = vector.shape_cast %134 : vector<1x16x8xf32> to vector<16x8xf32>
    %cst_113 = arith.constant dense<0.000000e+00> : vector<48x8xf32>
    %136 = tpu.matmul %130, %135, %cst_113 {dimension_numbers = #tpu.dot_dimension_numbers<[1], [0], [0], [1], [0, 0, 1, 1], [], []>} : vector<48x16xf32>, vector<16x8xf32>, vector<48x8xf32> -> vector<48x8xf32>
    %137 = arith.maximumf %133, %136 : vector<48x8xf32>
    %c0_114 = arith.constant 0 : index
    %c0_115 = arith.constant 0 : index
    %c0_116 = arith.constant 0 : index
    %138 = vector.load %arg16[%c0_114, %c0_115, %c0_116] : memref<2x12x48xf32, #tpu.memory_space<vmem>>, vector<1x12x48xf32>
    %139 = vector.shape_cast %138 : vector<1x12x48xf32> to vector<12x48xf32>
    %cst_117 = arith.constant dense<0.000000e+00> : vector<12x8xf32>
    %140 = tpu.matmul %139, %137, %cst_117 {dimension_numbers = #tpu.dot_dimension_numbers<[1], [0], [0], [1], [0, 0, 1, 1], [], []>} : vector<12x48xf32>, vector<48x8xf32>, vector<12x8xf32> -> vector<12x8xf32>
    %c1_118 = arith.constant 1 : index
    %c0_119 = arith.constant 0 : index
    %c0_120 = arith.constant 0 : index
    %141 = vector.load %arg16[%c1_118, %c0_119, %c0_120] : memref<2x12x48xf32, #tpu.memory_space<vmem>>, vector<1x12x48xf32>
    %142 = vector.shape_cast %141 : vector<1x12x48xf32> to vector<12x48xf32>
    %cst_121 = arith.constant dense<0.000000e+00> : vector<12x8xf32>
    %143 = tpu.matmul %142, %137, %cst_121 {dimension_numbers = #tpu.dot_dimension_numbers<[1], [0], [0], [1], [0, 0, 1, 1], [], []>} : vector<12x48xf32>, vector<48x8xf32>, vector<12x8xf32> -> vector<12x8xf32>
    %144 = arith.maximumf %140, %143 : vector<12x8xf32>
    %c0_122 = arith.constant 0 : index
    %c0_123 = arith.constant 0 : index
    %145 = vector.load %arg19[%c0_122, %c0_123] : memref<12x8xf32, #tpu.memory_space<vmem>>, vector<12x8xf32>
    tpu.vector_store %arg19[%c0_122, %c0_123], %144 {strides = array<i32>} : memref<12x8xf32, #tpu.memory_space<vmem>>, vector<12x8xf32>,
    %c0_124 = arith.constant 0 : index
    %c0_125 = arith.constant 0 : index
    %146 = vector.load %arg17[%c0_124, %c0_125] : memref<3x12xf32, #tpu.memory_space<vmem>>, vector<3x12xf32>
    %cst_126 = arith.constant dense<0.000000e+00> : vector<3x8xf32>
    %147 = tpu.matmul %146, %144, %cst_126 {dimension_numbers = #tpu.dot_dimension_numbers<[1], [0], [0], [1], [0, 0, 1, 1], [], []>} : vector<3x12xf32>, vector<12x8xf32>, vector<3x8xf32> -> vector<3x8xf32>
    %c0_127 = arith.constant 0 : index
    %c0_128 = arith.constant 0 : index
    %148 = vector.load %arg18[%c0_127, %c0_128] : memref<6x12xf32, #tpu.memory_space<vmem>>, vector<6x12xf32>
    %cst_129 = arith.constant dense<0.000000e+00> : vector<6x8xf32>
    %149 = tpu.matmul %148, %144, %cst_129 {dimension_numbers = #tpu.dot_dimension_numbers<[1], [0], [0], [1], [0, 0, 1, 1], [], []>} : vector<6x12xf32>, vector<12x8xf32>, vector<6x8xf32> -> vector<6x8xf32>
    %cst_130 = arith.constant dense<0.000000e+00> : vector<6x3xf32>
    %150 = tpu.matmul %149, %147, %cst_130 {dimension_numbers = #tpu.dot_dimension_numbers<[1], [1], [0], [0], [0, 0, 1, 0], [], []>} : vector<6x8xf32>, vector<3x8xf32>, vector<6x3xf32> -> vector<6x3xf32>
    %151 = arith.mulf %149, %149 : vector<6x8xf32>
    %cst_131 = arith.constant dense<0.000000e+00> : vector<6xf32>
    %152 = vector.multi_reduction <add>, %151, %cst_131 [1] : vector<6x8xf32> to vector<6xf32>
    %153 = vector.shape_cast %152 : vector<6xf32> to vector<6x1xf32>
    %154 = arith.mulf %147, %147 : vector<3x8xf32>
    %cst_132 = arith.constant dense<0.000000e+00> : vector<3xf32>
    %155 = vector.multi_reduction <add>, %154, %cst_132 [1] : vector<3x8xf32> to vector<3xf32>
    %156 = vector.shape_cast %155 : vector<3xf32> to vector<1x3xf32>
    %cst_133 = arith.constant 2.000000e+00 : f32
    %157 = vector.broadcast %cst_133 : f32 to vector<6x3xf32>
    %158 = arith.mulf %157, %150 : vector<6x3xf32>
    %159 = vector.broadcast %153 : vector<6x1xf32> to vector<6x3xf32>
    %160 = arith.subf %158, %159 : vector<6x3xf32>
    %161 = vector.broadcast %156 : vector<1x3xf32> to vector<6x3xf32>
    %162 = arith.subf %160, %161 : vector<6x3xf32>
    %c0_134 = arith.constant 0 : index
    %c0_135 = arith.constant 0 : index
    %163 = vector.load %arg20[%c0_134, %c0_135] : memref<6x3xf32, #tpu.memory_space<vmem>>, vector<6x3xf32>
    tpu.vector_store %arg20[%c0_134, %c0_135], %162 {strides = array<i32>} : memref<6x3xf32, #tpu.memory_space<vmem>>, vector<6x3xf32>,
    return
  }
}

</mosaic_0001>

<bundles_post_ra>
// kernel: _lambda_.1
= control target key start
LH: loop header
LB: loop body
LE: loop exit
PB: predicated region body
PF: predicated region fallthrough
CT: control target
= control target key end

     0   :  { %vm299_vm0 = vcmask 1042432   ;;  %vm123_vm1 = vsmask.f32 7424  ;;  %vm256_vm2 = vcmask 441344   ;;  %vm666_vm3 = vcmask 1046528   ;;  %s9403_s1 = inlined_call_operand.vmem [shape: bf16[3,54,128], index: 1, kind: input, shape index: {}]   ;;  %s9404_s0 = inlined_call_operand.vmem [shape: f32[218,54], index: 0, kind: input, shape index: {}]   ;;  %s9405_s3 = inlined_call_operand.vmem [shape: f32[2,128,80], index: 3, kind: input, shape index: {}]   ;;  %s9406_s2 = inlined_call_operand.vmem [shape: f32[1,128], index: 2, kind: input, shape index: {}]   ;;  %s9407_s4 = inlined_call_operand.vmem [shape: f32[2,122,216], index: 4, kind: input, shape index: {}]   ;;  %s9408_s5 = inlined_call_operand.vmem [shape: bf16[3,80,64], index: 5, kind: input, shape index: {}]   ;;  %s9409_s7 = inlined_call_operand.vmem [shape: f32[2,64,48], index: 7, kind: input, shape index: {}]   ;;  %s9410_s6 = inlined_call_operand.vmem [shape: f32[1,64], index: 6, kind: input, shape index: {}]   ;;  %s9411_s8 = inlined_call_operand.vmem [shape: f32[2,74,120], index: 8, kind: input, shape index: {}]   ;;  %s9412_s9 = inlined_call_operand.vmem [shape: bf16[3,48,32], index: 9, kind: input, shape index: {}]   ;;  %s9413_s11 = inlined_call_operand.vmem [shape: f32[2,32,32], index: 11, kind: input, shape index: {}]   ;;  %s9414_s10 = inlined_call_operand.vmem [shape: f32[1,32], index: 10, kind: input, shape index: {}]   ;;  %s9415_s12 = inlined_call_operand.vmem [shape: f32[2,50,72], index: 12, kind: input, shape index: {}]   ;;  %s9416_s13 = inlined_call_operand.vmem [shape: bf16[3,32,16], index: 13, kind: input, shape index: {}]   ;;  %s9417_s15 = inlined_call_operand.vmem [shape: f32[2,16,8], index: 15, kind: input, shape index: {}]   ;;  %s9418_s14 = inlined_call_operand.vmem [shape: f32[1,16], index: 14, kind: input, shape index: {}]   ;;  %s9419_s16 = inlined_call_operand.vmem [shape: f32[2,12,48], index: 16, kind: input, shape index: {}]   ;;  %s9420_s19 = inlined_call_operand.vmem [shape: f32[12,8], index: 19, kind: output, shape index: {0}]   ;;  %s9421_s17 = inlined_call_operand.vmem [shape: f32[3,12], index: 17, kind: input, shape index: {}]   ;;  %s9422_s18 = inlined_call_operand.vmem [shape: f32[6,12], index: 18, kind: input, shape index: {}]   ;;  %s9423_s20 = inlined_call_operand.vmem [shape: f32[6,3], index: 20, kind: output, shape index: {1}]  }
   0x1   :  { %9428 = sst [smem:[#allocation2_spill]] %s9403_s1  ;;  %vm7349_vm4 = vmmov 0   ;;  %vm1484_vm5 = vcmask 719872   ;;  %vm2043_vm6 = vcmask 654336   ;;  %vm2551_vm7 = vcmask 523264  }
   0x2   :  { %9429 = sst [smem:[#allocation3_spill]] %s9404_s0  ;;  %s9433_s23 = sld [smem:[#allocation2_spill]]  ;;  %vm2911_vm8 = vcmask 982016   ;;  %vm3299_vm9 = vcmask 392192   ;;  %vm3652_vm10 = vcmask 261120   ;;  %vm3921_vm11 = vcmask 588800  }
   0x3   :  { %9430 = sst [smem:[#allocation4_spill]] %s9405_s3  ;;  %s9434_s28 = sld [smem:[#allocation3_spill]]  ;;  %vm4494_vm12 = vcmask 130048   ;;  %vm4883_vm13 = vcmask 60416   ;;  %vm4890_vm14 = vcmask 1043456   ;;  %vm4881_vm15 = vcmask 64512  }
   0x4   :  { %9431 = sst [smem:[#allocation5_spill]] %s9406_s2  ;;  %s9435_s24 = sld [smem:[#allocation4_spill]] }
   0x5   :  { %9432 = sst [smem:[#allocation6_spill]] %s9407_s4  ;;  %s9436_s27 = sld [smem:[#allocation5_spill]] }
   0x6   :  { %s9437_s21 = sld [smem:[#allocation6_spill]] }
   0x8   :  { %v7306_v0 = vld [vmem:[%s9433_s23 + $0x1c] sm:$0xff]   ;;  %v7307_v1 = vld [vmem:[%s9433_s23 + $0x24] sm:$0xff]   ;;  %v7308_v2 = vld [vmem:[%s9433_s23 + $0x2c] sm:$0xff]  }
   0x9   :  { %5972 = vmatprep.subr.bf16.mxu0 %v7306_v0  ;;  %v65_v3 = vld [vmem:[%s9434_s28] sm:$0xff]  ;;  %v66_v4 = vld [vmem:[%s9434_s28 + $0x8] sm:$0xff]  ;;  %v67_v5 = vld [vmem:[%s9434_s28 + $0x10] sm:$0xff] }
   0xa   :  { %5973 = vmatpush3.bf16.msra.mxu0 %v7306_v0  ;;  %v68_v6 = vld [vmem:[%s9434_s28 + $0x18] sm:$0xff]  ;;  %v7478_v7 = vpack.c.bf16 %v66_v4, %v65_v3  ;;  %v69_v9 = vld [vmem:[%s9434_s28 + $0x20] sm:$0xff]  ;;  %v70_v10 = vld [vmem:[%s9434_s28 + $0x28] sm:$0xff] }
   0xb   :  { %5974 = vmatprep.subr.bf16.mxu0 %v7307_v1  ;;  %v7480_v8 = vpack.c.bf16 %v68_v6, %v67_v5  ;;  %v71_v11 = vld [vmem:[%s9434_s28 + $0x30] sm:$0xff]  ;;  %v7494_v13 = vpack.c.bf16 %v70_v10, %v69_v9  ;;  %v72_v14 = vld [vmem:[%s9434_s28 + $0x38] sm:$0xff]  ;;  %v73_v15 = vld [vmem:[%s9434_s28 + $0x40] sm:$0xff] }
   0xc   :  { %v7309_v12 = vld [vmem:[%s9433_s23 + $0x34] ss:$0 sps:$4 sm:$0x77]   ;;  %v74_v16 = vld [vmem:[%s9434_s28 + $0x48] sm:$0xff]  ;;  %v125_v17 = vshrl.u32 %v7478_v7, 16  ;;  %v127_v18 = vshll.u32 %v7478_v7, 16  ;;  %v7510_v22 = vpack.c.bf16 %v72_v14, %v71_v11 }
   0xd   :  { %v132_v19 = vshll.u32 %v7480_v8, 16  ;;  %v136_v20 = vshrl.u32 %v7480_v8, 16  ;;  %v140_v21 = vshll.u32 %v7494_v13, 16  ;;  %v144_v23 = vshrl.u32 %v7494_v13, 16  ;;  %v75_v26 = vld [vmem:[%s9434_s28 + $0x50] sm:$0xff]  ;;  %v76_v27 = vld [vmem:[%s9434_s28 + $0x58] sm:$0xff] }
   0xe   :  { %5975 = vmatpush3.bf16.msra.mxu0 %v7307_v1  ;;  %v129_v24 = vrot.slane %v127_v18, 1  ;;  %v148_v29 = vshll.u32 %v7510_v22, 16  ;;  %v7520_v30 = vpack.c.bf16 %v74_v16, %v73_v15  ;;  %v301_v33 = vsel %vm299_vm0, %v7309_v12, 0  ;;  %v7310_v36 = vld [vmem:[%s9433_s23] sm:$0xff]   ;;  %v78_v43 = vld [vmem:[%s9434_s28 + $0x68] sm:$0xff]  ;;  %v79_v48 = vld [vmem:[%s9434_s28 + $0x70] sm:$0xff] }
   0xf   :  { %5976 = vmatprep.subr.bf16.mxu0 %v7308_v2  ;;  %v134_v25 = vrot.slane %v132_v19, 1  ;;  %v142_v28 = vrot.slane %v140_v21, 1  ;;  %v7527_v37 = vpack.c.bf16 %v76_v27, %v75_v26  ;;  %v152_v41 = vshrl.u32 %v7510_v22, 16  ;;  %v77_v42 = vld [vmem:[%s9434_s28 + $0x60] sm:$0xff]  ;;  %v7311_v47 = vld [vmem:[%s9433_s23 + $0x8] sm:$0xff]   ;;  %v80_v49 = vld [vmem:[%s9434_s28 + $0x78] sm:$0xff] }
  0x10   :  { %v130_v31 = vor.u32 %v129_v24, %v125_v17  ;;  %v150_v35 = vrot.slane %v148_v29, 1  ;;  %v156_v39 = vshll.u32 %v7520_v30, 16  ;;  %v160_v45 = vshrl.u32 %v7520_v30, 16  ;;  %v7312_v56 = vld [vmem:[%s9433_s23 + $0x10] sm:$0xff]   ;;  %v81_v60 = vld [vmem:[%s9434_s28 + $0x80] sm:$0xff]  ;;  %v82_v61 = vld [vmem:[%s9434_s28 + $0x88] sm:$0xff] }
  0x11   :  { %v138_v32 = vor.u32 %v136_v20, %v134_v25  ;;  %v146_v34 = vor.u32 %v144_v23, %v142_v28  ;;  %v164_v46 = vshll.u32 %v7527_v37, 16  ;;  %v7553_v51 = vpack.c.bf16 %v78_v43, %v77_v42  ;;  %v7313_v1 = vld [vmem:[%s9433_s23 + $0x18] ss:$0 sps:$4 sm:$0x77]   ;;  %v85_v18 = vld [vmem:[%s9434_s28 + $0xa0] sm:$0xff]  ;;  %v86_v19 = vld [vmem:[%s9434_s28 + $0xa8] sm:$0xff] }
  0x12   :  { %5977 = vmatpush3.bf16.msra.mxu0 %v7308_v2  ;;  %v135_v38 = vsel %vm123_vm1, %v130_v31, %v134_v25  ;;  %v158_v50 = vrot.slane %v156_v39, 1  ;;  %v154_v52 = vor.u32 %v152_v41, %v150_v35  ;;  %v7556_v55 = vpack.c.bf16 %v80_v49, %v79_v48  ;;  %v83_v2 = vld [vmem:[%s9434_s28 + $0x90] sm:$0xff]  ;;  %v84_v3 = vld [vmem:[%s9434_s28 + $0x98] sm:$0xff] }
  0x13   :  { %7299 = vmatprep.subr.msk.bf16.mxu0 %vm299_vm0, %v7309_v12  ;;  %5980 = vmatprep.mubr.msk.bf16.mxu0 %vm256_vm2, %v135_v38  ;;  %v143_v40 = vsel %vm123_vm1, %v138_v32, %v142_v28  ;;  %v151_v44 = vsel %vm123_vm1, %v146_v34, %v150_v35  ;;  %v166_v54 = vrot.slane %v164_v46, 1  ;;  %v172_v57 = vshll.u32 %v7553_v51, 16  ;;  %v7314_v14 = vld [vmem:[%s9433_s23 + $0x38] sm:$0xff]   ;;  %v87_v24 = vld [vmem:[%s9434_s28 + $0xb0] sm:$0xff]  ;;  %v90_v38 = vld [vmem:[%s9434_s28 + $0xc8] sm:$0xff] }
  0x14   :  { %v162_v53 = vor.u32 %v160_v45, %v158_v50  ;;  %v159_v58 = vsel %vm123_vm1, %v154_v52, %v158_v50  ;;  %v168_v59 = vshrl.u32 %v7527_v37, 16  ;;  %v176_v63 = vshrl.u32 %v7553_v51, 16  ;;  %v88_v25 = vld [vmem:[%s9434_s28 + $0xb8] sm:$0xff]  ;;  %v91_v42 = vld [vmem:[%s9434_s28 + $0xd0] sm:$0xff] }
  0x15   :  { %v180_v0 = vshll.u32 %v7556_v55, 16  ;;  %v174_v4 = vrot.slane %v172_v57, 1  ;;  %v7583_v5 = vpack.c.bf16 %v82_v61, %v81_v60  ;;  %v7586_v11 = vpack.c.bf16 %v84_v3, %v83_v2  ;;  %v92_v43 = vld [vmem:[%s9434_s28 + $0xd8] sm:$0x3]  ;;  %v7315_v2 = vld [vmem:[%s9433_s23 + $0x40] sm:$0xff]   ;;  %v7316_v3 = vld [vmem:[%s9433_s23 + $0x48] sm:$0xff]  }
  0x16   :  { %5979 = vmatpush3.bf16.msra.mxu0 %v301_v33  ;;  %v167_v62 = vsel %vm123_vm1, %v162_v53, %v166_v54  ;;  %v170_v6 = vor.u32 %v168_v59, %v166_v54  ;;  %v498_v12 = vsel %vm299_vm0, %v7313_v1, 0  ;;  %v184_v17 = vshrl.u32 %v7556_v55, 16 }
  0x17   :  { %6008 = vmatprep.subr.bf16.mxu0 %v7310_v36  ;;  %v178_v9 = vor.u32 %v176_v63, %v174_v4  ;;  %v182_v10 = vrot.slane %v180_v0, 1  ;;  %v188_v15 = vshll.u32 %v7583_v5, 16  ;;  %v192_v21 = vshrl.u32 %v7583_v5, 16 }
  0x18   :  { %v175_v16 = vsel %vm123_vm1, %v170_v6, %v174_v4  ;;  %v196_v23 = vshll.u32 %v7586_v11, 16  ;;  %v7612_v27 = vpack.c.bf16 %v86_v19, %v85_v18  ;;  %v7615_v32 = vpack.c.bf16 %v88_v25, %v87_v24  ;;  %v7317_v4 = vld [vmem:[%s9433_s23 + $0x50] ss:$0 sps:$4 sm:$0x77]  }
  0x19   :  { %5981 = vmatmul.mubr.msk.bf16.vlgmr.msra.gmra.mrb[0].mxu0 %vm256_vm2, %v143_v40  ;;  %v183_v20 = vsel %vm123_vm1, %v178_v9, %v182_v10  ;;  %v190_v26 = vrot.slane %v188_v15, 1  ;;  %v186_v28 = vor.u32 %v184_v17, %v182_v10  ;;  %v200_v35 = vshrl.u32 %v7586_v11, 16 }
  0x1a   :  { %5984 = vmatprep.mubr.msk.bf16.mxu0 %vm256_vm2, %v151_v44  ;;  %6009 = vmatpush3.bf16.msra.mxu0 %v7310_v36  ;;  %v198_v31 = vrot.slane %v196_v23, 1  ;;  %v204_v33 = vshll.u32 %v7612_v27, 16  ;;  %v89_v36 = vld [vmem:[%s9434_s28 + $0xc0] sm:$0xff]  ;;  %v208_v40 = vshrl.u32 %v7612_v27, 16  ;;  %v212_v41 = vshll.u32 %v7615_v32, 16 }
  0x1b   :  { %6010 = vmatprep.subr.bf16.mxu0 %v7311_v47  ;;  %v194_v29 = vor.u32 %v192_v21, %v190_v26  ;;  %v191_v34 = vsel %vm123_vm1, %v186_v28, %v190_v26  ;;  %v7636_v45 = vpack.c.bf16 %v90_v38, %v89_v36  ;;  %v7639_v49 = vpack.c.bf16 %v92_v43, %v91_v42  ;;  %v995_v28 = vld [vmem:[%s9435_s24 + $0x18] sm:$0xff]  ;;  %v1000_v43 = vld [vmem:[%s9435_s24 + $0x40] sm:$0xff] }
  0x1c   :  { %v206_v44 = vrot.slane %v204_v33, 1  ;;  %v202_v46 = vor.u32 %v200_v35, %v198_v31  ;;  %v214_v48 = vrot.slane %v212_v41, 1  ;;  %v216_v53 = vshrl.u32 %v7615_v32, 16  ;;  %v997_v35 = vld [vmem:[%s9435_s24 + $0x28] sm:$0xff] }
  0x1d   :  { %v199_v39 = vsel %vm123_vm1, %v194_v29, %v198_v31  ;;  %v220_v50 = vshll.u32 %v7636_v45, 16  ;;  %v228_v57 = vshll.u32 %v7639_v49, 16  ;;  %v232_v0 = vshrl.u32 %v7639_v49, 16 }
  0x1e   :  { %6011 = vmatpush3.bf16.msra.mxu0 %v7311_v47  ;;  %v210_v47 = vor.u32 %v208_v40, %v206_v44  ;;  %v207_v52 = vsel %vm123_vm1, %v202_v46, %v206_v44  ;;  %v218_v59 = vor.u32 %v216_v53, %v214_v48  ;;  %v758_v6 = vsel %vm299_vm0, %v7317_v4, 0  ;;  %v1001_v44 = vld [vmem:[%s9435_s24 + $0x48] sm:$0xff] }
  0x1f   :  { %6012 = vmatprep.subr.bf16.mxu0 %v7312_v56  ;;  %v230_v61 = vrot.slane %v228_v57, 1  ;;  %v667_v9 = vrot.slane %v7478_v7, 1  ;;  %v668_v10 = vrot.slane %v7480_v8, 1  ;;  %v670_v15 = vrot.slane %v7494_v13, 1  ;;  %v1005_v53 = vld [vmem:[%s9435_s24 + $0x68] sm:$0xff]  ;;  %v1007_v57 = vld [vmem:[%s9435_s24 + $0x78] sm:$0xff] }
  0x20   :  { %v215_v54 = vsel %vm123_vm1, %v210_v47, %v214_v48  ;;  %v7348_v26 = vmov 0.0|0.0   ;;  %v686_v29 = vrot.slane %v7612_v27, 1  ;;  %v688_v31 = vrot.slane %v7615_v32, 1  ;;  %v1002_v48 = vld [vmem:[%s9435_s24 + $0x50] sm:$0xff] }
  0x21   :  { %5985 = vmatmul.mubr.msk.bf16.gmra.mrb[4].mxu0 %vm256_vm2, %v159_v58  ;;  %v222_v58 = vrot.slane %v220_v50, 1  ;;  %v671_v17 = vsel %vm666_vm3, %v668_v10, %v670_v15  ;;  %6945 = vmatprep.subr.bf16.mxu1 %v7348_v26  ;;  %v690_v40 = vrot.slane %v7636_v45, 1  ;;  %v692_v41 = vrot.slane %v7639_v49, 1  ;;  %v1003_v49 = vld [vmem:[%s9435_s24 + $0x58] sm:$0xff] }
  0x22   :  { %5988 = vmatprep.mubr.msk.bf16.mxu0 %vm256_vm2, %v167_v62  ;;  %6013 = vmatpush3.bf16.msra.mxu0 %v7312_v56  ;;  %v224_v56 = vshrl.u32 %v7636_v45, 16  ;;  %v689_v38 = vsel %vm666_vm3, %v686_v29, %v688_v31  ;;  %v6961_v50 = vpack.c.bf16 %v1003_v49, %v1002_v48 }
  0x23   :  { %7300 = vmatprep.subr.msk.bf16.mxu0 %vm299_vm0, %v7313_v1  ;;  %v223_v62 = vsel %vm123_vm1, %v218_v59, %v222_v58  ;;  %v234_v1 = vor.u32 %v232_v0, %v230_v61  ;;  %v691_v46 = vsel %vm666_vm3, %v688_v31, %v690_v40  ;;  %v693_v47 = vsel %vm666_vm3, %v690_v40, %v692_v41  ;;  %v5228_v31 = vld [vmem:[%s9435_s24 + $0xb0] sm:$0xff] }
  0x24   :  { %v226_v60 = vor.u32 %v224_v56, %v222_v58  ;;  %v1006_v56 = vld [vmem:[%s9435_s24 + $0x70] sm:$0xff]  ;;  %v7350_v59 = vmov 0.0  }
  0x25   :  { %v6967_v58 = vpack.c.bf16 %v1007_v57, %v1006_v56  ;;  %6112 = vmatprep.mubr.msk.f32.mxu1 %vm7349_vm4, %v7350_v59 }
  0x26   :  { %6015 = vmatpush3.bf16.msra.mxu0 %v498_v12  ;;  %v231_v63 = vsel %vm123_vm1, %v226_v60, %v230_v61  ;;  %v106_v12 = vpack.c.bf16 %v91_v42, %v91_v42 }
  0x27   :  { %6044 = vmatprep.subr.bf16.mxu0 %v7314_v14 }
  0x29   :  { %5989 = vmatmul.mubr.msk.bf16.gmra.mrb[8].mxu0 %vm256_vm2, %v175_v16  ;;  %v672_v16 = vrot.slane %v7510_v22, 1 }
  0x2a   :  { %5992 = vmatprep.mubr.msk.bf16.mxu0 %vm256_vm2, %v183_v20 }
  0x2b   :  { %v673_v18 = vsel %vm666_vm3, %v670_v15, %v672_v16  ;;  %v5223_v15 = vld [vmem:[%s9435_s24 + $0x88] sm:$0xff] }
  0x31   :  { %5993 = vmatmul.mubr.msk.bf16.gmra.mrb[12].mxu0 %vm256_vm2, %v191_v34  ;;  %v996_v34 = vld [vmem:[%s9435_s24 + $0x20] sm:$0xff] }
  0x32   :  { %5996 = vmatprep.mubr.msk.bf16.mxu0 %vm256_vm2, %v199_v39  ;;  %v999_v39 = vld [vmem:[%s9435_s24 + $0x38] sm:$0xff] }
  0x39   :  { %5997 = vmatmul.mubr.msk.bf16.gmra.mrb[16].mxu0 %vm256_vm2, %v207_v52  ;;  %v1004_v52 = vld [vmem:[%s9435_s24 + $0x60] sm:$0xff] }
  0x3a   :  { %6000 = vmatprep.mubr.msk.bf16.mxu0 %vm256_vm2, %v215_v54  ;;  %v6964_v54 = vpack.c.bf16 %v1005_v53, %v1004_v52  ;;  %v5234_v52 = vld [vmem:[%s9435_s24 + $0xe0] sm:$0xff]  ;;  %v5235_v53 = vld [vmem:[%s9435_s24 + $0xe8] sm:$0xff] }
  0x41   :  { %6001 = vmatmul.mubr.msk.bf16.gmra.mrb[20].mxu0 %vm256_vm2, %v223_v62 }
  0x42   :  { %6004 = vmatprep.mubr.msk.bf16.mxu0 %vm256_vm2, %v231_v63 }
  0x49   :  { %6005 = vmatmul.mubr.msk.bf16.gmra.mrb[24].mxu0 %vm256_vm2, %v234_v1 }
  0x4a   :  { %6016 = vmatprep.mubr.msk.bf16.mxu0 %vm256_vm2, %v7478_v7  ;;  %v674_v7 = vrot.slane %v7520_v30, 1 }
  0x4c   :  { %v675_v19 = vsel %vm666_vm3, %v672_v16, %v674_v7 }
  0x51   :  { %6017 = vmatmul.mubr.msk.bf16.vlgmr.msra.gmra.mrb[0].mxu0 %vm256_vm2, %v7480_v8  ;;  %v676_v8 = vrot.slane %v7527_v37, 1 }
  0x52   :  { %6020 = vmatprep.mubr.msk.bf16.mxu0 %vm256_vm2, %v7494_v13  ;;  %6045 = vmatpush3.bf16.msra.mxu0 %v7314_v14  ;;  %v669_v14 = vsel %vm666_vm3, %v667_v9, %v668_v10  ;;  %v678_v13 = vrot.slane %v7553_v51, 1  ;;  %v7803_v10 = vld [vmem:[%s9436_s27] ss:$0 sm:$0xff] }
  0x53   :  { %6046 = vmatprep.subr.bf16.mxu0 %v7315_v2  ;;  %v677_v20 = vsel %vm666_vm3, %v674_v7, %v676_v8 }
  0x54   :  { %v679_v21 = vsel %vm666_vm3, %v676_v8, %v678_v13 }
  0x56   :  { %6047 = vmatpush3.bf16.msra.mxu0 %v7315_v2 }
  0x57   :  { %6048 = vmatprep.subr.bf16.mxu0 %v7316_v3 }
  0x59   :  { %6021 = vmatmul.mubr.msk.bf16.gmra.mrb[4].mxu0 %vm256_vm2, %v7510_v22  ;;  %v680_v22 = vrot.slane %v7556_v55, 1 }
  0x5a   :  { %6024 = vmatprep.mubr.msk.bf16.mxu0 %vm256_vm2, %v7520_v30  ;;  %6049 = vmatpush3.bf16.msra.mxu0 %v7316_v3  ;;  %v682_v30 = vrot.slane %v7583_v5, 1 }
  0x5b   :  { %7301 = vmatprep.subr.msk.bf16.mxu0 %vm299_vm0, %v7317_v4  ;;  %v681_v23 = vsel %vm666_vm3, %v678_v13, %v680_v22  ;;  %v5224_v13 = vld [vmem:[%s9435_s24 + $0x90] sm:$0xff]  ;;  %vm7351_vm0 = vmmov 1  }
  0x5c   :  { %v683_v24 = vsel %vm666_vm3, %v680_v22, %v682_v30  ;;  %v5225_v22 = vld [vmem:[%s9435_s24 + $0x98] sm:$0xff] }
  0x5e   :  { %6051 = vmatpush3.bf16.msra.mxu0 %v758_v6 }
  0x5f   :  { %6993 = vmatprep.subr.bf16.mxu0 %v7348_v26 }
  0x61   :  { %6025 = vmatmul.mubr.msk.bf16.gmra.mrb[8].mxu0 %vm256_vm2, %v7527_v37  ;;  %v684_v37 = vrot.slane %v7586_v11, 1 }
  0x62   :  { %6028 = vmatprep.mubr.msk.bf16.mxu0 %vm256_vm2, %v7553_v51  ;;  %v992_v51 = vld [vmem:[%s9435_s24] sm:$0xff] }
  0x63   :  { %v685_v25 = vsel %vm666_vm3, %v682_v30, %v684_v37  ;;  %v687_v36 = vsel %vm666_vm3, %v684_v37, %v686_v29 }
  0x69   :  { %6029 = vmatmul.mubr.msk.bf16.gmra.mrb[12].mxu0 %vm256_vm2, %v7556_v55  ;;  %v993_v55 = vld [vmem:[%s9435_s24 + $0x8] sm:$0xff] }
  0x6a   :  { %6032 = vmatprep.mubr.msk.bf16.mxu0 %vm256_vm2, %v7583_v5  ;;  %v994_v5 = vld [vmem:[%s9435_s24 + $0x10] sm:$0xff] }
  0x6b   :  { %v6949_v33 = vpack.c.bf16 %v995_v28, %v994_v5 }
  0x71   :  { %6033 = vmatmul.mubr.msk.bf16.gmra.mrb[16].mxu0 %vm256_vm2, %v7586_v11  ;;  %v6946_v11 = vpack.c.bf16 %v993_v55, %v992_v51 }
  0x72   :  { %6036 = vmatprep.mubr.msk.bf16.mxu0 %vm256_vm2, %v7612_v27  ;;  %v6952_v27 = vpack.c.bf16 %v997_v35, %v996_v34 }
  0x73   :  { %6947 = vmatpush3.bf16.msra.mxu1 %v6946_v11 }
  0x74   :  { %6948 = vmatprep.subr.bf16.mxu1 %v7348_v26 }
  0x77   :  { %6950 = vmatpush3.bf16.msra.mxu1 %v6949_v33  ;;  %v5229_v33 = vld [vmem:[%s9435_s24 + $0xb8] sm:$0xff] }
  0x78   :  { %6951 = vmatprep.subr.bf16.mxu1 %v7348_v26  ;;  %v6979_v34 = vpack.c.bf16 %v5229_v33, %v5228_v31 }
  0x79   :  { %6037 = vmatmul.mubr.msk.bf16.gmra.mrb[20].mxu0 %vm256_vm2, %v7615_v32  ;;  %v998_v32 = vld [vmem:[%s9435_s24 + $0x30] sm:$0xff] }
  0x7a   :  { %6040 = vmatprep.mubr.msk.bf16.mxu0 %vm256_vm2, %v7636_v45  ;;  %v6955_v42 = vpack.c.bf16 %v999_v39, %v998_v32  ;;  %v6958_v45 = vpack.c.bf16 %v1001_v44, %v1000_v43  ;;  %v5231_v32 = vld [vmem:[%s9435_s24 + $0xc8] sm:$0xff] }
  0x7b   :  { %6953 = vmatpush3.bf16.msra.mxu1 %v6952_v27  ;;  %v5230_v27 = vld [vmem:[%s9435_s24 + $0xc0] sm:$0xff] }
  0x7c   :  { %6954 = vmatprep.subr.bf16.mxu1 %v7348_v26 }
  0x7f   :  { %6956 = vmatpush3.bf16.msra.mxu1 %v6955_v42  ;;  %v6982_v42 = vpack.c.bf16 %v5231_v32, %v5230_v27 }
  0x80   :  { %6957 = vmatprep.subr.bf16.mxu1 %v7348_v26 }
  0x81   :  { %6041 = vmatmul.mubr.msk.bf16.gmra.mrb[28].mxu0 %vm256_vm2, %v106_v12 }
  0x82   :  { %6052 = vmatprep.mubr.msk.bf16.mxu0 %vm256_vm2, %v669_v14  ;;  %v5222_v14 = vld [vmem:[%s9435_s24 + $0x80] sm:$0xff] }
  0x83   :  { %6959 = vmatpush3.bf16.msra.mxu1 %v6958_v45  ;;  %v6970_v8 = vpack.c.bf16 %v5223_v15, %v5222_v14 }
  0x84   :  { %6960 = vmatprep.subr.bf16.mxu1 %v7348_v26 }
  0x87   :  { %6962 = vmatpush3.bf16.msra.mxu1 %v6961_v50 }
  0x88   :  { %6963 = vmatprep.subr.bf16.mxu1 %v7348_v26 }
  0x89   :  { %6053 = vmatmul.mubr.msk.bf16.vlgmr.msra.gmra.mrb[0].mxu0 %vm256_vm2, %v671_v17 }
  0x8a   :  { %6056 = vmatprep.mubr.msk.bf16.mxu0 %vm256_vm2, %v673_v18 }
  0x8b   :  { %6965 = vmatpush3.bf16.msra.mxu1 %v6964_v54 }
  0x8c   :  { %6966 = vmatprep.subr.bf16.mxu1 %v7348_v26 }
  0x8f   :  { %6968 = vmatpush3.bf16.msra.mxu1 %v6967_v58  ;;  %v6988_v58 = vpack.c.bf16 %v5235_v53, %v5234_v52 }
  0x90   :  { %6969 = vmatprep.subr.bf16.mxu1 %v7348_v26 }
  0x91   :  { %6057 = vmatmul.mubr.msk.bf16.gmra.mrb[4].mxu0 %vm256_vm2, %v675_v19 }
  0x92   :  { %6060 = vmatprep.mubr.msk.bf16.mxu0 %vm256_vm2, %v677_v20 }
  0x99   :  { %6061 = vmatmul.mubr.msk.bf16.gmra.mrb[8].mxu0 %vm256_vm2, %v679_v21  ;;  %v6973_v21 = vpack.c.bf16 %v5225_v22, %v5224_v13 }
  0x9a   :  { %6064 = vmatprep.mubr.msk.bf16.mxu0 %vm256_vm2, %v681_v23 }
  0xa1   :  { %6065 = vmatmul.mubr.msk.bf16.gmra.mrb[12].mxu0 %vm256_vm2, %v683_v24  ;;  %v5226_v24 = vld [vmem:[%s9435_s24 + $0xa0] sm:$0xff] }
  0xa2   :  { %6068 = vmatprep.mubr.msk.bf16.mxu0 %vm256_vm2, %v685_v25  ;;  %v5227_v25 = vld [vmem:[%s9435_s24 + $0xa8] sm:$0xff] }
  0xa3   :  { %v6976_v11 = vpack.c.bf16 %v5227_v25, %v5226_v24 }
  0xa9   :  { %6069 = vmatmul.mubr.msk.bf16.gmra.mrb[16].mxu0 %vm256_vm2, %v687_v36 }
  0xaa   :  { %6072 = vmatprep.mubr.msk.bf16.mxu0 %vm256_vm2, %v689_v38 }
  0xb1   :  { %6073 = vmatmul.mubr.msk.bf16.gmra.mrb[20].mxu0 %vm256_vm2, %v691_v46  ;;  %v5232_v46 = vld [vmem:[%s9435_s24 + $0xd0] sm:$0xff] }
  0xb2   :  { %6076 = vmatprep.mubr.msk.bf16.mxu0 %vm256_vm2, %v693_v47  ;;  %v5233_v47 = vld [vmem:[%s9435_s24 + $0xd8] sm:$0xff] }
  0xb3   :  { %v6985_v45 = vpack.c.bf16 %v5233_v47, %v5232_v46 }
  0xb9   :  { %6077 = vmatmul.mubr.msk.bf16.gmra.mrb[32].mxu0 %vm256_vm2, %v692_v41  ;;  %vm4886_vm2 = vcmask 97280  }
 0x11c   :  { %v6006_v60 = vpop.f32.mrb[24].mxu0 }
 0x11d   :  { %v433_v61 = vpop.f32.mrb[25].mxu0 }
 0x11e   :  { %v6007_v62 = vpop.f32.mrb[26].mxu0 }
 0x11f   :  { %v436_v63 = vpop.f32.mrb[27].mxu0  ;;  %v5236_v62 = vld [vmem:[%s9435_s24 + $0xf0] sm:$0xff] }
 0x154   :  { %v6042_v0 = vpop.f32.mrb[28].mxu0 }
 0x155   :  { %v7794_v1 = vadd.f32 %v6042_v0, %v6006_v60  ;;  %v630_v2 = vpop.f32.mrb[29].mxu0 }
 0x156   :  { %v7796_v3 = vadd.f32 %v630_v2, %v433_v61  ;;  %v6043_v4 = vpop.f32.mrb[30].mxu0 }
 0x157   :  { %v633_v6 = vpop.f32.mrb[31].mxu0 }
 0x158   :  { %v7798_v9 = vadd.f32 %v633_v6, %v436_v63  ;;  %v5237_v63 = vld [vmem:[%s9435_s24 + $0xf8] sm:$0xff] }
 0x159   :  { %v6991_v0 = vpack.c.bf16 %v5237_v63, %v5236_v62 }
 0x15c   :  { %v6054_v12 = vpop.f32.mrb[0].mxu0 }
 0x15d   :  { %v794_v16 = vpop.f32.mrb[1].mxu0  ;;  %v7829_v23 = vadd.f32 %v6054_v12, %v7803_v10 }
 0x15e   :  { %v7812_v17 = vadd.f32 %v7803_v10, %v794_v16  ;;  %v6055_v18 = vpop.f32.mrb[2].mxu0 }
 0x15f   :  { %v797_v7 = vpop.f32.mrb[3].mxu0  ;;  %v967_v28 = vmax.f32 %v7829_v23, 0.0  ;;  %v7845_v29 = vadd.f32 %v6055_v18, %v7803_v10 }
 0x160   :  { %v965_v19 = vmax.f32 %v7812_v17, 0.0  ;;  %v7816_v20 = vadd.f32 %v7803_v10, %v797_v7 }
 0x161   :  { %v968_v35 = vmax.f32 %v7845_v29, 0.0 }
 0x162   :  { %6113 = vmatmul.mubr.f32.vlgmr.msra.gmra.mrb[0].mxu1 %v965_v19  ;;  %v966_v30 = vmax.f32 %v7816_v20, 0.0 }
 0x163   :  { %6115 = vmatprep.mubr.msk.f32.mxu1 %vm7349_vm4, %v7350_v59  ;;  %6971 = vmatpush3.bf16.msra.mxu1 %v6970_v8 }
 0x164   :  { %v6058_v37 = vpop.f32.mrb[4].mxu0  ;;  %6972 = vmatprep.subr.bf16.mxu1 %v7348_v26 }
 0x165   :  { %v810_v51 = vpop.f32.mrb[5].mxu0  ;;  %v7891_v48 = vadd.f32 %v6058_v37, %v7803_v10 }
 0x166   :  { %v6059_v55 = vpop.f32.mrb[6].mxu0  ;;  %6116 = vmatmul.mubr.f32.gmra.mrb[2].mxu1 %v966_v30  ;;  %v7860_v36 = vadd.f32 %v7803_v10, %v810_v51 }
 0x167   :  { %v813_v5 = vpop.f32.mrb[7].mxu0  ;;  %6118 = vmatprep.mubr.msk.f32.mxu1 %vm7349_vm4, %v7350_v59  ;;  %6974 = vmatpush3.bf16.msra.mxu1 %v6973_v21  ;;  %v971_v60 = vmax.f32 %v7891_v48, 0.0  ;;  %v7911_v61 = vadd.f32 %v6059_v55, %v7803_v10 }
 0x168   :  { %6975 = vmatprep.subr.bf16.mxu1 %v7348_v26  ;;  %v969_v43 = vmax.f32 %v7860_v36, 0.0  ;;  %v7877_v44 = vadd.f32 %v7803_v10, %v813_v5 }
 0x169   :  { %v972_v2 = vmax.f32 %v7911_v61, 0.0 }
 0x16a   :  { %6119 = vmatmul.mubr.f32.gmra.mrb[4].mxu1 %v967_v28  ;;  %v970_v49 = vmax.f32 %v7877_v44, 0.0 }
 0x16b   :  { %6121 = vmatprep.mubr.msk.f32.mxu1 %vm7349_vm4, %v7350_v59  ;;  %6977 = vmatpush3.bf16.msra.mxu1 %v6976_v11 }
 0x16c   :  { %v6062_v38 = vpop.f32.mrb[8].mxu0  ;;  %6978 = vmatprep.subr.bf16.mxu1 %v7348_v26 }
 0x16d   :  { %v826_v39 = vpop.f32.mrb[9].mxu0  ;;  %v7954_v21 = vadd.f32 %v6062_v38, %v7803_v10 }
 0x16e   :  { %v7869_v40 = vpop.f32.mrb[10].mxu0  ;;  %6122 = vmatmul.mubr.f32.gmra.mrb[6].mxu1 %v968_v35  ;;  %v7926_v4 = vadd.f32 %v7803_v10, %v826_v39 }
 0x16f   :  { %v829_v41 = vpop.f32.mrb[11].mxu0  ;;  %6124 = vmatprep.mubr.msk.f32.mxu1 %vm7349_vm4, %v7350_v59  ;;  %6980 = vmatpush3.bf16.msra.mxu1 %v6979_v34  ;;  %v975_v33 = vmax.f32 %v7954_v21, 0.0  ;;  %v7973_v34 = vadd.f32 %v7869_v40, %v7803_v10 }
 0x170   :  { %6981 = vmatprep.subr.bf16.mxu1 %v7348_v26  ;;  %v973_v8 = vmax.f32 %v7926_v4, 0.0  ;;  %v7944_v13 = vadd.f32 %v7803_v10, %v829_v41 }
 0x171   :  { %v976_v27 = vmax.f32 %v7973_v34, 0.0 }
 0x172   :  { %6125 = vmatmul.mubr.f32.gmra.mrb[8].mxu1 %v969_v43  ;;  %v974_v37 = vmax.f32 %v7944_v13, 0.0 }
 0x173   :  { %6127 = vmatprep.mubr.msk.f32.mxu1 %vm7349_vm4, %v7350_v59  ;;  %6983 = vmatpush3.bf16.msra.mxu1 %v6982_v42 }
 0x174   :  { %v7894_v50 = vpop.f32.mrb[12].mxu0  ;;  %6984 = vmatprep.subr.bf16.mxu1 %v7348_v26 }
 0x175   :  { %v842_v54 = vpop.f32.mrb[13].mxu0 }
 0x176   :  { %v7903_v56 = vpop.f32.mrb[14].mxu0  ;;  %6128 = vmatmul.mubr.f32.gmra.mrb[10].mxu1 %v970_v49  ;;  %v7984_v32 = vadd.f32 %v7803_v10, %v842_v54 }
 0x177   :  { %v845_v57 = vpop.f32.mrb[15].mxu0  ;;  %6130 = vmatprep.mubr.msk.f32.mxu1 %vm7349_vm4, %v7350_v59  ;;  %6986 = vmatpush3.bf16.msra.mxu1 %v6985_v45  ;;  %v8022_v62 = vadd.f32 %v7903_v56, %v7803_v10 }
 0x178   :  { %6987 = vmatprep.subr.bf16.mxu1 %v7348_v26  ;;  %v977_v52 = vmax.f32 %v7984_v32, 0.0  ;;  %v7997_v53 = vadd.f32 %v7803_v10, %v845_v57 }
 0x17a   :  { %6131 = vmatmul.mubr.f32.gmra.mrb[12].mxu1 %v971_v60  ;;  %v978_v57 = vmax.f32 %v7997_v53, 0.0 }
 0x17b   :  { %6133 = vmatprep.mubr.msk.f32.mxu1 %vm7349_vm4, %v7350_v59  ;;  %6989 = vmatpush3.bf16.msra.mxu1 %v6988_v58  ;;  %v8012_v58 = vadd.f32 %v7894_v50, %v7803_v10  ;;  %v980_v50 = vmax.f32 %v8022_v62, 0.0 }
 0x17c   :  { %v6070_v6 = vpop.f32.mrb[16].mxu0  ;;  %6990 = vmatprep.subr.bf16.mxu1 %v7348_v26 }
 0x17d   :  { %v7930_v12 = vadd.f32 %v6070_v6, %v7803_v10  ;;  %v858_v14 = vpop.f32.mrb[17].mxu0 }
 0x17e   :  { %v7933_v15 = vadd.f32 %v7803_v10, %v858_v14  ;;  %v6071_v16 = vpop.f32.mrb[18].mxu0  ;;  %6134 = vmatmul.mubr.f32.gmra.mrb[14].mxu1 %v972_v2 }
 0x17f   :  { %v7938_v18 = vadd.f32 %v6071_v16, %v7803_v10  ;;  %v861_v7 = vpop.f32.mrb[19].mxu0  ;;  %6136 = vmatprep.mubr.msk.f32.mxu1 %vm7349_vm4, %v7350_v59  ;;  %6992 = vmatpush3.bf16.msra.mxu1 %v6991_v0  ;;  %v983_v56 = vmax.f32 %v7930_v12, 0.0 }
 0x180   :  { %v7947_v22 = vadd.f32 %v7803_v10, %v861_v7  ;;  %v981_v63 = vmax.f32 %v7933_v15, 0.0 }
 0x181   :  { %v984_v0 = vmax.f32 %v7938_v18, 0.0 }
 0x182   :  { %6137 = vmatmul.mubr.f32.gmra.mrb[16].mxu1 %v973_v8 }
 0x183   :  { %6139 = vmatprep.mubr.msk.f32.mxu1 %vm7349_vm4, %v7350_v59 }
 0x184   :  { %v6074_v24 = vpop.f32.mrb[20].mxu0 }
 0x185   :  { %v7958_v25 = vadd.f32 %v6074_v24, %v7803_v10  ;;  %v874_v51 = vpop.f32.mrb[21].mxu0 }
 0x186   :  { %v7961_v55 = vadd.f32 %v7803_v10, %v874_v51  ;;  %v6075_v5 = vpop.f32.mrb[22].mxu0  ;;  %6140 = vmatmul.mubr.f32.gmra.mrb[18].mxu1 %v974_v37 }
 0x187   :  { %v7966_v11 = vadd.f32 %v6075_v5, %v7803_v10  ;;  %v877_v31 = vpop.f32.mrb[23].mxu0  ;;  %6142 = vmatprep.mubr.msk.f32.mxu1 %vm7349_vm4, %v7350_v59  ;;  %v987_v16 = vmax.f32 %v7958_v25, 0.0 }
 0x188   :  { %v7976_v38 = vadd.f32 %v7803_v10, %v877_v31  ;;  %v985_v6 = vmax.f32 %v7961_v55, 0.0 }
 0x189   :  { %v988_v18 = vmax.f32 %v7966_v11, 0.0 }
 0x18a   :  { %6143 = vmatmul.mubr.f32.gmra.mrb[20].mxu1 %v975_v33  ;;  %v986_v14 = vmax.f32 %v7976_v38, 0.0 }
 0x18b   :  { %6145 = vmatprep.mubr.msk.f32.mxu1 %vm7349_vm4, %v7350_v59 }
 0x18c   :  { %v6078_v39 = vpop.f32.mrb[32].mxu0 }
 0x18d   :  { %v930_v41 = vadd.f32 %v6078_v39, %v7794_v1  ;;  %v890_v42 = vpop.f32.mrb[33].mxu0 }
 0x18e   :  { %v928_v40 = vadd.f32 %v890_v42, %v7796_v3  ;;  %v6079_v46 = vpop.f32.mrb[34].mxu0  ;;  %6146 = vmatmul.mubr.f32.gmra.mrb[22].mxu1 %v976_v27 }
 0x18f   :  { %v7991_v47 = vadd.f32 %v7803_v10, %v930_v41  ;;  %v893_v45 = vpop.f32.mrb[35].mxu0  ;;  %6148 = vmatprep.mubr.msk.f32.mxu1 %vm7349_vm4, %v7350_v59 }
 0x190   :  { %v8000_v1 = vadd.f32 %v7803_v10, %v928_v40  ;;  %v929_v3 = vadd.f32 %v893_v45, %v7798_v9  ;;  %v979_v9 = vmax.f32 %v8012_v58, 0.0 }
 0x191   :  { %v991_v25 = vmax.f32 %v7991_v47, 0.0 }
 0x192   :  { %v8004_v54 = vadd.f32 %v7803_v10, %v929_v3  ;;  %6149 = vmatmul.mubr.f32.gmra.mrb[24].mxu1 %v977_v52  ;;  %v982_v10 = vmax.f32 %v7947_v22, 0.0  ;;  %v989_v7 = vmax.f32 %v8000_v1, 0.0 }
 0x193   :  { %6151 = vmatprep.mubr.msk.f32.mxu1 %vm7349_vm4, %v7350_v59 }
 0x194   :  { %v990_v24 = vmax.f32 %v8004_v54, 0.0  ;;  %v1453_v54 = vld [vmem:[%s9437_s21 + $0x8] sm:$0xff] }
 0x195   :  { %5238 = vmatprep.mubr.msk.f32.mxu0 %vm1484_vm5, %v1453_v54 }
 0x196   :  { %6152 = vmatmul.mubr.f32.gmra.mrb[26].mxu1 %v978_v57 }
 0x197   :  { %6154 = vmatprep.mubr.msk.f32.mxu1 %vm7349_vm4, %v7350_v59 }
 0x19a   :  { %6155 = vmatmul.mubr.f32.gmra.mrb[28].mxu1 %v979_v9 }
 0x19b   :  { %6157 = vmatprep.mubr.msk.f32.mxu1 %vm7349_vm4, %v7350_v59 }
 0x19e   :  { %6158 = vmatmul.mubr.f32.gmra.mrb[30].mxu1 %v980_v50 }
 0x19f   :  { %6160 = vmatprep.mubr.msk.f32.mxu1 %vm7349_vm4, %v7350_v59 }
 0x1a2   :  { %6161 = vmatmul.mubr.f32.gmra.mrb[32].mxu1 %v981_v63 }
 0x1a3   :  { %6163 = vmatprep.mubr.msk.f32.mxu1 %vm7349_vm4, %v7350_v59 }
 0x1a6   :  { %6164 = vmatmul.mubr.f32.gmra.mrb[34].mxu1 %v982_v10 }
 0x1a7   :  { %6166 = vmatprep.mubr.msk.f32.mxu1 %vm7349_vm4, %v7350_v59 }
 0x1aa   :  { %6167 = vmatmul.mubr.f32.gmra.mrb[36].mxu1 %v983_v56 }
 0x1ab   :  { %6169 = vmatprep.mubr.msk.f32.mxu1 %vm7349_vm4, %v7350_v59 }
 0x1ae   :  { %6170 = vmatmul.mubr.f32.gmra.mrb[38].mxu1 %v984_v0 }
 0x1af   :  { %6172 = vmatprep.mubr.msk.f32.mxu1 %vm7349_vm4, %v7350_v59 }
 0x1b2   :  { %6173 = vmatmul.mubr.f32.gmra.mrb[40].mxu1 %v985_v6 }
 0x1b3   :  { %6175 = vmatprep.mubr.msk.f32.mxu1 %vm7349_vm4, %v7350_v59 }
 0x1b6   :  { %6176 = vmatmul.mubr.f32.gmra.mrb[42].mxu1 %v986_v14 }
 0x1b7   :  { %6178 = vmatprep.mubr.msk.f32.mxu1 %vm7349_vm4, %v7350_v59 }
 0x1ba   :  { %6179 = vmatmul.mubr.f32.gmra.mrb[44].mxu1 %v987_v16 }
 0x1bb   :  { %6181 = vmatprep.mubr.msk.f32.mxu1 %vm7349_vm4, %v7350_v59 }
 0x1be   :  { %6182 = vmatmul.mubr.f32.gmra.mrb[46].mxu1 %v988_v18 }
 0x1bf   :  { %6184 = vmatprep.mubr.msk.f32.mxu1 %vm7349_vm4, %v7350_v59 }
 0x1c2   :  { %6185 = vmatmul.mubr.f32.gmra.mrb[48].mxu1 %v989_v7 }
 0x1c3   :  { %6187 = vmatprep.mubr.msk.f32.mxu1 %vm7349_vm4, %v7350_v59 }
 0x1c6   :  { %6188 = vmatmul.mubr.f32.gmra.mrb[50].mxu1 %v990_v24 }
 0x1c7   :  { %6190 = vmatprep.mubr.msk.f32.mxu1 %vm7349_vm4, %v7350_v59 }
 0x1ca   :  { %6191 = vmatmul.mubr.f32.gmra.mrb[52].mxu1 %v991_v25 }
 0x1cb   :  { %6225 = vmatprep.mubr.msk.f32.mxu1 %vm7349_vm4, %v7350_v59 }
 0x1ce   :  { %6226 = vmatmul.mubr.f32.vlgmr.msra.gmra.mrb[54].mxu1 %v965_v19 }
 0x1cf   :  { %6228 = vmatprep.mubr.msk.f32.mxu1 %vm7349_vm4, %v7350_v59 }
 0x1d2   :  { %6229 = vmatmul.mubr.f32.gmra.mrb[56].mxu1 %v966_v30 }
 0x1d3   :  { %6231 = vmatprep.mubr.msk.f32.mxu1 %vm7349_vm4, %v7350_v59 }
 0x1d6   :  { %6232 = vmatmul.mubr.f32.gmra.mrb[58].mxu1 %v967_v28 }
 0x1d7   :  { %6234 = vmatprep.mubr.msk.f32.mxu1 %vm7349_vm4, %v7350_v59 }
 0x1da   :  { %6235 = vmatmul.mubr.f32.gmra.mrb[60].mxu1 %v968_v35 }
 0x1db   :  { %6237 = vmatprep.mubr.msk.f32.mxu1 %vm7349_vm4, %v7350_v59 }
 0x1de   :  { %6238 = vmatmul.mubr.f32.gmra.mrb[62].mxu1 %v969_v43 }
 0x1df   :  { %6240 = vmatprep.mubr.msk.f32.mxu1 %vm7349_vm4, %v7350_v59 }
 0x1e2   :  { %6241 = vmatmul.mubr.f32.gmra.mrb[64].mxu1 %v970_v49 }
 0x1e3   :  { %6243 = vmatprep.mubr.msk.f32.mxu1 %vm7349_vm4, %v7350_v59 }
 0x1e6   :  { %6244 = vmatmul.mubr.f32.gmra.mrb[66].mxu1 %v971_v60 }
 0x1e7   :  { %6246 = vmatprep.mubr.msk.f32.mxu1 %vm7349_vm4, %v7350_v59 }
 0x1ea   :  { %6247 = vmatmul.mubr.f32.gmra.mrb[68].mxu1 %v972_v2 }
 0x1eb   :  { %6249 = vmatprep.mubr.msk.f32.mxu1 %vm7349_vm4, %v7350_v59 }
 0x1ee   :  { %6250 = vmatmul.mubr.f32.gmra.mrb[70].mxu1 %v973_v8 }
 0x1ef   :  { %6252 = vmatprep.mubr.msk.f32.mxu1 %vm7349_vm4, %v7350_v59 }
 0x1f2   :  { %6253 = vmatmul.mubr.f32.gmra.mrb[72].mxu1 %v974_v37 }
 0x1f3   :  { %6255 = vmatprep.mubr.msk.f32.mxu1 %vm7349_vm4, %v7350_v59 }
 0x1f6   :  { %6256 = vmatmul.mubr.f32.gmra.mrb[74].mxu1 %v975_v33 }
 0x1f7   :  { %6258 = vmatprep.mubr.msk.f32.mxu1 %vm7349_vm4, %v7350_v59 }
 0x1fa   :  { %6259 = vmatmul.mubr.f32.gmra.mrb[76].mxu1 %v976_v27 }
 0x1fb   :  { %6261 = vmatprep.mubr.msk.f32.mxu1 %vm7349_vm4, %v7350_v59 }
 0x1fe   :  { %6262 = vmatmul.mubr.f32.gmra.mrb[78].mxu1 %v977_v52 }
 0x1ff   :  { %6264 = vmatprep.mubr.msk.f32.mxu1 %vm7349_vm4, %v7350_v59 }
 0x202   :  { %6265 = vmatmul.mubr.f32.gmra.mrb[80].mxu1 %v978_v57 }
 0x203   :  { %6267 = vmatprep.mubr.msk.f32.mxu1 %vm7349_vm4, %v7350_v59 }
 0x206   :  { %6268 = vmatmul.mubr.f32.gmra.mrb[82].mxu1 %v979_v9 }
 0x207   :  { %6270 = vmatprep.mubr.msk.f32.mxu1 %vm7349_vm4, %v7350_v59 }
 0x20a   :  { %6271 = vmatmul.mubr.f32.gmra.mrb[84].mxu1 %v980_v50 }
 0x20b   :  { %6273 = vmatprep.mubr.msk.f32.mxu1 %vm7349_vm4, %v7350_v59 }
 0x20e   :  { %6274 = vmatmul.mubr.f32.gmra.mrb[86].mxu1 %v981_v63 }
 0x20f   :  { %6276 = vmatprep.mubr.msk.f32.mxu1 %vm7349_vm4, %v7350_v59 }
 0x212   :  { %6277 = vmatmul.mubr.f32.gmra.mrb[88].mxu1 %v982_v10 }
 0x213   :  { %6279 = vmatprep.mubr.msk.f32.mxu1 %vm7349_vm4, %v7350_v59 }
 0x216   :  { %6280 = vmatmul.mubr.f32.gmra.mrb[90].mxu1 %v983_v56 }
 0x217   :  { %6282 = vmatprep.mubr.msk.f32.mxu1 %vm7349_vm4, %v7350_v59 }
 0x21a   :  { %6283 = vmatmul.mubr.f32.gmra.mrb[92].mxu1 %v984_v0 }
 0x21b   :  { %6285 = vmatprep.mubr.msk.f32.mxu1 %vm7349_vm4, %v7350_v59 }
 0x21e   :  { %6286 = vmatmul.mubr.f32.gmra.mrb[94].mxu1 %v985_v6 }
 0x21f   :  { %6288 = vmatprep.mubr.msk.f32.mxu1 %vm7349_vm4, %v7350_v59 }
 0x222   :  { %6289 = vmatmul.mubr.f32.gmra.mrb[96].mxu1 %v986_v14 }
 0x223   :  { %6291 = vmatprep.mubr.msk.f32.mxu1 %vm7349_vm4, %v7350_v59 }
 0x226   :  { %6292 = vmatmul.mubr.f32.gmra.mrb[98].mxu1 %v987_v16 }
 0x227   :  { %6294 = vmatprep.mubr.msk.f32.mxu1 %vm7349_vm4, %v7350_v59 }
 0x22a   :  { %6295 = vmatmul.mubr.f32.gmra.mrb[100].mxu1 %v988_v18 }
 0x22b   :  { %6297 = vmatprep.mubr.msk.f32.mxu1 %vm7349_vm4, %v7350_v59 }
 0x22e   :  { %6298 = vmatmul.mubr.f32.gmra.mrb[102].mxu1 %v989_v7 }
 0x22f   :  { %6300 = vmatprep.mubr.msk.f32.mxu1 %vm7349_vm4, %v7350_v59 }
 0x232   :  { %6301 = vmatmul.mubr.f32.gmra.mrb[104].mxu1 %v990_v24 }
 0x233   :  { %6303 = vmatprep.mubr.msk.f32.mxu1 %vm7349_vm4, %v7350_v59 }
 0x235   :  { %v8162_v17 = vpop.f32.mrb[0].mxu1 }
 0x236   :  { %v6114_v19 = vpop.f32.mrb[1].mxu1  ;;  %6304 = vmatmul.mubr.f32.gmra.mrb[106].mxu1 %v991_v25 }
 0x239   :  { %v8164_v20 = vpop.f32.mrb[2].mxu1 }
 0x23a   :  { %v6117_v23 = vpop.f32.mrb[3].mxu1 }
 0x23d   :  { %v8166_v30 = vpop.f32.mrb[4].mxu1 }
 0x23e   :  { %v6120_v28 = vpop.f32.mrb[5].mxu1 }
 0x241   :  { %v8168_v29 = vpop.f32.mrb[6].mxu1 }
 0x242   :  { %v6123_v35 = vpop.f32.mrb[7].mxu1 }
 0x245   :  { %v8170_v36 = vpop.f32.mrb[8].mxu1 }
 0x246   :  { %v6126_v43 = vpop.f32.mrb[9].mxu1 }
 0x249   :  { %v8172_v44 = vpop.f32.mrb[10].mxu1 }
 0x24a   :  { %v6129_v48 = vpop.f32.mrb[11].mxu1 }
 0x24d   :  { %v8174_v49 = vpop.f32.mrb[12].mxu1 }
 0x24e   :  { %v6132_v60 = vpop.f32.mrb[13].mxu1 }
 0x251   :  { %v8176_v61 = vpop.f32.mrb[14].mxu1 }
 0x252   :  { %v6135_v2 = vpop.f32.mrb[15].mxu1 }
 0x255   :  { %v8178_v4 = vpop.f32.mrb[16].mxu1 }
 0x256   :  { %v6138_v12 = vpop.f32.mrb[17].mxu1 }
 0x259   :  { %v8180_v15 = vpop.f32.mrb[18].mxu1 }
 0x25a   :  { %v6141_v8 = vpop.f32.mrb[19].mxu1 }
 0x25d   :  { %v8182_v13 = vpop.f32.mrb[20].mxu1 }
 0x25e   :  { %v6144_v22 = vpop.f32.mrb[21].mxu1 }
 0x261   :  { %v8184_v21 = vpop.f32.mrb[22].mxu1 }
 0x262   :  { %v6147_v37 = vpop.f32.mrb[23].mxu1 }
 0x265   :  { %v8186_v51 = vpop.f32.mrb[24].mxu1 }
 0x266   :  { %v6150_v55 = vpop.f32.mrb[25].mxu1 }
 0x269   :  { %v8188_v5 = vpop.f32.mrb[26].mxu1 }
 0x26a   :  { %v6153_v11 = vpop.f32.mrb[27].mxu1 }
 0x26d   :  { %v8190_v31 = vpop.f32.mrb[28].mxu1 }
 0x26e   :  { %v6156_v33 = vpop.f32.mrb[29].mxu1 }
 0x271   :  { %v8192_v34 = vpop.f32.mrb[30].mxu1 }
 0x272   :  { %v6159_v38 = vpop.f32.mrb[31].mxu1 }
 0x275   :  { %v8194_v27 = vpop.f32.mrb[32].mxu1 }
 0x276   :  { %v6162_v32 = vpop.f32.mrb[33].mxu1 }
 0x279   :  { %v8196_v39 = vpop.f32.mrb[34].mxu1 }
 0x27a   :  { %v6165_v41 = vpop.f32.mrb[35].mxu1 }
 0x27d   :  { %v8198_v42 = vpop.f32.mrb[36].mxu1 }
 0x27e   :  { %v6168_v40 = vpop.f32.mrb[37].mxu1 }
 0x281   :  { %v8200_v46 = vpop.f32.mrb[38].mxu1 }
 0x282   :  { %v6171_v47 = vpop.f32.mrb[39].mxu1 }
 0x285   :  { %v8202_v45 = vpop.f32.mrb[40].mxu1 }
 0x286   :  { %v6174_v52 = vpop.f32.mrb[41].mxu1 }
 0x289   :  { %v8204_v53 = vpop.f32.mrb[42].mxu1 }
 0x28a   :  { %v6177_v1 = vpop.f32.mrb[43].mxu1 }
 0x28d   :  { %v8206_v3 = vpop.f32.mrb[44].mxu1 }
 0x28e   :  { %v6180_v58 = vpop.f32.mrb[45].mxu1 }
 0x291   :  { %v8212_v57 = vpop.f32.mrb[46].mxu1 }
 0x292   :  { %v6183_v9 = vpop.f32.mrb[47].mxu1 }
 0x295   :  { %v8214_v62 = vpop.f32.mrb[48].mxu1 }
 0x296   :  { %v6186_v50 = vpop.f32.mrb[49].mxu1 }
 0x299   :  { %v8216_v63 = vpop.f32.mrb[50].mxu1 }
 0x29a   :  { %v6189_v10 = vpop.f32.mrb[51].mxu1 }
 0x29d   :  { %v8218_v56 = vpop.f32.mrb[52].mxu1 }
 0x29e   :  { %v6192_v0 = vpop.f32.mrb[53].mxu1 }
 0x2a1   :  { %v1291_v6 = vpop.f32.mrb[54].mxu1 }
 0x2a2   :  { %v1425_v14 = vmax.f32 %v8162_v17, %v1291_v6  ;;  %v6227_v16 = vpop.f32.mrb[55].mxu1 }
 0x2a5   :  { %v1296_v18 = vpop.f32.mrb[56].mxu1 }
 0x2a6   :  { %v1426_v7 = vmax.f32 %v8164_v20, %v1296_v18  ;;  %v6230_v24 = vpop.f32.mrb[57].mxu1 }
 0x2a8   :  { %v8222_v25 = vpack.c.bf16 %v1426_v7, %v1425_v14 }
 0x2a9   :  { %v1301_v19 = vpop.f32.mrb[58].mxu1 }
 0x2aa   :  { %v1427_v23 = vmax.f32 %v8166_v30, %v1301_v19  ;;  %v6233_v28 = vpop.f32.mrb[59].mxu1  ;;  %6995 = vmatpush1.bf16.msra.mxu0 %v8222_v25 }
 0x2ab   :  { %6996 = vmatprep.subr.bf16.mxu0 %v7348_v26 }
 0x2ad   :  { %v1306_v35 = vpop.f32.mrb[60].mxu1 }
 0x2ae   :  { %v1428_v43 = vmax.f32 %v8168_v29, %v1306_v35  ;;  %v6236_v48 = vpop.f32.mrb[61].mxu1 }
 0x2b0   :  { %v8228_v17 = vpack.c.bf16 %v1428_v43, %v1427_v23 }
 0x2b1   :  { %v1311_v60 = vpop.f32.mrb[62].mxu1 }
 0x2b2   :  { %v1429_v20 = vmax.f32 %v8170_v36, %v1311_v60  ;;  %v6239_v2 = vpop.f32.mrb[63].mxu1  ;;  %6998 = vmatpush1.bf16.msra.mxu0 %v8228_v17 }
 0x2b3   :  { %6999 = vmatprep.subr.bf16.mxu0 %v7348_v26 }
 0x2b5   :  { %v1316_v30 = vpop.f32.mrb[64].mxu1 }
 0x2b6   :  { %v1430_v12 = vmax.f32 %v8172_v44, %v1316_v30  ;;  %v6242_v8 = vpop.f32.mrb[65].mxu1 }
 0x2b8   :  { %v8234_v22 = vpack.c.bf16 %v1430_v12, %v1429_v20 }
 0x2b9   :  { %v1321_v37 = vpop.f32.mrb[66].mxu1 }
 0x2ba   :  { %v1431_v29 = vmax.f32 %v8174_v49, %v1321_v37  ;;  %v6245_v55 = vpop.f32.mrb[67].mxu1  ;;  %7001 = vmatpush1.bf16.msra.mxu0 %v8234_v22 }
 0x2bb   :  { %7002 = vmatprep.subr.bf16.mxu0 %v7348_v26 }
 0x2bd   :  { %v1326_v36 = vpop.f32.mrb[68].mxu1 }
 0x2be   :  { %v1432_v11 = vmax.f32 %v8176_v61, %v1326_v36  ;;  %v6248_v33 = vpop.f32.mrb[69].mxu1 }
 0x2c0   :  { %v8240_v38 = vpack.c.bf16 %v1432_v11, %v1431_v29 }
 0x2c1   :  { %v1331_v32 = vpop.f32.mrb[70].mxu1 }
 0x2c2   :  { %v1433_v44 = vmax.f32 %v8178_v4, %v1331_v32  ;;  %v6251_v41 = vpop.f32.mrb[71].mxu1  ;;  %7004 = vmatpush1.bf16.msra.mxu0 %v8240_v38 }
 0x2c3   :  { %7005 = vmatprep.subr.bf16.mxu0 %v7348_v26 }
 0x2c5   :  { %v1336_v49 = vpop.f32.mrb[72].mxu1 }
 0x2c6   :  { %v1434_v40 = vmax.f32 %v8180_v15, %v1336_v49  ;;  %v6254_v47 = vpop.f32.mrb[73].mxu1 }
 0x2c8   :  { %v8246_v52 = vpack.c.bf16 %v1434_v40, %v1433_v44 }
 0x2c9   :  { %v1341_v1 = vpop.f32.mrb[74].mxu1 }
 0x2ca   :  { %v1435_v61 = vmax.f32 %v8182_v13, %v1341_v1  ;;  %v6257_v54 = vpop.f32.mrb[75].mxu1  ;;  %7007 = vmatpush1.bf16.msra.mxu0 %v8246_v52 }
 0x2cb   :  { %7008 = vmatprep.subr.bf16.mxu0 %v7348_v26 }
 0x2cd   :  { %v1346_v4 = vpop.f32.mrb[76].mxu1 }
 0x2ce   :  { %v1436_v58 = vmax.f32 %v8184_v21, %v1346_v4  ;;  %v6260_v9 = vpop.f32.mrb[77].mxu1 }
 0x2cf   :  { %v1457_v9 = vld [vmem:[%s9437_s21 + $0x28] sm:$0xff] }
 0x2d0   :  { %v8252_v50 = vpack.c.bf16 %v1436_v58, %v1435_v61 }
 0x2d1   :  { %v1351_v10 = vpop.f32.mrb[78].mxu1 }
 0x2d2   :  { %v1437_v15 = vmax.f32 %v8186_v51, %v1351_v10  ;;  %v6263_v0 = vpop.f32.mrb[79].mxu1  ;;  %7010 = vmatpush1.bf16.msra.mxu0 %v8252_v50  ;;  %v1459_v10 = vld [vmem:[%s9437_s21 + $0x38] sm:$0xff] }
 0x2d3   :  { %7011 = vmatprep.subr.bf16.mxu0 %v7348_v26  ;;  %v1463_v0 = vld [vmem:[%s9437_s21 + $0x58] sm:$0xff] }
 0x2d5   :  { %v1356_v13 = vpop.f32.mrb[80].mxu1 }
 0x2d6   :  { %v1438_v6 = vmax.f32 %v8188_v5, %v1356_v13  ;;  %v6266_v14 = vpop.f32.mrb[81].mxu1  ;;  %v1465_v13 = vld [vmem:[%s9437_s21 + $0x68] sm:$0xff] }
 0x2d7   :  { %v1469_v14 = vld [vmem:[%s9437_s21 + $0x88] sm:$0xff] }
 0x2d8   :  { %v8258_v16 = vpack.c.bf16 %v1438_v6, %v1437_v15  ;;  %v1461_v15 = vld [vmem:[%s9437_s21 + $0x48] sm:$0xff]  ;;  %v1467_v6 = vld [vmem:[%s9437_s21 + $0x78] sm:$0xff] }
 0x2d9   :  { %v1361_v18 = vpop.f32.mrb[82].mxu1 }
 0x2da   :  { %v1439_v21 = vmax.f32 %v8190_v31, %v1361_v18  ;;  %v6269_v7 = vpop.f32.mrb[83].mxu1  ;;  %7013 = vmatpush1.bf16.msra.mxu0 %v8258_v16  ;;  %v1471_v18 = vld [vmem:[%s9437_s21 + $0x98] sm:$0xff] }
 0x2db   :  { %7014 = vmatprep.subr.bf16.mxu0 %v7348_v26  ;;  %v1473_v7 = vld [vmem:[%s9437_s21 + $0xa8] sm:$0xff] }
 0x2dd   :  { %v1366_v51 = vpop.f32.mrb[84].mxu1 }
 0x2de   :  { %v1440_v24 = vmax.f32 %v8192_v34, %v1366_v51  ;;  %v6272_v19 = vpop.f32.mrb[85].mxu1  ;;  %v1472_v51 = vld [vmem:[%s9437_s21 + $0xa0] sm:$0xff] }
 0x2df   :  { %v1474_v19 = vld [vmem:[%s9437_s21 + $0xb0] sm:$0xff] }
 0x2e0   :  { %v8264_v23 = vpack.c.bf16 %v1440_v24, %v1439_v21  ;;  %v1470_v21 = vld [vmem:[%s9437_s21 + $0x90] sm:$0xff]  ;;  %v1475_v24 = vld [vmem:[%s9437_s21 + $0xb8] sm:$0xff] }
 0x2e1   :  { %v1371_v28 = vpop.f32.mrb[86].mxu1 }
 0x2e2   :  { %v1441_v5 = vmax.f32 %v8194_v27, %v1371_v28  ;;  %v6275_v35 = vpop.f32.mrb[87].mxu1  ;;  %7016 = vmatpush1.bf16.msra.mxu0 %v8264_v23  ;;  %v1476_v28 = vld [vmem:[%s9437_s21 + $0xc0] sm:$0xff] }
 0x2e3   :  { %7017 = vmatprep.subr.bf16.mxu0 %v7348_v26  ;;  %v1478_v35 = vld [vmem:[%s9437_s21 + $0xd0] sm:$0xff] }
 0x2e5   :  { %v1376_v31 = vpop.f32.mrb[88].mxu1 }
 0x2e6   :  { %v1442_v43 = vmax.f32 %v8196_v39, %v1376_v31  ;;  %v6278_v48 = vpop.f32.mrb[89].mxu1  ;;  %v1481_v31 = vld [vmem:[%s9437_s21 + $0xe8] sm:$0xff] }
 0x2e7   :  { %v1483_v48 = vld [vmem:[%s9437_s21 + $0xf8] sm:$0x3] }
 0x2e8   :  { %v8270_v60 = vpack.c.bf16 %v1442_v43, %v1441_v5  ;;  %v1479_v5 = vld [vmem:[%s9437_s21 + $0xd8] sm:$0xff]  ;;  %v1480_v43 = vld [vmem:[%s9437_s21 + $0xe0] sm:$0xff] }
 0x2e9   :  { %v1381_v20 = vpop.f32.mrb[90].mxu1 }
 0x2ea   :  { %v1443_v34 = vmax.f32 %v8198_v42, %v1381_v20  ;;  %v6281_v2 = vpop.f32.mrb[91].mxu1  ;;  %7019 = vmatpush1.bf16.msra.mxu0 %v8270_v60  ;;  %v5255_v20 = vld [vmem:[%s9437_s21 + $0x108] sm:$0xff] }
 0x2eb   :  { %7020 = vmatprep.subr.bf16.mxu0 %v7348_v26  ;;  %v5257_v2 = vld [vmem:[%s9437_s21 + $0x118] sm:$0xff] }
 0x2ed   :  { %v1386_v27 = vpop.f32.mrb[92].mxu1 }
 0x2ee   :  { %v1444_v30 = vmax.f32 %v8200_v46, %v1386_v27  ;;  %v6284_v12 = vpop.f32.mrb[93].mxu1  ;;  %v5256_v27 = vld [vmem:[%s9437_s21 + $0x110] sm:$0xff] }
 0x2ef   :  { %v5258_v12 = vld [vmem:[%s9437_s21 + $0x120] sm:$0xff] }
 0x2f0   :  { %v8276_v8 = vpack.c.bf16 %v1444_v30, %v1443_v34  ;;  %v5254_v34 = vld [vmem:[%s9437_s21 + $0x100] sm:$0xff]  ;;  %v5259_v30 = vld [vmem:[%s9437_s21 + $0x128] sm:$0xff] }
 0x2f1   :  { %v1391_v37 = vpop.f32.mrb[94].mxu1 }
 0x2f2   :  { %v1445_v39 = vmax.f32 %v8202_v45, %v1391_v37  ;;  %v6287_v29 = vpop.f32.mrb[95].mxu1  ;;  %7022 = vmatpush1.bf16.msra.mxu0 %v8276_v8  ;;  %v5260_v37 = vld [vmem:[%s9437_s21 + $0x130] sm:$0xff] }
 0x2f3   :  { %7023 = vmatprep.subr.bf16.mxu0 %v7348_v26  ;;  %v5262_v29 = vld [vmem:[%s9437_s21 + $0x140] sm:$0xff] }
 0x2f5   :  { %v1396_v42 = vpop.f32.mrb[96].mxu1 }
 0x2f6   :  { %v1446_v55 = vmax.f32 %v8204_v53, %v1396_v42  ;;  %v6290_v36 = vpop.f32.mrb[97].mxu1  ;;  %v5265_v42 = vld [vmem:[%s9437_s21 + $0x158] sm:$0xff] }
 0x2f7   :  { %v5267_v36 = vld [vmem:[%s9437_s21 + $0x168] sm:$0xff] }
 0x2f8   :  { %v8282_v11 = vpack.c.bf16 %v1446_v55, %v1445_v39  ;;  %v5263_v39 = vld [vmem:[%s9437_s21 + $0x148] sm:$0xff]  ;;  %v5264_v55 = vld [vmem:[%s9437_s21 + $0x150] sm:$0xff] }
 0x2f9   :  { %v1401_v33 = vpop.f32.mrb[98].mxu1 }
 0x2fa   :  { %v1447_v46 = vmax.f32 %v8206_v3, %v1401_v33  ;;  %v6293_v32 = vpop.f32.mrb[99].mxu1  ;;  %7025 = vmatpush1.bf16.msra.mxu0 %v8282_v11  ;;  %v5269_v33 = vld [vmem:[%s9437_s21 + $0x178] sm:$0xff] }
 0x2fb   :  { %7026 = vmatprep.subr.bf16.mxu0 %v7348_v26  ;;  %v5271_v32 = vld [vmem:[%s9437_s21 + $0x188] sm:$0xff] }
 0x2fd   :  { %v1406_v45 = vpop.f32.mrb[100].mxu1 }
 0x2fe   :  { %v1448_v44 = vmax.f32 %v8212_v57, %v1406_v45  ;;  %v6296_v41 = vpop.f32.mrb[101].mxu1  ;;  %v5270_v45 = vld [vmem:[%s9437_s21 + $0x180] sm:$0xff] }
 0x2ff   :  { %v7318_v41 = vld [vmem:[%s9408_s5 + $0x28] sm:$0xff]  }
 0x300   :  { %v8288_v49 = vpack.c.bf16 %v1448_v44, %v1447_v46  ;;  %v5268_v46 = vld [vmem:[%s9437_s21 + $0x170] sm:$0xff]  ;;  %v5273_v44 = vld [vmem:[%s9437_s21 + $0x198] sm:$0xff]  ;;  %6306 = vmatprep.subr.bf16.mxu1 %v7318_v41 }
 0x301   :  { %v1411_v40 = vpop.f32.mrb[102].mxu1  ;;  %6307 = vmatpush3.bf16.msra.mxu1 %v7318_v41 }
 0x302   :  { %v1449_v53 = vmax.f32 %v8214_v62, %v1411_v40  ;;  %v6299_v47 = vpop.f32.mrb[103].mxu1  ;;  %7028 = vmatpush1.bf16.msra.mxu0 %v8288_v49  ;;  %v1452_v62 = vld [vmem:[%s9437_s21] sm:$0xff]  ;;  %v5275_v40 = vld [vmem:[%s9437_s21 + $0x1a8] sm:$0xff] }
 0x303   :  { %7029 = vmatprep.subr.bf16.mxu0 %v7348_v26  ;;  %v5277_v47 = vld [vmem:[%s9437_s21 + $0x1b8] sm:$0xff] }
 0x305   :  { %v1416_v3 = vpop.f32.mrb[104].mxu1 }
 0x306   :  { %v1450_v1 = vmax.f32 %v8216_v63, %v1416_v3  ;;  %v6302_v61 = vpop.f32.mrb[105].mxu1  ;;  %v1455_v63 = vld [vmem:[%s9437_s21 + $0x18] sm:$0xff]  ;;  %v5276_v3 = vld [vmem:[%s9437_s21 + $0x1b0] sm:$0xff] }
 0x307   :  { %v5278_v61 = vld [vmem:[%s9437_s21 + $0x1c0] sm:$0xff] }
 0x308   :  { %v8294_v54 = vpack.c.bf16 %v1450_v1, %v1449_v53  ;;  %v5274_v53 = vld [vmem:[%s9437_s21 + $0x1a0] sm:$0xff]  ;;  %v5279_v1 = vld [vmem:[%s9437_s21 + $0x1c8] sm:$0xff] }
 0x309   :  { %v1421_v4 = vpop.f32.mrb[106].mxu1 }
 0x30a   :  { %v8297_v57 = vmax.f32 %v8218_v56, %v1421_v4  ;;  %v6305_v58 = vpop.f32.mrb[107].mxu1  ;;  %7031 = vmatpush1.bf16.msra.mxu0 %v8294_v54  ;;  %v1454_v56 = vld [vmem:[%s9437_s21 + $0x10] sm:$0xff] }
 0x30b   :  { %1585 = vmatprep.subr.mxu0 %v7350_v59  ;;  %v5280_v4 = vld [vmem:[%s9437_s21 + $0x1d0] sm:$0xff] }
 0x30c   :  { %v7319_v58 = vld [vmem:[%s9408_s5 + $0x30] sm:$0xff]  }
 0x30d   :  { %6308 = vmatprep.subr.bf16.mxu1 %v7319_v58 }
 0x30e   :  { %1586 = vmatpush1.msra.mxu0 %v8297_v57  ;;  %6309 = vmatpush3.bf16.msra.mxu1 %v7319_v58 }
 0x30f   :  { %1598 = vmatmul.mubr.f32.vlgmr.msra.gmra.mrb[36].mxu0 %v1452_v62  ;;  %7032 = vmatprep.subr.bf16.mxu0 %v7348_v26  ;;  %v5282_v62 = vld [vmem:[%s9437_s21 + $0x1e0] sm:$0xff] }
 0x310   :  { %7034 = vmatpush1.bf16.msra.mxu0 %v8222_v25  ;;  %5239 = vmatprep.mubr.msk.f32.mxu0 %vm1484_vm5, %v1455_v63  ;;  %v1456_v25 = vld [vmem:[%s9437_s21 + $0x20] sm:$0xff]  ;;  %v5285_v63 = vld [vmem:[%s9437_s21 + $0x1f8] sm:$0x3] }
 0x311   :  { %7035 = vmatprep.subr.bf16.mxu0 %v7348_v26 }
 0x313   :  { %1603 = vmatmul.mubr.f32.gmra.mrb[38].mxu0 %v1454_v56  ;;  %v5284_v56 = vld [vmem:[%s9437_s21 + $0x1f0] sm:$0x3] }
 0x314   :  { %7037 = vmatpush1.bf16.msra.mxu0 %v8228_v17  ;;  %5240 = vmatprep.mubr.msk.f32.mxu0 %vm1484_vm5, %v1457_v9  ;;  %v1458_v17 = vld [vmem:[%s9437_s21 + $0x30] sm:$0xff]  ;;  %v7320_v9 = vld [vmem:[%s9408_s5 + $0x38] sm:$0xff]  }
 0x315   :  { %7038 = vmatprep.subr.bf16.mxu0 %v7348_v26  ;;  %6310 = vmatprep.subr.bf16.mxu1 %v7320_v9 }
 0x316   :  { %6311 = vmatpush3.bf16.msra.mxu1 %v7320_v9 }
 0x317   :  { %1608 = vmatmul.mubr.f32.gmra.mrb[40].mxu0 %v1456_v25  ;;  %v7321_v25 = vld [vmem:[%s9408_s5 + $0x40] sm:$0xff]  }
 0x318   :  { %7040 = vmatpush1.bf16.msra.mxu0 %v8234_v22  ;;  %5241 = vmatprep.mubr.msk.f32.mxu0 %vm1484_vm5, %v1459_v10  ;;  %v1460_v22 = vld [vmem:[%s9437_s21 + $0x40] sm:$0xff]  ;;  %v7322_v10 = vld [vmem:[%s9408_s5 + $0x48] sm:$0xff]  }
 0x319   :  { %7041 = vmatprep.subr.bf16.mxu0 %v7348_v26  ;;  %6312 = vmatprep.subr.bf16.mxu1 %v7321_v25 }
 0x31a   :  { %6313 = vmatpush3.bf16.msra.mxu1 %v7321_v25 }
 0x31b   :  { %1613 = vmatmul.mubr.f32.gmra.mrb[42].mxu0 %v1458_v17  ;;  %6314 = vmatprep.subr.bf16.mxu1 %v7322_v10  ;;  %v8571_v17 = vld [vmem:[%s9408_s5] sm:$0xff]  }
 0x31c   :  { %7043 = vmatpush1.bf16.msra.mxu0 %v8240_v38  ;;  %5242 = vmatprep.mubr.msk.f32.mxu0 %vm1484_vm5, %v1461_v15  ;;  %v1462_v38 = vld [vmem:[%s9437_s21 + $0x50] sm:$0xff] }
 0x31d   :  { %7044 = vmatprep.subr.bf16.mxu0 %v7348_v26 }
 0x31e   :  { %6315 = vmatpush3.bf16.msra.mxu1 %v7322_v10 }
 0x31f   :  { %1618 = vmatmul.mubr.f32.gmra.mrb[44].mxu0 %v1460_v22  ;;  %6332 = vmatprep.subr.bf16.mxu1 %v8571_v17 }
 0x320   :  { %7046 = vmatpush1.bf16.msra.mxu0 %v8246_v52  ;;  %5243 = vmatprep.mubr.msk.f32.mxu0 %vm1484_vm5, %v1463_v0  ;;  %v1464_v52 = vld [vmem:[%s9437_s21 + $0x60] sm:$0xff] }
 0x321   :  { %7047 = vmatprep.subr.bf16.mxu0 %v7348_v26 }
 0x323   :  { %1623 = vmatmul.mubr.f32.gmra.mrb[46].mxu0 %v1462_v38 }
 0x324   :  { %7049 = vmatpush1.bf16.msra.mxu0 %v8252_v50  ;;  %5244 = vmatprep.mubr.msk.f32.mxu0 %vm1484_vm5, %v1465_v13  ;;  %v1466_v50 = vld [vmem:[%s9437_s21 + $0x70] sm:$0xff] }
 0x325   :  { %7050 = vmatprep.subr.bf16.mxu0 %v7348_v26 }
 0x327   :  { %1628 = vmatmul.mubr.f32.gmra.mrb[48].mxu0 %v1464_v52 }
 0x328   :  { %7052 = vmatpush1.bf16.msra.mxu0 %v8258_v16  ;;  %5245 = vmatprep.mubr.msk.f32.mxu0 %vm1484_vm5, %v1467_v6  ;;  %v1468_v16 = vld [vmem:[%s9437_s21 + $0x80] sm:$0xff] }
 0x329   :  { %7053 = vmatprep.subr.bf16.mxu0 %v7348_v26 }
 0x32b   :  { %1633 = vmatmul.mubr.f32.gmra.mrb[50].mxu0 %v1466_v50 }
 0x32c   :  { %7055 = vmatpush1.bf16.msra.mxu0 %v8264_v23  ;;  %5246 = vmatprep.mubr.msk.f32.mxu0 %vm1484_vm5, %v1469_v14  ;;  %v1477_v23 = vld [vmem:[%s9437_s21 + $0xc8] sm:$0xff] }
 0x32d   :  { %7056 = vmatprep.subr.bf16.mxu0 %v7348_v26 }
 0x32f   :  { %1638 = vmatmul.mubr.f32.gmra.mrb[52].mxu0 %v1468_v16 }
 0x330   :  { %7058 = vmatpush1.bf16.msra.mxu0 %v8270_v60  ;;  %5247 = vmatprep.mubr.msk.f32.mxu0 %vm1484_vm5, %v1471_v18  ;;  %v1482_v60 = vld [vmem:[%s9437_s21 + $0xf0] sm:$0x3] }
 0x331   :  { %7059 = vmatprep.subr.bf16.mxu0 %v7348_v26 }
 0x333   :  { %1643 = vmatmul.mubr.f32.gmra.mrb[54].mxu0 %v1470_v21 }
 0x334   :  { %7061 = vmatpush1.bf16.msra.mxu0 %v8276_v8  ;;  %5248 = vmatprep.mubr.msk.f32.mxu0 %vm1484_vm5, %v1473_v7  ;;  %v5261_v8 = vld [vmem:[%s9437_s21 + $0x138] sm:$0xff] }
 0x335   :  { %7062 = vmatprep.subr.bf16.mxu0 %v7348_v26 }
 0x337   :  { %1648 = vmatmul.mubr.f32.gmra.mrb[56].mxu0 %v1472_v51 }
 0x338   :  { %7064 = vmatpush1.bf16.msra.mxu0 %v8282_v11  ;;  %5249 = vmatprep.mubr.msk.f32.mxu0 %vm1484_vm5, %v1475_v24  ;;  %v5266_v11 = vld [vmem:[%s9437_s21 + $0x160] sm:$0xff] }
 0x339   :  { %7065 = vmatprep.subr.bf16.mxu0 %v7348_v26 }
 0x33b   :  { %1653 = vmatmul.mubr.f32.gmra.mrb[58].mxu0 %v1474_v19 }
 0x33c   :  { %7067 = vmatpush1.bf16.msra.mxu0 %v8288_v49  ;;  %5250 = vmatprep.mubr.msk.f32.mxu0 %vm1484_vm5, %v1477_v23  ;;  %v5272_v49 = vld [vmem:[%s9437_s21 + $0x190] sm:$0xff] }
 0x33d   :  { %7068 = vmatprep.subr.bf16.mxu0 %v7348_v26 }
 0x33f   :  { %1658 = vmatmul.mubr.f32.gmra.mrb[60].mxu0 %v1476_v28 }
 0x340   :  { %7070 = vmatpush1.bf16.msra.mxu0 %v8294_v54  ;;  %5251 = vmatprep.mubr.msk.f32.mxu0 %vm1484_vm5, %v1479_v5  ;;  %v5281_v54 = vld [vmem:[%s9437_s21 + $0x1d8] sm:$0xff] }
 0x341   :  { %1811 = vmatprep.subr.mxu0 %v7350_v59 }
 0x343   :  { %1663 = vmatmul.mubr.f32.gmra.mrb[62].mxu0 %v1478_v35 }
 0x344   :  { %1812 = vmatpush1.msra.mxu0 %v8297_v57  ;;  %5252 = vmatprep.mubr.msk.f32.mxu0 %vm1484_vm5, %v1481_v31  ;;  %v5283_v57 = vld [vmem:[%s9437_s21 + $0x1e8] sm:$0xff] }
 0x345   :  { %7071 = vmatprep.subr.bf16.mxu0 %v7348_v26 }
 0x347   :  { %1668 = vmatmul.mubr.f32.gmra.mrb[64].mxu0 %v1480_v43 }
 0x348   :  { %5253 = vmatprep.mubr.msk.f32.mxu0 %vm1484_vm5, %v1483_v48 }
 0x34b   :  { %1673 = vmatmul.mubr.f32.gmra.mrb[66].mxu0 %v1482_v60 }
 0x34c   :  { %5286 = vmatprep.mubr.msk.f32.mxu0 %vm1484_vm5, %v5255_v20 }
 0x34f   :  { %1824 = vmatmul.mubr.f32.vlgmr.msra.gmra.mrb[68].mxu0 %v5254_v34 }
 0x350   :  { %5287 = vmatprep.mubr.msk.f32.mxu0 %vm1484_vm5, %v5257_v2 }
 0x353   :  { %1829 = vmatmul.mubr.f32.gmra.mrb[70].mxu0 %v5256_v27 }
 0x354   :  { %5288 = vmatprep.mubr.msk.f32.mxu0 %vm1484_vm5, %v5259_v30 }
 0x357   :  { %1834 = vmatmul.mubr.f32.gmra.mrb[72].mxu0 %v5258_v12 }
 0x358   :  { %5289 = vmatprep.mubr.msk.f32.mxu0 %vm1484_vm5, %v5261_v8 }
 0x35b   :  { %1839 = vmatmul.mubr.f32.gmra.mrb[74].mxu0 %v5260_v37 }
 0x35c   :  { %5290 = vmatprep.mubr.msk.f32.mxu0 %vm1484_vm5, %v5263_v39 }
 0x35f   :  { %1844 = vmatmul.mubr.f32.gmra.mrb[76].mxu0 %v5262_v29 }
 0x360   :  { %5291 = vmatprep.mubr.msk.f32.mxu0 %vm1484_vm5, %v5265_v42 }
 0x363   :  { %1849 = vmatmul.mubr.f32.gmra.mrb[78].mxu0 %v5264_v55 }
 0x364   :  { %5292 = vmatprep.mubr.msk.f32.mxu0 %vm1484_vm5, %v5267_v36 }
 0x367   :  { %1854 = vmatmul.mubr.f32.gmra.mrb[80].mxu0 %v5266_v11 }
 0x368   :  { %5293 = vmatprep.mubr.msk.f32.mxu0 %vm1484_vm5, %v5269_v33 }
 0x36b   :  { %1859 = vmatmul.mubr.f32.gmra.mrb[82].mxu0 %v5268_v46 }
 0x36c   :  { %5294 = vmatprep.mubr.msk.f32.mxu0 %vm1484_vm5, %v5271_v32  ;;  %v2543_v32 = vld [vmem:[%s9409_s7] sm:$0xff] }
 0x36f   :  { %1864 = vmatmul.mubr.f32.gmra.mrb[84].mxu0 %v5270_v45  ;;  %v2544_v45 = vld [vmem:[%s9409_s7 + $0x8] sm:$0xff] }
 0x370   :  { %5295 = vmatprep.mubr.msk.f32.mxu0 %vm1484_vm5, %v5273_v44 }
 0x373   :  { %1869 = vmatmul.mubr.f32.gmra.mrb[86].mxu0 %v5272_v49  ;;  %v7072_v49 = vpack.c.bf16 %v2544_v45, %v2543_v32 }
 0x374   :  { %5296 = vmatprep.mubr.msk.f32.mxu0 %vm1484_vm5, %v5275_v40 }
 0x375   :  { %7073 = vmatpush3.bf16.msra.mxu0 %v7072_v49  ;;  %v7327_v49 = vld [vmem:[%s9408_s5 + $0x20] sm:$0xff]  }
 0x376   :  { %7074 = vmatprep.subr.bf16.mxu0 %v7348_v26 }
 0x377   :  { %1874 = vmatmul.mubr.f32.gmra.mrb[88].mxu0 %v5274_v53 }
 0x378   :  { %5297 = vmatprep.mubr.msk.f32.mxu0 %vm1484_vm5, %v5277_v47 }
 0x37b   :  { %1879 = vmatmul.mubr.f32.gmra.mrb[90].mxu0 %v5276_v3 }
 0x37c   :  { %5298 = vmatprep.mubr.msk.f32.mxu0 %vm1484_vm5, %v5279_v1 }
 0x37f   :  { %1884 = vmatmul.mubr.f32.gmra.mrb[92].mxu0 %v5278_v61 }
 0x380   :  { %5299 = vmatprep.mubr.msk.f32.mxu0 %vm1484_vm5, %v5281_v54 }
 0x383   :  { %1889 = vmatmul.mubr.f32.gmra.mrb[94].mxu0 %v5280_v4 }
 0x384   :  { %5300 = vmatprep.mubr.msk.f32.mxu0 %vm1484_vm5, %v5283_v57 }
 0x387   :  { %1894 = vmatmul.mubr.f32.gmra.mrb[96].mxu0 %v5282_v62 }
 0x388   :  { %5301 = vmatprep.mubr.msk.f32.mxu0 %vm1484_vm5, %v5285_v63  ;;  %vm5120_vm5 = vcmask 59392  }
 0x38b   :  { %1899 = vmatmul.mubr.f32.gmra.mrb[98].mxu0 %v5284_v56 }
 0x38c   :  { %6400 = vmatprep.mubr.msk.f32.mxu0 %vm7349_vm4, %v7350_v59 }
 0x3e2   :  { %v1599_v15 = vpop.f32.mrb[36].mxu0 }
 0x3e3   :  { %v1601_v22 = vpop.f32.mrb[37].mxu0 }
 0x3e6   :  { %v1604_v0 = vpop.f32.mrb[38].mxu0 }
 0x3e7   :  { %v1606_v38 = vpop.f32.mrb[39].mxu0 }
 0x3ea   :  { %v1609_v13 = vpop.f32.mrb[40].mxu0 }
 0x3eb   :  { %v1611_v52 = vpop.f32.mrb[41].mxu0 }
 0x3ee   :  { %v1614_v6 = vpop.f32.mrb[42].mxu0 }
 0x3ef   :  { %v1616_v50 = vpop.f32.mrb[43].mxu0 }
 0x3f2   :  { %v8574_v14 = vpop.f32.mrb[44].mxu0 }
 0x3f3   :  { %v1621_v16 = vpop.f32.mrb[45].mxu0 }
 0x3f6   :  { %v1624_v18 = vpop.f32.mrb[46].mxu0 }
 0x3f7   :  { %v1626_v21 = vpop.f32.mrb[47].mxu0 }
 0x3fa   :  { %v8576_v7 = vpop.f32.mrb[48].mxu0 }
 0x3fb   :  { %v1631_v51 = vpop.f32.mrb[49].mxu0 }
 0x3fe   :  { %v8578_v24 = vpop.f32.mrb[50].mxu0 }
 0x3ff   :  { %v1636_v19 = vpop.f32.mrb[51].mxu0 }
 0x402   :  { %v8580_v23 = vpop.f32.mrb[52].mxu0 }
 0x403   :  { %v1641_v28 = vpop.f32.mrb[53].mxu0 }
 0x406   :  { %v8582_v5 = vpop.f32.mrb[54].mxu0 }
 0x407   :  { %v1646_v35 = vpop.f32.mrb[55].mxu0 }
 0x408   :  { %v7324_v35 = vld [vmem:[%s9408_s5 + $0x8] sm:$0xff]  }
 0x40a   :  { %v8584_v31 = vpop.f32.mrb[56].mxu0 }
 0x40b   :  { %v1651_v43 = vpop.f32.mrb[57].mxu0 }
 0x40e   :  { %v8586_v48 = vpop.f32.mrb[58].mxu0 }
 0x40f   :  { %v1656_v60 = vpop.f32.mrb[59].mxu0 }
 0x412   :  { %v8588_v20 = vpop.f32.mrb[60].mxu0 }
 0x413   :  { %v1661_v34 = vpop.f32.mrb[61].mxu0 }
 0x416   :  { %v8590_v2 = vpop.f32.mrb[62].mxu0 }
 0x417   :  { %v1666_v27 = vpop.f32.mrb[63].mxu0 }
 0x41a   :  { %v8592_v30 = vpop.f32.mrb[64].mxu0 }
 0x41b   :  { %v1671_v12 = vpop.f32.mrb[65].mxu0 }
 0x41c   :  { %v7325_v12 = vld [vmem:[%s9408_s5 + $0x10] sm:$0xff]  }
 0x41e   :  { %v8594_v8 = vpop.f32.mrb[66].mxu0 }
 0x41f   :  { %v1676_v37 = vpop.f32.mrb[67].mxu0 }
 0x422   :  { %v1825_v39 = vpop.f32.mrb[68].mxu0 }
 0x423   :  { %v1904_v29 = vmax.f32 %v1599_v15, %v1825_v39  ;;  %v1827_v42 = vpop.f32.mrb[69].mxu0 }
 0x426   :  { %v1830_v55 = vpop.f32.mrb[70].mxu0 }
 0x427   :  { %v1905_v36 = vmax.f32 %v1604_v0, %v1830_v55  ;;  %v1832_v11 = vpop.f32.mrb[71].mxu0 }
 0x429   :  { %v8596_v33 = vpack.c.bf16 %v1905_v36, %v1904_v29 }
 0x42a   :  { %v1835_v46 = vpop.f32.mrb[72].mxu0 }
 0x42b   :  { %v1906_v44 = vmax.f32 %v1609_v13, %v1835_v46  ;;  %v1837_v41 = vpop.f32.mrb[73].mxu0  ;;  %v1953_v40 = vshll.u32 %v8596_v33, 16  ;;  %v1951_v4 = vshrl.u32 %v8596_v33, 16  ;;  %v2326_v63 = vrot.slane %v8596_v33, 1  ;;  %v7326_v46 = vld [vmem:[%s9408_s5 + $0x18] sm:$0xff]  }
 0x42d   :  { %v1955_v61 = vrot.slane %v1953_v40, 1 }
 0x42e   :  { %v1840_v53 = vpop.f32.mrb[74].mxu0 }
 0x42f   :  { %v1907_v47 = vmax.f32 %v1614_v6, %v1840_v53  ;;  %v1842_v3 = vpop.f32.mrb[75].mxu0  ;;  %v1956_v9 = vor.u32 %v1955_v61, %v1951_v4 }
 0x431   :  { %v8606_v1 = vpack.c.bf16 %v1907_v47, %v1906_v44 }
 0x432   :  { %v1845_v54 = vpop.f32.mrb[76].mxu0 }
 0x433   :  { %v1908_v57 = vmax.f32 %v8574_v14, %v1845_v54  ;;  %v1847_v58 = vpop.f32.mrb[77].mxu0  ;;  %v1958_v62 = vshll.u32 %v8606_v1, 16  ;;  %v2327_v56 = vrot.slane %v8606_v1, 1  ;;  %v1962_v6 = vshrl.u32 %v8606_v1, 16 }
 0x434   :  { %v7328_v58 = vld [vmem:[%s9408_s5 + $0x50] sm:$0xff]  }
 0x435   :  { %v1960_v25 = vrot.slane %v1958_v62, 1  ;;  %v8614_v10 = vsel %vm666_vm3, %v2326_v63, %v2327_v56 }
 0x436   :  { %v1850_v15 = vpop.f32.mrb[78].mxu0 }
 0x437   :  { %v1909_v22 = vmax.f32 %v1624_v18, %v1850_v15  ;;  %v1852_v0 = vpop.f32.mrb[79].mxu0  ;;  %v1961_v38 = vsel %vm123_vm1, %v1956_v9, %v1960_v25  ;;  %v1964_v19 = vor.u32 %v1962_v6, %v1960_v25 }
 0x438   :  { %6316 = vmatprep.mubr.msk.bf16.mxu1 %vm2043_vm6, %v1961_v38 }
 0x439   :  { %v8618_v13 = vpack.c.bf16 %v1909_v22, %v1908_v57 }
 0x43a   :  { %v1855_v52 = vpop.f32.mrb[80].mxu0 }
 0x43b   :  { %v1966_v50 = vshll.u32 %v8618_v13, 16  ;;  %v2329_v14 = vrot.slane %v8618_v13, 1  ;;  %v1910_v16 = vmax.f32 %v8576_v7, %v1855_v52  ;;  %v1857_v21 = vpop.f32.mrb[81].mxu0 }
 0x43d   :  { %v1968_v51 = vrot.slane %v1966_v50, 1  ;;  %v8625_v18 = vsel %vm666_vm3, %v2327_v56, %v2329_v14 }
 0x43e   :  { %v1860_v28 = vpop.f32.mrb[82].mxu0 }
 0x43f   :  { %v1911_v43 = vmax.f32 %v8578_v24, %v1860_v28  ;;  %v1862_v60 = vpop.f32.mrb[83].mxu0  ;;  %v1969_v34 = vsel %vm123_vm1, %v1964_v19, %v1968_v51  ;;  %v1970_v24 = vshrl.u32 %v8618_v13, 16 }
 0x440   :  { %6317 = vmatmul.mubr.msk.bf16.vlgmr.msra.gmra.mrb[108].mxu1 %vm2043_vm6, %v1969_v34 }
 0x441   :  { %v8633_v27 = vpack.c.bf16 %v1911_v43, %v1910_v16  ;;  %6333 = vmatpush3.bf16.msra.mxu1 %v8571_v17  ;;  %v1972_v55 = vor.u32 %v1970_v24, %v1968_v51 }
 0x442   :  { %v1865_v7 = vpop.f32.mrb[84].mxu0  ;;  %6334 = vmatprep.subr.bf16.mxu1 %v7324_v35 }
 0x443   :  { %v1912_v37 = vmax.f32 %v8580_v23, %v1865_v7  ;;  %v1867_v39 = vpop.f32.mrb[85].mxu0  ;;  %v1974_v29 = vshll.u32 %v8633_v27, 16  ;;  %v2331_v42 = vrot.slane %v8633_v27, 1  ;;  %v1978_v47 = vshrl.u32 %v8633_v27, 16 }
 0x445   :  { %v1976_v36 = vrot.slane %v1974_v29, 1  ;;  %6335 = vmatpush3.bf16.msra.mxu1 %v7324_v35  ;;  %v8644_v17 = vsel %vm666_vm3, %v2329_v14, %v2331_v42 }
 0x446   :  { %v1870_v11 = vpop.f32.mrb[86].mxu0  ;;  %6336 = vmatprep.subr.bf16.mxu1 %v7325_v12 }
 0x447   :  { %v1913_v23 = vmax.f32 %v8582_v5, %v1870_v11  ;;  %v1872_v32 = vpop.f32.mrb[87].mxu0  ;;  %v1977_v45 = vsel %vm123_vm1, %v1972_v55, %v1976_v36  ;;  %v1980_v61 = vor.u32 %v1978_v47, %v1976_v36  ;;  %v5379_v47 = vld [vmem:[%s9409_s7 + $0x50] sm:$0xff] }
 0x448   :  { %6320 = vmatprep.mubr.msk.bf16.mxu1 %vm2043_vm6, %v1977_v45 }
 0x449   :  { %v8652_v44 = vpack.c.bf16 %v1913_v23, %v1912_v37  ;;  %6337 = vmatpush3.bf16.msra.mxu1 %v7325_v12 }
 0x44a   :  { %v1875_v41 = vpop.f32.mrb[88].mxu0  ;;  %6338 = vmatprep.subr.bf16.mxu1 %v7326_v46 }
 0x44b   :  { %v1914_v40 = vmax.f32 %v8584_v31, %v1875_v41  ;;  %v1877_v53 = vpop.f32.mrb[89].mxu0  ;;  %v1982_v5 = vshll.u32 %v8652_v44, 16  ;;  %v2333_v3 = vrot.slane %v8652_v44, 1  ;;  %v1986_v22 = vshrl.u32 %v8652_v44, 16  ;;  %v7330_v41 = vld [vmem:[%s9408_s5 + $0x60] sm:$0xff]  }
 0x44d   :  { %v1984_v54 = vrot.slane %v1982_v5, 1  ;;  %6339 = vmatpush3.bf16.msra.mxu1 %v7326_v46  ;;  %v8662_v4 = vsel %vm666_vm3, %v2331_v42, %v2333_v3  ;;  %v5380_v5 = vld [vmem:[%s9409_s7 + $0x58] sm:$0xff] }
 0x44e   :  { %v1880_v57 = vpop.f32.mrb[90].mxu0  ;;  %6340 = vmatprep.subr.bf16.mxu1 %v7327_v49 }
 0x44f   :  { %v1915_v31 = vmax.f32 %v8586_v48, %v1880_v57  ;;  %v1882_v62 = vpop.f32.mrb[91].mxu0  ;;  %v1985_v63 = vsel %vm123_vm1, %v1980_v61, %v1984_v54  ;;  %v1988_v52 = vor.u32 %v1986_v22, %v1984_v54  ;;  %v7087_v61 = vpack.c.bf16 %v5380_v5, %v5379_v47  ;;  %v2549_v54 = vld [vmem:[%s9409_s7 + $0x30] sm:$0xff]  ;;  %v5381_v57 = vld [vmem:[%s9409_s7 + $0x60] sm:$0xff] }
 0x450   :  { %6321 = vmatmul.mubr.msk.bf16.gmra.mrb[112].mxu1 %vm2043_vm6, %v1985_v63  ;;  %v5383_v63 = vld [vmem:[%s9409_s7 + $0x70] sm:$0xff] }
 0x451   :  { %v1925_v56 = vpack.c.bf16 %v1915_v31, %v1914_v40  ;;  %6341 = vmatpush3.bf16.msra.mxu1 %v7327_v49  ;;  %v5377_v49 = vld [vmem:[%s9409_s7 + $0x40] sm:$0xff]  ;;  %v5378_v40 = vld [vmem:[%s9409_s7 + $0x48] sm:$0xff] }
 0x452   :  { %v1885_v9 = vpop.f32.mrb[92].mxu0  ;;  %6358 = vmatprep.subr.bf16.mxu1 %v7328_v58  ;;  %v7084_v53 = vpack.c.bf16 %v5378_v40, %v5377_v49  ;;  %v5382_v31 = vld [vmem:[%s9409_s7 + $0x68] sm:$0xff] }
 0x453   :  { %v1916_v25 = vmax.f32 %v8588_v20, %v1885_v9  ;;  %v1887_v15 = vpop.f32.mrb[93].mxu0  ;;  %v1990_v0 = vshll.u32 %v1925_v56, 16  ;;  %v2335_v38 = vrot.slane %v1925_v56, 1  ;;  %v1994_v35 = vshrl.u32 %v1925_v56, 16 }
 0x454   :  { %v7090_v62 = vpack.c.bf16 %v5382_v31, %v5381_v57 }
 0x455   :  { %v1992_v6 = vrot.slane %v1990_v0, 1  ;;  %v2336_v48 = vsel %vm666_vm3, %v2333_v3, %v2335_v38 }
 0x456   :  { %v1890_v50 = vpop.f32.mrb[94].mxu0 }
 0x457   :  { %v1917_v14 = vmax.f32 %v8590_v2, %v1890_v50  ;;  %v1892_v16 = vpop.f32.mrb[95].mxu0  ;;  %v1993_v21 = vsel %vm123_vm1, %v1988_v52, %v1992_v6  ;;  %v1996_v34 = vor.u32 %v1994_v35, %v1992_v6 }
 0x458   :  { %6324 = vmatprep.mubr.msk.bf16.mxu1 %vm2043_vm6, %v1993_v21  ;;  %v8776_v21 = vld [vmem:[%s9410_s6] ss:$0 sm:$0xff] }
 0x459   :  { %v1926_v51 = vpack.c.bf16 %v1917_v14, %v1916_v25 }
 0x45a   :  { %v1895_v19 = vpop.f32.mrb[96].mxu0 }
 0x45b   :  { %v1918_v20 = vmax.f32 %v8592_v30, %v1895_v19  ;;  %v1897_v28 = vpop.f32.mrb[97].mxu0  ;;  %v1998_v43 = vshll.u32 %v1926_v51, 16  ;;  %v2337_v60 = vrot.slane %v1926_v51, 1  ;;  %v2002_v30 = vshrl.u32 %v1926_v51, 16 }
 0x45d   :  { %v2000_v7 = vrot.slane %v1998_v43, 1  ;;  %v2338_v12 = vsel %vm666_vm3, %v2335_v38, %v2337_v60 }
 0x45e   :  { %v1900_v37 = vpop.f32.mrb[98].mxu0 }
 0x45f   :  { %v1919_v2 = vmax.f32 %v8594_v8, %v1900_v37  ;;  %v1902_v39 = vpop.f32.mrb[99].mxu0  ;;  %v2001_v24 = vsel %vm123_vm1, %v1996_v34, %v2000_v7  ;;  %v2004_v46 = vor.u32 %v2002_v30, %v2000_v7  ;;  %v7329_v8 = vld [vmem:[%s9408_s5 + $0x58] sm:$0xff]  }
 0x460   :  { %6325 = vmatmul.mubr.msk.bf16.gmra.mrb[116].mxu1 %vm2043_vm6, %v2001_v24 }
 0x461   :  { %v1938_v29 = vpack.c.bf16 %v1919_v2, %v1918_v20 }
 0x463   :  { %v2006_v42 = vshll.u32 %v1938_v29, 16  ;;  %v2339_v55 = vrot.slane %v1938_v29, 1  ;;  %v2010_v11 = vshrl.u32 %v1938_v29, 16 }
 0x465   :  { %v2008_v36 = vrot.slane %v2006_v42, 1  ;;  %v2340_v23 = vsel %vm666_vm3, %v2337_v60, %v2339_v55 }
 0x467   :  { %v2009_v32 = vsel %vm123_vm1, %v2004_v46, %v2008_v36  ;;  %v2012_v45 = vor.u32 %v2010_v11, %v2008_v36 }
 0x468   :  { %6328 = vmatprep.mubr.msk.bf16.mxu1 %vm2043_vm6, %v2009_v32 }
 0x469   :  { %6329 = vmatmul.mubr.msk.bf16.gmra.mrb[120].mxu1 %vm2043_vm6, %v2012_v45 }
 0x46a   :  { %6342 = vmatprep.mubr.msk.bf16.mxu1 %vm2043_vm6, %v8596_v33  ;;  %v7331_v33 = vld [vmem:[%s9408_s5 + $0x68] sm:$0xff]  }
 0x471   :  { %6343 = vmatmul.mubr.msk.bf16.vlgmr.msra.gmra.mrb[108].mxu1 %vm2043_vm6, %v8606_v1  ;;  %v7332_v1 = vld [vmem:[%s9408_s5 + $0x70] sm:$0xff]  }
 0x472   :  { %6346 = vmatprep.mubr.msk.bf16.mxu1 %vm2043_vm6, %v8618_v13  ;;  %6359 = vmatpush3.bf16.msra.mxu1 %v7328_v58  ;;  %v1927_v13 = vpack.c.bf16 %v1918_v20, %v1918_v20 }
 0x473   :  { %6360 = vmatprep.subr.bf16.mxu1 %v7329_v8 }
 0x476   :  { %6361 = vmatpush3.bf16.msra.mxu1 %v7329_v8 }
 0x477   :  { %6362 = vmatprep.subr.bf16.mxu1 %v7330_v41 }
 0x479   :  { %6347 = vmatmul.mubr.msk.bf16.gmra.mrb[112].mxu1 %vm2043_vm6, %v8633_v27  ;;  %v2547_v27 = vld [vmem:[%s9409_s7 + $0x20] sm:$0xff] }
 0x47a   :  { %6350 = vmatprep.mubr.msk.bf16.mxu1 %vm2043_vm6, %v8652_v44  ;;  %6363 = vmatpush3.bf16.msra.mxu1 %v7330_v41  ;;  %v2548_v44 = vld [vmem:[%s9409_s7 + $0x28] sm:$0xff] }
 0x47b   :  { %6364 = vmatprep.subr.bf16.mxu1 %v7331_v33  ;;  %v7078_v3 = vpack.c.bf16 %v2548_v44, %v2547_v27 }
 0x47e   :  { %6365 = vmatpush3.bf16.msra.mxu1 %v7331_v33 }
 0x47f   :  { %6366 = vmatprep.subr.bf16.mxu1 %v7332_v1 }
 0x481   :  { %6351 = vmatmul.mubr.msk.bf16.gmra.mrb[116].mxu1 %vm2043_vm6, %v1925_v56  ;;  %v5384_v56 = vld [vmem:[%s9409_s7 + $0x78] sm:$0xff] }
 0x482   :  { %6354 = vmatprep.mubr.msk.bf16.mxu1 %vm2043_vm6, %v1926_v51  ;;  %6367 = vmatpush3.bf16.msra.mxu1 %v7332_v1  ;;  %v7093_v9 = vpack.c.bf16 %v5384_v56, %v5383_v63 }
 0x483   :  { %7083 = vmatprep.subr.bf16.mxu1 %v7348_v26 }
 0x489   :  { %6355 = vmatmul.mubr.msk.bf16.gmra.mrb[124].mxu1 %vm2043_vm6, %v1927_v13 }
 0x48a   :  { %6368 = vmatprep.mubr.msk.bf16.mxu1 %vm2043_vm6, %v8614_v10  ;;  %v2545_v10 = vld [vmem:[%s9409_s7 + $0x10] sm:$0xff] }
 0x491   :  { %6369 = vmatmul.mubr.msk.bf16.vlgmr.msra.gmra.mrb[108].mxu1 %vm2043_vm6, %v8625_v18  ;;  %v2546_v18 = vld [vmem:[%s9409_s7 + $0x18] sm:$0xff] }
 0x492   :  { %6372 = vmatprep.mubr.msk.bf16.mxu1 %vm2043_vm6, %v8644_v17  ;;  %v7075_v17 = vpack.c.bf16 %v2546_v18, %v2545_v10  ;;  %7085 = vmatpush3.bf16.msra.mxu1 %v7084_v53 }
 0x493   :  { %7086 = vmatprep.subr.bf16.mxu1 %v7348_v26 }
 0x494   :  { %7076 = vmatpush3.bf16.msra.mxu0 %v7075_v17 }
 0x495   :  { %7077 = vmatprep.subr.bf16.mxu0 %v7348_v26 }
 0x496   :  { %7088 = vmatpush3.bf16.msra.mxu1 %v7087_v61 }
 0x497   :  { %7089 = vmatprep.subr.bf16.mxu1 %v7348_v26 }
 0x498   :  { %7079 = vmatpush3.bf16.msra.mxu0 %v7078_v3 }
 0x499   :  { %6373 = vmatmul.mubr.msk.bf16.gmra.mrb[112].mxu1 %vm2043_vm6, %v8662_v4  ;;  %7080 = vmatprep.subr.bf16.mxu0 %v7348_v26  ;;  %v2550_v4 = vld [vmem:[%s9409_s7 + $0x38] sm:$0xff] }
 0x49a   :  { %6376 = vmatprep.mubr.msk.bf16.mxu1 %vm2043_vm6, %v2336_v48  ;;  %v7081_v58 = vpack.c.bf16 %v2550_v4, %v2549_v54  ;;  %7091 = vmatpush3.bf16.msra.mxu1 %v7090_v62 }
 0x49b   :  { %7092 = vmatprep.subr.bf16.mxu1 %v7348_v26 }
 0x49c   :  { %7082 = vmatpush3.bf16.msra.mxu0 %v7081_v58 }
 0x49e   :  { %7094 = vmatpush3.bf16.msra.mxu1 %v7093_v9  ;;  %v2901_v9 = vld [vmem:[%s9411_s8] sm:$0xff] }
 0x49f   :  { %6596 = vmatprep.subr.bf16.mxu1 %v7350_v59 }
 0x4a1   :  { %6377 = vmatmul.mubr.msk.bf16.gmra.mrb[116].mxu1 %vm2043_vm6, %v2338_v12 }
 0x4a2   :  { %6380 = vmatprep.mubr.msk.bf16.mxu1 %vm2043_vm6, %v2340_v23 }
 0x4a9   :  { %6381 = vmatmul.mubr.msk.bf16.gmra.mrb[128].mxu1 %vm2043_vm6, %v2339_v55 }
 0x4aa   :  { %6461 = vmatprep.mubr.msk.f32.mxu1 %vm7349_vm4, %v7350_v59 }
 0x53c   :  { %v6330_v25 = vpop.f32.mrb[120].mxu1 }
 0x53d   :  { %v2150_v15 = vpop.f32.mrb[121].mxu1 }
 0x53e   :  { %v6331_v22 = vpop.f32.mrb[122].mxu1 }
 0x53f   :  { %v2153_v0 = vpop.f32.mrb[123].mxu1 }
 0x55c   :  { %v6356_v38 = vpop.f32.mrb[124].mxu1 }
 0x55d   :  { %v2302_v52 = vadd.f32 %v6356_v38, %v6330_v25  ;;  %v2293_v6 = vpop.f32.mrb[125].mxu1  ;;  %v7333_v25 = vld [vmem:[%s9412_s9 + $0x18] sm:$0xff]  }
 0x55e   :  { %v2294_v48 = vadd.f32 %v2293_v6, %v2150_v15  ;;  %v6357_v50 = vpop.f32.mrb[126].mxu1 }
 0x55f   :  { %v2296_v14 = vpop.f32.mrb[127].mxu1 }
 0x560   :  { %v2297_v16 = vadd.f32 %v2296_v14, %v2153_v0 }
 0x564   :  { %v6370_v51 = vpop.f32.mrb[108].mxu1 }
 0x565   :  { %v2429_v19 = vpop.f32.mrb[109].mxu1  ;;  %v2515_v34 = vadd.f32 %v6370_v51, %v8776_v21 }
 0x566   :  { %v2513_v20 = vadd.f32 %v8776_v21, %v2429_v19  ;;  %v6371_v28 = vpop.f32.mrb[110].mxu1 }
 0x567   :  { %v2432_v35 = vpop.f32.mrb[111].mxu1  ;;  %v2530_v24 = vmax.f32 %v2515_v34, 0.0  ;;  %v2516_v29 = vadd.f32 %v6371_v28, %v8776_v21 }
 0x568   :  { %v2528_v43 = vmax.f32 %v2513_v20, 0.0  ;;  %v2514_v60 = vadd.f32 %v8776_v21, %v2432_v35 }
 0x569   :  { %v2531_v42 = vmax.f32 %v2516_v29, 0.0 }
 0x56a   :  { %6401 = vmatmul.mubr.msk.f32.vlgmr.msra.gmra.mrb[100].mxu0 %vm2551_vm7, %v2528_v43  ;;  %6462 = vmatmul.mubr.msk.f32.vlgmr.msra.gmra.mrb[132].mxu1 %vm2551_vm7, %v2528_v43  ;;  %v2529_v7 = vmax.f32 %v2514_v60, 0.0 }
 0x56b   :  { %6403 = vmatprep.mubr.msk.f32.mxu0 %vm7349_vm4, %v7350_v59  ;;  %6464 = vmatprep.mubr.msk.f32.mxu1 %vm7349_vm4, %v7350_v59 }
 0x56c   :  { %v6374_v12 = vpop.f32.mrb[112].mxu1  ;;  %6597 = vmatpush3.bf16.msra.mxu1 %v7333_v25 }
 0x56d   :  { %v2445_v37 = vpop.f32.mrb[113].mxu1  ;;  %v2519_v45 = vadd.f32 %v6374_v12, %v8776_v21  ;;  %6598 = vmatprep.subr.bf16.mxu1 %v7350_v59 }
 0x56e   :  { %v6375_v2 = vpop.f32.mrb[114].mxu1  ;;  %6404 = vmatmul.mubr.msk.f32.gmra.mrb[102].mxu0 %vm2551_vm7, %v2529_v7  ;;  %6465 = vmatmul.mubr.msk.f32.gmra.mrb[134].mxu1 %vm2551_vm7, %v2529_v7  ;;  %v2517_v55 = vadd.f32 %v8776_v21, %v2445_v37 }
 0x56f   :  { %v2448_v39 = vpop.f32.mrb[115].mxu1  ;;  %6406 = vmatprep.mubr.msk.f32.mxu0 %vm7349_vm4, %v7350_v59  ;;  %6467 = vmatprep.mubr.msk.f32.mxu1 %vm7349_vm4, %v7350_v59  ;;  %v2534_v27 = vmax.f32 %v2519_v45, 0.0  ;;  %v2520_v17 = vadd.f32 %v6375_v2, %v8776_v21 }
 0x570   :  { %v2532_v23 = vmax.f32 %v2517_v55, 0.0  ;;  %v2518_v32 = vadd.f32 %v8776_v21, %v2448_v39 }
 0x571   :  { %v2535_v49 = vmax.f32 %v2520_v17, 0.0 }
 0x572   :  { %6407 = vmatmul.mubr.msk.f32.gmra.mrb[104].mxu0 %vm2551_vm7, %v2530_v24  ;;  %6468 = vmatmul.mubr.msk.f32.gmra.mrb[136].mxu1 %vm2551_vm7, %v2530_v24  ;;  %v2533_v8 = vmax.f32 %v2518_v32, 0.0 }
 0x573   :  { %6409 = vmatprep.mubr.msk.f32.mxu0 %vm7349_vm4, %v7350_v59  ;;  %6470 = vmatprep.mubr.msk.f32.mxu1 %vm7349_vm4, %v7350_v59 }
 0x574   :  { %v6378_v30 = vpop.f32.mrb[116].mxu1 }
 0x575   :  { %v2461_v36 = vpop.f32.mrb[117].mxu1  ;;  %v2523_v5 = vadd.f32 %v6378_v30, %v8776_v21 }
 0x576   :  { %v6379_v11 = vpop.f32.mrb[118].mxu1  ;;  %6410 = vmatmul.mubr.msk.f32.gmra.mrb[106].mxu0 %vm2551_vm7, %v2531_v42  ;;  %6471 = vmatmul.mubr.msk.f32.gmra.mrb[138].mxu1 %vm2551_vm7, %v2531_v42  ;;  %v2521_v40 = vadd.f32 %v8776_v21, %v2461_v36 }
 0x577   :  { %v2464_v46 = vpop.f32.mrb[119].mxu1  ;;  %6412 = vmatprep.mubr.msk.f32.mxu0 %vm7349_vm4, %v7350_v59  ;;  %6473 = vmatprep.mubr.msk.f32.mxu1 %vm7349_vm4, %v7350_v59  ;;  %v2538_v61 = vmax.f32 %v2523_v5, 0.0  ;;  %v2524_v54 = vadd.f32 %v6379_v11, %v8776_v21 }
 0x578   :  { %v2536_v53 = vmax.f32 %v2521_v40, 0.0  ;;  %v2522_v47 = vadd.f32 %v8776_v21, %v2464_v46 }
 0x579   :  { %v2539_v4 = vmax.f32 %v2524_v54, 0.0 }
 0x57a   :  { %6413 = vmatmul.mubr.msk.f32.gmra.mrb[108].mxu0 %vm2551_vm7, %v2532_v23  ;;  %6474 = vmatmul.mubr.msk.f32.gmra.mrb[140].mxu1 %vm2551_vm7, %v2532_v23  ;;  %v2537_v3 = vmax.f32 %v2522_v47, 0.0 }
 0x57b   :  { %6415 = vmatprep.mubr.msk.f32.mxu0 %vm7349_vm4, %v7350_v59  ;;  %6476 = vmatprep.mubr.msk.f32.mxu1 %vm7349_vm4, %v7350_v59 }
 0x57c   :  { %v6382_v41 = vpop.f32.mrb[128].mxu1 }
 0x57d   :  { %v2505_v33 = vadd.f32 %v6382_v41, %v2302_v52  ;;  %v2477_v1 = vpop.f32.mrb[129].mxu1 }
 0x57e   :  { %v2503_v13 = vadd.f32 %v2477_v1, %v2294_v48  ;;  %v6383_v10 = vpop.f32.mrb[130].mxu1  ;;  %6416 = vmatmul.mubr.msk.f32.gmra.mrb[110].mxu0 %vm2551_vm7, %v2533_v8  ;;  %6477 = vmatmul.mubr.msk.f32.gmra.mrb[142].mxu1 %vm2551_vm7, %v2533_v8 }
 0x57f   :  { %v2480_v18 = vpop.f32.mrb[131].mxu1  ;;  %6418 = vmatprep.mubr.msk.f32.mxu0 %vm7349_vm4, %v7350_v59  ;;  %6479 = vmatprep.mubr.msk.f32.mxu1 %vm7349_vm4, %v7350_v59  ;;  %v2527_v62 = vadd.f32 %v8776_v21, %v2505_v33 }
 0x580   :  { %v2504_v44 = vadd.f32 %v2480_v18, %v2297_v16  ;;  %v2525_v57 = vadd.f32 %v8776_v21, %v2503_v13 }
 0x581   :  { %v2542_v56 = vmax.f32 %v2527_v62, 0.0 }
 0x582   :  { %6419 = vmatmul.mubr.msk.f32.gmra.mrb[112].mxu0 %vm2551_vm7, %v2534_v27  ;;  %6480 = vmatmul.mubr.msk.f32.gmra.mrb[144].mxu1 %vm2551_vm7, %v2534_v27  ;;  %v2540_v58 = vmax.f32 %v2525_v57, 0.0  ;;  %v2526_v31 = vadd.f32 %v8776_v21, %v2504_v44 }
 0x583   :  { %6421 = vmatprep.mubr.msk.f32.mxu0 %vm7349_vm4, %v7350_v59  ;;  %6482 = vmatprep.mubr.msk.f32.mxu1 %vm7349_vm4, %v7350_v59 }
 0x584   :  { %v2541_v63 = vmax.f32 %v2526_v31, 0.0 }
 0x586   :  { %6422 = vmatmul.mubr.msk.f32.gmra.mrb[114].mxu0 %vm2551_vm7, %v2535_v49  ;;  %6483 = vmatmul.mubr.msk.f32.gmra.mrb[146].mxu1 %vm2551_vm7, %v2535_v49 }
 0x587   :  { %6424 = vmatprep.mubr.msk.f32.mxu0 %vm7349_vm4, %v7350_v59  ;;  %6485 = vmatprep.mubr.msk.f32.mxu1 %vm7349_vm4, %v7350_v59 }
 0x58a   :  { %6425 = vmatmul.mubr.msk.f32.gmra.mrb[116].mxu0 %vm2551_vm7, %v2536_v53  ;;  %6486 = vmatmul.mubr.msk.f32.gmra.mrb[148].mxu1 %vm2551_vm7, %v2536_v53 }
 0x58b   :  { %6427 = vmatprep.mubr.msk.f32.mxu0 %vm7349_vm4, %v7350_v59  ;;  %6488 = vmatprep.mubr.msk.f32.mxu1 %vm7349_vm4, %v7350_v59 }
 0x58e   :  { %6428 = vmatmul.mubr.msk.f32.gmra.mrb[118].mxu0 %vm2551_vm7, %v2537_v3  ;;  %6489 = vmatmul.mubr.msk.f32.gmra.mrb[150].mxu1 %vm2551_vm7, %v2537_v3 }
 0x58f   :  { %6430 = vmatprep.mubr.msk.f32.mxu0 %vm7349_vm4, %v7350_v59  ;;  %6491 = vmatprep.mubr.msk.f32.mxu1 %vm7349_vm4, %v7350_v59 }
 0x592   :  { %6431 = vmatmul.mubr.msk.f32.gmra.mrb[120].mxu0 %vm2551_vm7, %v2538_v61  ;;  %6492 = vmatmul.mubr.msk.f32.gmra.mrb[152].mxu1 %vm2551_vm7, %v2538_v61 }
 0x593   :  { %6433 = vmatprep.mubr.msk.f32.mxu0 %vm7349_vm4, %v7350_v59  ;;  %6494 = vmatprep.mubr.msk.f32.mxu1 %vm7349_vm4, %v7350_v59 }
 0x596   :  { %6434 = vmatmul.mubr.msk.f32.gmra.mrb[122].mxu0 %vm2551_vm7, %v2539_v4  ;;  %6495 = vmatmul.mubr.msk.f32.gmra.mrb[154].mxu1 %vm2551_vm7, %v2539_v4 }
 0x597   :  { %6436 = vmatprep.mubr.msk.f32.mxu0 %vm7349_vm4, %v7350_v59  ;;  %6497 = vmatprep.mubr.msk.f32.mxu1 %vm7349_vm4, %v7350_v59 }
 0x59a   :  { %6437 = vmatmul.mubr.msk.f32.gmra.mrb[124].mxu0 %vm2551_vm7, %v2540_v58  ;;  %6498 = vmatmul.mubr.msk.f32.gmra.mrb[156].mxu1 %vm2551_vm7, %v2540_v58 }
 0x59b   :  { %6439 = vmatprep.mubr.msk.f32.mxu0 %vm7349_vm4, %v7350_v59  ;;  %6500 = vmatprep.mubr.msk.f32.mxu1 %vm7349_vm4, %v7350_v59 }
 0x59e   :  { %6440 = vmatmul.mubr.msk.f32.gmra.mrb[126].mxu0 %vm2551_vm7, %v2541_v63  ;;  %6501 = vmatmul.mubr.msk.f32.gmra.mrb[158].mxu1 %vm2551_vm7, %v2541_v63 }
 0x59f   :  { %6442 = vmatprep.mubr.msk.f32.mxu0 %vm7349_vm4, %v7350_v59  ;;  %6503 = vmatprep.mubr.msk.f32.mxu1 %vm7349_vm4, %v7350_v59 }
 0x5a2   :  { %6443 = vmatmul.mubr.msk.f32.gmra.mrb[128].mxu0 %vm2551_vm7, %v2542_v56  ;;  %6504 = vmatmul.mubr.msk.f32.gmra.mrb[160].mxu1 %vm2551_vm7, %v2542_v56 }
 0x5a3   :  { %6602 = vmatprep.mubr.msk.bf16.mxu1 %vm7349_vm4, %v7350_v59  ;;  %6536 = vmatprep.mubr.msk.f32.mxu0 %vm2911_vm8, %v2901_v9 }
 0x63d   :  { %v2663_v15 = vpop.f32.mrb[100].mxu0  ;;  %v2812_v22 = vpop.f32.mrb[132].mxu1 }
 0x63e   :  { %v2886_v0 = vmax.f32 %v2663_v15, %v2812_v22  ;;  %v6402_v38 = vpop.f32.mrb[101].mxu0  ;;  %v6463_v52 = vpop.f32.mrb[133].mxu1 }
 0x641   :  { %v2668_v6 = vpop.f32.mrb[102].mxu0  ;;  %v2817_v48 = vpop.f32.mrb[134].mxu1 }
 0x642   :  { %v2887_v50 = vmax.f32 %v2668_v6, %v2817_v48  ;;  %v6405_v14 = vpop.f32.mrb[103].mxu0  ;;  %v6466_v16 = vpop.f32.mrb[135].mxu1 }
 0x644   :  { %v8889_v21 = vpack.c.bf16 %v2887_v50, %v2886_v0 }
 0x645   :  { %v2673_v51 = vpop.f32.mrb[104].mxu0  ;;  %v2822_v19 = vpop.f32.mrb[136].mxu1 }
 0x646   :  { %v2888_v20 = vmax.f32 %v2673_v51, %v2822_v19  ;;  %v6408_v28 = vpop.f32.mrb[105].mxu0  ;;  %v6469_v35 = vpop.f32.mrb[137].mxu1  ;;  %7096 = vmatprep.subr.bf16.mxu0 %v8889_v21 }
 0x647   :  { %7098 = vmatpush3.bf16.msra.mxu0 %v8889_v21 }
 0x649   :  { %v2678_v43 = vpop.f32.mrb[106].mxu0  ;;  %v2827_v60 = vpop.f32.mrb[138].mxu1 }
 0x64a   :  { %v2889_v34 = vmax.f32 %v2678_v43, %v2827_v60  ;;  %v6411_v7 = vpop.f32.mrb[107].mxu0  ;;  %v6472_v12 = vpop.f32.mrb[139].mxu1 }
 0x64c   :  { %v8893_v37 = vpack.c.bf16 %v2889_v34, %v2888_v20 }
 0x64d   :  { %v2683_v2 = vpop.f32.mrb[108].mxu0  ;;  %v2832_v39 = vpop.f32.mrb[140].mxu1 }
 0x64e   :  { %v2890_v24 = vmax.f32 %v2683_v2, %v2832_v39  ;;  %v6414_v29 = vpop.f32.mrb[109].mxu0  ;;  %v6475_v42 = vpop.f32.mrb[141].mxu1  ;;  %7100 = vmatprep.subr.bf16.mxu0 %v8893_v37  ;;  %v2902_v2 = vld [vmem:[%s9411_s8 + $0x8] sm:$0xff]  ;;  %v2903_v39 = vld [vmem:[%s9411_s8 + $0x10] sm:$0xff] }
 0x64f   :  { %7102 = vmatpush3.bf16.msra.mxu0 %v8893_v37  ;;  %v2905_v29 = vld [vmem:[%s9411_s8 + $0x20] sm:$0xff]  ;;  %v2907_v42 = vld [vmem:[%s9411_s8 + $0x30] sm:$0xff] }
 0x651   :  { %v2688_v55 = vpop.f32.mrb[110].mxu0  ;;  %v2837_v30 = vpop.f32.mrb[142].mxu1 }
 0x652   :  { %v2891_v36 = vmax.f32 %v2688_v55, %v2837_v30  ;;  %v6417_v11 = vpop.f32.mrb[111].mxu0  ;;  %v6478_v46 = vpop.f32.mrb[143].mxu1  ;;  %v2909_v55 = vld [vmem:[%s9411_s8 + $0x40] sm:$0xff]  ;;  %v2910_v30 = vld [vmem:[%s9411_s8 + $0x48] sm:$0x3] }
 0x653   :  { %v5411_v11 = vld [vmem:[%s9411_s8 + $0x58] sm:$0xff]  ;;  %v5412_v46 = vld [vmem:[%s9411_s8 + $0x60] sm:$0xff] }
 0x654   :  { %v8897_v23 = vpack.c.bf16 %v2891_v36, %v2890_v24  ;;  %v2904_v24 = vld [vmem:[%s9411_s8 + $0x18] sm:$0xff]  ;;  %v5410_v36 = vld [vmem:[%s9411_s8 + $0x50] sm:$0xff] }
 0x655   :  { %v2693_v32 = vpop.f32.mrb[112].mxu0  ;;  %v2842_v45 = vpop.f32.mrb[144].mxu1 }
 0x656   :  { %v2892_v8 = vmax.f32 %v2693_v32, %v2842_v45  ;;  %v6420_v41 = vpop.f32.mrb[113].mxu0  ;;  %v6481_v33 = vpop.f32.mrb[145].mxu1  ;;  %7104 = vmatprep.subr.bf16.mxu0 %v8897_v23  ;;  %v5414_v32 = vld [vmem:[%s9411_s8 + $0x70] sm:$0xff]  ;;  %v5415_v45 = vld [vmem:[%s9411_s8 + $0x78] sm:$0xff] }
 0x657   :  { %7106 = vmatpush3.bf16.msra.mxu0 %v8897_v23  ;;  %v5417_v41 = vld [vmem:[%s9411_s8 + $0x88] sm:$0xff]  ;;  %v5418_v33 = vld [vmem:[%s9411_s8 + $0x90] sm:$0xff] }
 0x659   :  { %v2698_v1 = vpop.f32.mrb[114].mxu0  ;;  %v2847_v13 = vpop.f32.mrb[146].mxu1 }
 0x65a   :  { %v2893_v10 = vmax.f32 %v2698_v1, %v2847_v13  ;;  %v6423_v18 = vpop.f32.mrb[115].mxu0  ;;  %v6484_v27 = vpop.f32.mrb[147].mxu1  ;;  %v5419_v1 = vld [vmem:[%s9411_s8 + $0x98] sm:$0x3]  ;;  %v7334_v13 = vld [vmem:[%s9412_s9 + $0x20] sm:$0xff]  }
 0x65b   :  { %6599 = vmatpush3.bf16.msra.mxu1 %v7334_v13  ;;  %v7336_v18 = vld [vmem:[%s9412_s9 + $0x8] sm:$0xff]   ;;  %v7337_v27 = vld [vmem:[%s9412_s9 + $0x10] sm:$0xff]  }
 0x65c   :  { %v8901_v17 = vpack.c.bf16 %v2893_v10, %v2892_v8  ;;  %v5416_v8 = vld [vmem:[%s9411_s8 + $0x80] sm:$0xff]  ;;  %6600 = vmatprep.subr.bf16.mxu1 %v7350_v59 }
 0x65d   :  { %v2703_v44 = vpop.f32.mrb[116].mxu0  ;;  %v2852_v49 = vpop.f32.mrb[148].mxu1  ;;  %v7335_v10 = vld [vmem:[%s9412_s9] sm:$0xff]  }
 0x65e   :  { %v2894_v40 = vmax.f32 %v2703_v44, %v2852_v49  ;;  %v6426_v53 = vpop.f32.mrb[117].mxu0  ;;  %v6487_v47 = vpop.f32.mrb[149].mxu1  ;;  %7108 = vmatprep.subr.bf16.mxu0 %v8901_v17 }
 0x65f   :  { %7110 = vmatpush3.bf16.msra.mxu0 %v8901_v17 }
 0x661   :  { %v2708_v5 = vpop.f32.mrb[118].mxu0  ;;  %v2857_v3 = vpop.f32.mrb[150].mxu1 }
 0x662   :  { %v2895_v61 = vmax.f32 %v2708_v5, %v2857_v3  ;;  %v6429_v54 = vpop.f32.mrb[119].mxu0  ;;  %v6490_v4 = vpop.f32.mrb[151].mxu1 }
 0x664   :  { %v8905_v57 = vpack.c.bf16 %v2895_v61, %v2894_v40 }
 0x665   :  { %v2713_v58 = vpop.f32.mrb[120].mxu0  ;;  %v2862_v31 = vpop.f32.mrb[152].mxu1 }
 0x666   :  { %v2896_v62 = vmax.f32 %v2713_v58, %v2862_v31  ;;  %v6432_v63 = vpop.f32.mrb[121].mxu0  ;;  %v6493_v56 = vpop.f32.mrb[153].mxu1  ;;  %7112 = vmatprep.subr.bf16.mxu0 %v8905_v57 }
 0x667   :  { %7114 = vmatpush3.bf16.msra.mxu0 %v8905_v57 }
 0x669   :  { %v2718_v9 = vpop.f32.mrb[122].mxu0  ;;  %v2867_v25 = vpop.f32.mrb[154].mxu1 }
 0x66a   :  { %v2897_v15 = vmax.f32 %v2718_v9, %v2867_v25  ;;  %v6435_v22 = vpop.f32.mrb[123].mxu0  ;;  %v6496_v0 = vpop.f32.mrb[155].mxu1 }
 0x66c   :  { %v7115_v38 = vpack.c.bf16 %v2897_v15, %v2896_v62 }
 0x66d   :  { %v2723_v52 = vpop.f32.mrb[124].mxu0  ;;  %v2872_v6 = vpop.f32.mrb[156].mxu1 }
 0x66e   :  { %v2898_v48 = vmax.f32 %v2723_v52, %v2872_v6  ;;  %v6438_v50 = vpop.f32.mrb[125].mxu0  ;;  %v6499_v14 = vpop.f32.mrb[157].mxu1  ;;  %7116 = vmatprep.subr.bf16.mxu0 %v7115_v38 }
 0x66f   :  { %7118 = vmatpush3.bf16.msra.mxu0 %v7115_v38 }
 0x671   :  { %v2728_v16 = vpop.f32.mrb[126].mxu0  ;;  %v2877_v51 = vpop.f32.mrb[158].mxu1 }
 0x672   :  { %v2899_v19 = vmax.f32 %v2728_v16, %v2877_v51  ;;  %v6441_v20 = vpop.f32.mrb[127].mxu0  ;;  %v6502_v28 = vpop.f32.mrb[159].mxu1 }
 0x674   :  { %v7119_v35 = vpack.c.bf16 %v2899_v19, %v2898_v48 }
 0x675   :  { %v2733_v43 = vpop.f32.mrb[128].mxu0  ;;  %v2882_v60 = vpop.f32.mrb[160].mxu1 }
 0x676   :  { %v2900_v34 = vmax.f32 %v2733_v43, %v2882_v60  ;;  %v6444_v7 = vpop.f32.mrb[129].mxu0  ;;  %v6505_v12 = vpop.f32.mrb[161].mxu1  ;;  %7120 = vmatprep.subr.bf16.mxu0 %v7119_v35  ;;  %v7339_v60 = vld [vmem:[%s9412_s9 + $0x30] sm:$0xff]  }
 0x677   :  { %7122 = vmatpush3.bf16.msra.mxu0 %v7119_v35 }
 0x678   :  { %6534 = vmatprep.subr.mxu0 %v2900_v34 }
 0x67b   :  { %6535 = vmatpush3.msra.mxu0 %v2900_v34 }
 0x67c   :  { %6537 = vmatmul.mubr.msk.f32.vlgmr.msra.gmra.mrb[130].mxu0 %vm2911_vm8, %v2902_v2  ;;  %7124 = vmatprep.subr.bf16.mxu0 %v8889_v21 }
 0x67d   :  { %7126 = vmatpush3.bf16.msra.mxu0 %v8889_v21  ;;  %6539 = vmatprep.mubr.msk.f32.mxu0 %vm2911_vm8, %v2903_v39  ;;  %v2906_v21 = vld [vmem:[%s9411_s8 + $0x28] sm:$0xff] }
 0x67e   :  { %7128 = vmatprep.subr.bf16.mxu0 %v8893_v37 }
 0x680   :  { %6540 = vmatmul.mubr.msk.f32.gmra.mrb[132].mxu0 %vm2911_vm8, %v2904_v24 }
 0x681   :  { %7130 = vmatpush3.bf16.msra.mxu0 %v8893_v37  ;;  %6542 = vmatprep.mubr.msk.f32.mxu0 %vm2911_vm8, %v2905_v29  ;;  %v2908_v37 = vld [vmem:[%s9411_s8 + $0x38] sm:$0xff] }
 0x682   :  { %7132 = vmatprep.subr.bf16.mxu0 %v8897_v23 }
 0x684   :  { %6543 = vmatmul.mubr.msk.f32.gmra.mrb[134].mxu0 %vm2911_vm8, %v2906_v21 }
 0x685   :  { %7134 = vmatpush3.bf16.msra.mxu0 %v8897_v23  ;;  %6545 = vmatprep.mubr.msk.f32.mxu0 %vm2911_vm8, %v2907_v42  ;;  %v5413_v23 = vld [vmem:[%s9411_s8 + $0x68] sm:$0xff] }
 0x686   :  { %7136 = vmatprep.subr.bf16.mxu0 %v8901_v17 }
 0x688   :  { %6546 = vmatmul.mubr.msk.f32.gmra.mrb[136].mxu0 %vm2911_vm8, %v2908_v37 }
 0x689   :  { %7138 = vmatpush3.bf16.msra.mxu0 %v8901_v17  ;;  %6548 = vmatprep.mubr.msk.f32.mxu0 %vm2911_vm8, %v2909_v55  ;;  %v7338_v17 = vld [vmem:[%s9412_s9 + $0x28] sm:$0xff]  }
 0x68a   :  { %7140 = vmatprep.subr.bf16.mxu0 %v8905_v57  ;;  %6601 = vmatpush3.bf16.msra.mxu1 %v7338_v17 }
 0x68b   :  { %6648 = vmatprep.subr.bf16.mxu1 %v7350_v59 }
 0x68c   :  { %6549 = vmatmul.mubr.msk.f32.gmra.mrb[138].mxu0 %vm2911_vm8, %v2910_v30 }
 0x68d   :  { %7142 = vmatpush3.bf16.msra.mxu0 %v8905_v57  ;;  %6581 = vmatprep.mubr.msk.f32.mxu0 %vm2911_vm8, %v5410_v36  ;;  %v7340_v36 = vld [vmem:[%s9412_s9 + $0x38] sm:$0xff]  }
 0x68e   :  { %7144 = vmatprep.subr.bf16.mxu0 %v7115_v38 }
 0x691   :  { %7146 = vmatpush3.bf16.msra.mxu0 %v7115_v38 }
 0x692   :  { %7148 = vmatprep.subr.bf16.mxu0 %v7119_v35 }
 0x695   :  { %7150 = vmatpush3.bf16.msra.mxu0 %v7119_v35 }
 0x696   :  { %6579 = vmatprep.subr.mxu0 %v2900_v34 }
 0x699   :  { %6580 = vmatpush3.msra.mxu0 %v2900_v34 }
 0x69a   :  { %6582 = vmatmul.mubr.msk.f32.vlgmr.msra.gmra.mrb[140].mxu0 %vm2911_vm8, %v5411_v11  ;;  %6622 = vmatprep.subr.bf16.mxu0 %v7350_v59 }
 0x69b   :  { %6584 = vmatprep.mubr.msk.f32.mxu0 %vm2911_vm8, %v5412_v46  ;;  %6623 = vmatpush3.bf16.msra.mxu0 %v7335_v10 }
 0x69c   :  { %6624 = vmatprep.subr.bf16.mxu0 %v7350_v59 }
 0x69e   :  { %6585 = vmatmul.mubr.msk.f32.gmra.mrb[142].mxu0 %vm2911_vm8, %v5413_v23 }
 0x69f   :  { %6587 = vmatprep.mubr.msk.f32.mxu0 %vm2911_vm8, %v5414_v32  ;;  %6625 = vmatpush3.bf16.msra.mxu0 %v7336_v18  ;;  %v7341_v18 = vld [vmem:[%s9412_s9 + $0x40] sm:$0xff]  }
 0x6a0   :  { %6626 = vmatprep.subr.bf16.mxu0 %v7350_v59 }
 0x6a2   :  { %6588 = vmatmul.mubr.msk.f32.gmra.mrb[144].mxu0 %vm2911_vm8, %v5415_v45 }
 0x6a3   :  { %6590 = vmatprep.mubr.msk.f32.mxu0 %vm2911_vm8, %v5416_v8  ;;  %6627 = vmatpush3.bf16.msra.mxu0 %v7337_v27 }
 0x6a4   :  { %7151 = vmatprep.subr.bf16.mxu0 %v7348_v26 }
 0x6a6   :  { %6591 = vmatmul.mubr.msk.f32.gmra.mrb[146].mxu0 %vm2911_vm8, %v5417_v41 }
 0x6a7   :  { %6593 = vmatprep.mubr.msk.f32.mxu0 %vm2911_vm8, %v5418_v33 }
 0x6aa   :  { %6594 = vmatmul.mubr.msk.f32.gmra.mrb[148].mxu0 %vm2911_vm8, %v5419_v1 }
 0x6ab   :  { %6628 = vmatprep.mubr.msk.bf16.mxu0 %vm7349_vm4, %v7350_v59 }
 0x74f   :  { %v6538_v44 = vpop.f32.mrb[130].mxu0 }
 0x750   :  { %v3008_v49 = vpop.f32.mrb[131].mxu0 }
 0x753   :  { %v6541_v40 = vpop.f32.mrb[132].mxu0 }
 0x754   :  { %v3018_v53 = vpop.f32.mrb[133].mxu0 }
 0x757   :  { %v6544_v47 = vpop.f32.mrb[134].mxu0 }
 0x758   :  { %v3028_v5 = vpop.f32.mrb[135].mxu0 }
 0x75b   :  { %v6547_v3 = vpop.f32.mrb[136].mxu0 }
 0x75c   :  { %v3038_v61 = vpop.f32.mrb[137].mxu0 }
 0x75f   :  { %v6550_v54 = vpop.f32.mrb[138].mxu0 }
 0x760   :  { %v3048_v4 = vpop.f32.mrb[139].mxu0 }
 0x76d   :  { %v6583_v57 = vpop.f32.mrb[140].mxu0 }
 0x76e   :  { %v3214_v58 = vmax.f32 %v6538_v44, %v6583_v57  ;;  %v3164_v31 = vpop.f32.mrb[141].mxu0  ;;  %v3648_v57 = vld [vmem:[%s9413_s11] sm:$0xff] }
 0x76f   :  { %v3213_v62 = vmax.f32 %v3008_v49, %v3164_v31  ;;  %v5476_v31 = vld [vmem:[%s9413_s11 + $0x20] sm:$0xff] }
 0x771   :  { %v3223_v63 = vpack.c.bf16 %v3214_v58, %v3213_v62  ;;  %v6586_v56 = vpop.f32.mrb[142].mxu0  ;;  %v3649_v58 = vld [vmem:[%s9413_s11 + $0x8] sm:$0xff] }
 0x772   :  { %v3216_v9 = vmax.f32 %v6541_v40, %v6586_v56  ;;  %v3174_v25 = vpop.f32.mrb[143].mxu0  ;;  %v7152_v62 = vpack.c.bf16 %v3649_v58, %v3648_v57  ;;  %v9120_v57 = vld [vmem:[%s9414_s10] ss:$0 sm:$0xff] }
 0x773   :  { %v3245_v15 = vshll.u32 %v3223_v63, 16  ;;  %v3215_v22 = vmax.f32 %v3018_v53, %v3174_v25  ;;  %6629 = vmatmul.mubr.msk.bf16.vlgmr.msra.gmra.mrb[152].mxu0 %vm3299_vm9, %v3223_v63  ;;  %v3243_v6 = vshrl.u32 %v3223_v63, 16  ;;  %v3500_v14 = vrot.slane %v3223_v63, 1  ;;  %v5477_v63 = vld [vmem:[%s9413_s11 + $0x28] sm:$0xff]  ;;  %v3651_v25 = vld [vmem:[%s9413_s11 + $0x18] sm:$0xff] }
 0x774   :  { %6632 = vmatprep.mubr.msk.bf16.mxu0 %vm7349_vm4, %v7350_v59  ;;  %v7158_v56 = vpack.c.bf16 %v5477_v63, %v5476_v31  ;;  %7153 = vmatpush3.bf16.msra.mxu0 %v7152_v62 }
 0x775   :  { %v3247_v0 = vrot.slane %v3245_v15, 1  ;;  %v3224_v38 = vpack.c.bf16 %v3216_v9, %v3215_v22  ;;  %v6589_v52 = vpop.f32.mrb[144].mxu0  ;;  %7154 = vmatprep.subr.bf16.mxu0 %v7348_v26  ;;  %v3650_v9 = vld [vmem:[%s9413_s11 + $0x10] sm:$0xff] }
 0x776   :  { %v3218_v48 = vmax.f32 %v6544_v47, %v6589_v52  ;;  %v3184_v50 = vpop.f32.mrb[145].mxu0  ;;  %v5478_v15 = vld [vmem:[%s9413_s11 + $0x30] sm:$0xff]  ;;  %v7155_v22 = vpack.c.bf16 %v3651_v25, %v3650_v9 }
 0x777   :  { %v3250_v16 = vshll.u32 %v3224_v38, 16  ;;  %v3501_v51 = vrot.slane %v3224_v38, 1  ;;  %v3217_v19 = vmax.f32 %v3028_v5, %v3184_v50  ;;  %v3248_v20 = vor.u32 %v3247_v0, %v3243_v6  ;;  %v5479_v0 = vld [vmem:[%s9413_s11 + $0x38] sm:$0xff] }
 0x778   :  { %v3254_v24 = vshrl.u32 %v3224_v38, 16  ;;  %7156 = vmatpush3.bf16.msra.mxu0 %v7155_v22 }
 0x779   :  { %v3252_v28 = vrot.slane %v3250_v16, 1  ;;  %v3225_v35 = vpack.c.bf16 %v3218_v48, %v3217_v19  ;;  %v6592_v43 = vpop.f32.mrb[146].mxu0  ;;  %v3502_v34 = vsel %vm666_vm3, %v3500_v14, %v3501_v51  ;;  %7163 = vmatprep.subr.bf16.mxu0 %v7348_v26 }
 0x77a   :  { %v3220_v7 = vmax.f32 %v6547_v3, %v6592_v43  ;;  %v3194_v12 = vpop.f32.mrb[147].mxu0 }
 0x77b   :  { %v3219_v2 = vmax.f32 %v3038_v61, %v3194_v12  ;;  %6633 = vmatmul.mubr.msk.bf16.gmra.mrb[156].mxu0 %vm3299_vm9, %v3224_v38  ;;  %v3253_v39 = vsel %vm123_vm1, %v3248_v20, %v3252_v28  ;;  %v3258_v29 = vshll.u32 %v3225_v35, 16  ;;  %v3503_v21 = vrot.slane %v3225_v35, 1 }
 0x77c   :  { %6603 = vmatmul.mubr.msk.bf16.vlgmr.msra.gmra.mrb[164].mxu1 %vm3299_vm9, %v3253_v39  ;;  %6636 = vmatprep.mubr.msk.bf16.mxu0 %vm7349_vm4, %v7350_v59  ;;  %v3256_v55 = vor.u32 %v3254_v24, %v3252_v28  ;;  %v3262_v8 = vshrl.u32 %v3225_v35, 16  ;;  %v7161_v38 = vpack.c.bf16 %v5479_v0, %v5478_v15 }
 0x77d   :  { %v3226_v42 = vpack.c.bf16 %v3220_v7, %v3219_v2  ;;  %v6595_v37 = vpop.f32.mrb[148].mxu0  ;;  %6606 = vmatprep.mubr.msk.bf16.mxu1 %vm7349_vm4, %v7350_v59  ;;  %v3260_v30 = vrot.slane %v3258_v29, 1  ;;  %6649 = vmatpush3.bf16.msra.mxu1 %v7339_v60  ;;  %v3504_v23 = vsel %vm666_vm3, %v3501_v51, %v3503_v21 }
 0x77e   :  { %v3222_v11 = vmax.f32 %v6550_v54, %v6595_v37  ;;  %v3204_v46 = vpop.f32.mrb[149].mxu0  ;;  %6650 = vmatprep.subr.bf16.mxu1 %v7350_v59 }
 0x77f   :  { %v3221_v32 = vmax.f32 %v3048_v4, %v3204_v46  ;;  %v3261_v45 = vsel %vm123_vm1, %v3256_v55, %v3260_v30  ;;  %v3266_v41 = vshll.u32 %v3226_v42, 16  ;;  %v3505_v33 = vrot.slane %v3226_v42, 1 }
 0x780   :  { %v3264_v13 = vor.u32 %v3262_v8, %v3260_v30  ;;  %v3270_v40 = vshrl.u32 %v3226_v42, 16 }
 0x781   :  { %v3234_v1 = vpack.c.bf16 %v3222_v11, %v3221_v32  ;;  %v3268_v10 = vrot.slane %v3266_v41, 1  ;;  %6651 = vmatpush3.bf16.msra.mxu1 %v7340_v36  ;;  %v3506_v27 = vsel %vm666_vm3, %v3503_v21, %v3505_v33  ;;  %v3227_v61 = vpack.c.bf16 %v3221_v32, %v3221_v32 }
 0x782   :  { %6652 = vmatprep.subr.bf16.mxu1 %v7350_v59 }
 0x783   :  { %v3274_v17 = vshll.u32 %v3234_v1, 16  ;;  %v3507_v44 = vrot.slane %v3234_v1, 1  ;;  %6637 = vmatmul.mubr.msk.bf16.gmra.mrb[160].mxu0 %vm3299_vm9, %v3225_v35  ;;  %v3269_v49 = vsel %vm123_vm1, %v3264_v13, %v3268_v10  ;;  %v3272_v47 = vor.u32 %v3270_v40, %v3268_v10 }
 0x784   :  { %6607 = vmatmul.mubr.msk.bf16.gmra.mrb[168].mxu1 %vm3299_vm9, %v3261_v45  ;;  %6640 = vmatprep.mubr.msk.bf16.mxu0 %vm7349_vm4, %v7350_v59  ;;  %v3278_v54 = vshrl.u32 %v3234_v1, 16 }
 0x785   :  { %v3276_v53 = vrot.slane %v3274_v17, 1  ;;  %6610 = vmatprep.mubr.msk.bf16.mxu1 %vm7349_vm4, %v7350_v59  ;;  %6653 = vmatpush3.bf16.msra.mxu1 %v7341_v18  ;;  %v3508_v5 = vsel %vm666_vm3, %v3505_v33, %v3507_v44 }
 0x786   :  { %7157 = vmatprep.subr.bf16.mxu1 %v7348_v26 }
 0x787   :  { %v3277_v3 = vsel %vm123_vm1, %v3272_v47, %v3276_v53  ;;  %v3280_v4 = vor.u32 %v3278_v54, %v3276_v53 }
 0x78b   :  { %6641 = vmatmul.mubr.msk.bf16.gmra.mrb[164].mxu0 %vm3299_vm9, %v3226_v42 }
 0x78c   :  { %6611 = vmatmul.mubr.msk.bf16.gmra.mrb[172].mxu1 %vm3299_vm9, %v3269_v49  ;;  %6644 = vmatprep.mubr.msk.bf16.mxu0 %vm7349_vm4, %v7350_v59 }
 0x78d   :  { %6614 = vmatprep.mubr.msk.bf16.mxu1 %vm7349_vm4, %v7350_v59 }
 0x793   :  { %6645 = vmatmul.mubr.msk.bf16.gmra.mrb[168].mxu0 %vm3299_vm9, %v3227_v61 }
 0x794   :  { %6615 = vmatmul.mubr.msk.bf16.gmra.mrb[176].mxu1 %vm3299_vm9, %v3277_v3  ;;  %6682 = vmatprep.mubr.msk.f32.mxu0 %vm7349_vm4, %v7350_v59 }
 0x795   :  { %6618 = vmatprep.mubr.msk.bf16.mxu1 %vm7349_vm4, %v7350_v59 }
 0x79c   :  { %6619 = vmatmul.mubr.msk.bf16.gmra.mrb[180].mxu1 %vm3299_vm9, %v3280_v4 }
 0x79d   :  { %6654 = vmatprep.mubr.msk.bf16.mxu1 %vm7349_vm4, %v7350_v59 }
 0x7a4   :  { %6655 = vmatmul.mubr.msk.bf16.vlgmr.msra.gmra.mrb[184].mxu1 %vm3299_vm9, %v3502_v34 }
 0x7a5   :  { %6658 = vmatprep.mubr.msk.bf16.mxu1 %vm7349_vm4, %v7350_v59  ;;  %7159 = vmatpush3.bf16.msra.mxu1 %v7158_v56 }
 0x7a6   :  { %7160 = vmatprep.subr.bf16.mxu1 %v7348_v26 }
 0x7a9   :  { %7162 = vmatpush3.bf16.msra.mxu1 %v7161_v38 }
 0x7aa   :  { %7175 = vmatprep.subr.bf16.mxu1 %v7348_v26 }
 0x7ac   :  { %6659 = vmatmul.mubr.msk.bf16.gmra.mrb[188].mxu1 %vm3299_vm9, %v3504_v23 }
 0x7ad   :  { %6662 = vmatprep.mubr.msk.bf16.mxu1 %vm7349_vm4, %v7350_v59 }
 0x7b4   :  { %6663 = vmatmul.mubr.msk.bf16.gmra.mrb[192].mxu1 %vm3299_vm9, %v3506_v27 }
 0x7b5   :  { %6666 = vmatprep.mubr.msk.bf16.mxu1 %vm7349_vm4, %v7350_v59 }
 0x7bc   :  { %6667 = vmatmul.mubr.msk.bf16.gmra.mrb[196].mxu1 %vm3299_vm9, %v3508_v5 }
 0x7bd   :  { %6670 = vmatprep.mubr.msk.bf16.mxu1 %vm7349_vm4, %v7350_v59 }
 0x7c4   :  { %6671 = vmatmul.mubr.msk.bf16.gmra.mrb[200].mxu1 %vm3299_vm9, %v3507_v44 }
 0x7c5   :  { %6717 = vmatprep.mubr.msk.f32.mxu1 %vm7349_vm4, %v7350_v59 }
 0x846   :  { %v3450_v52 = vpop.f32.mrb[152].mxu0 }
 0x847   :  { %v6630_v6 = vpop.f32.mrb[153].mxu0 }
 0x848   :  { %v3453_v48 = vpop.f32.mrb[154].mxu0 }
 0x849   :  { %v6631_v50 = vpop.f32.mrb[155].mxu0 }
 0x84e   :  { %v3458_v14 = vpop.f32.mrb[156].mxu0 }
 0x84f   :  { %v3349_v16 = vpop.f32.mrb[164].mxu1  ;;  %v6634_v51 = vpop.f32.mrb[157].mxu0 }
 0x850   :  { %v3451_v19 = vadd.f32 %v3450_v52, %v3349_v16  ;;  %v6604_v20 = vpop.f32.mrb[165].mxu1  ;;  %v3461_v28 = vpop.f32.mrb[158].mxu0 }
 0x851   :  { %v3352_v35 = vpop.f32.mrb[166].mxu1  ;;  %v6635_v43 = vpop.f32.mrb[159].mxu0 }
 0x852   :  { %v3454_v60 = vadd.f32 %v3453_v48, %v3352_v35  ;;  %v6605_v34 = vpop.f32.mrb[167].mxu1 }
 0x856   :  { %v3466_v7 = vpop.f32.mrb[160].mxu0 }
 0x857   :  { %v3357_v12 = vpop.f32.mrb[168].mxu1  ;;  %v6638_v2 = vpop.f32.mrb[161].mxu0 }
 0x858   :  { %v3459_v39 = vadd.f32 %v3458_v14, %v3357_v12  ;;  %v6608_v24 = vpop.f32.mrb[169].mxu1  ;;  %v3469_v29 = vpop.f32.mrb[162].mxu0 }
 0x859   :  { %v3360_v21 = vpop.f32.mrb[170].mxu1  ;;  %v6639_v42 = vpop.f32.mrb[163].mxu0 }
 0x85a   :  { %v3462_v37 = vadd.f32 %v3461_v28, %v3360_v21  ;;  %v6609_v55 = vpop.f32.mrb[171].mxu1 }
 0x85e   :  { %v3474_v30 = vpop.f32.mrb[164].mxu0 }
 0x85f   :  { %v3365_v36 = vpop.f32.mrb[172].mxu1  ;;  %v6642_v11 = vpop.f32.mrb[165].mxu0 }
 0x860   :  { %v3467_v46 = vadd.f32 %v3466_v7, %v3365_v36  ;;  %v6612_v23 = vpop.f32.mrb[173].mxu1  ;;  %v3477_v32 = vpop.f32.mrb[166].mxu0 }
 0x861   :  { %v3368_v45 = vpop.f32.mrb[174].mxu1  ;;  %v6643_v8 = vpop.f32.mrb[167].mxu0 }
 0x862   :  { %v3470_v41 = vadd.f32 %v3469_v29, %v3368_v45  ;;  %v6613_v33 = vpop.f32.mrb[175].mxu1 }
 0x866   :  { %v3482_v1 = vpop.f32.mrb[168].mxu0 }
 0x867   :  { %v3373_v13 = vpop.f32.mrb[176].mxu1  ;;  %v6646_v10 = vpop.f32.mrb[169].mxu0 }
 0x868   :  { %v9111_v18 = vadd.f32 %v3474_v30, %v3373_v13  ;;  %v6616_v27 = vpop.f32.mrb[177].mxu1  ;;  %v3485_v17 = vpop.f32.mrb[170].mxu0 }
 0x869   :  { %v3376_v44 = vpop.f32.mrb[178].mxu1  ;;  %v6647_v49 = vpop.f32.mrb[171].mxu0 }
 0x86a   :  { %v9113_v40 = vadd.f32 %v3477_v32, %v3376_v44  ;;  %v6617_v53 = vpop.f32.mrb[179].mxu1 }
 0x86f   :  { %v3381_v47 = vpop.f32.mrb[180].mxu1 }
 0x870   :  { %v9115_v5 = vadd.f32 %v3482_v1, %v3381_v47  ;;  %v6620_v3 = vpop.f32.mrb[181].mxu1 }
 0x871   :  { %v3384_v61 = vpop.f32.mrb[182].mxu1 }
 0x872   :  { %v6621_v54 = vpop.f32.mrb[183].mxu1 }
 0x877   :  { %v3576_v4 = vpop.f32.mrb[184].mxu1 }
 0x878   :  { %v3614_v58 = vadd.f32 %v3576_v4, %v3451_v19  ;;  %v6656_v31 = vpop.f32.mrb[185].mxu1 }
 0x879   :  { %v3579_v62 = vpop.f32.mrb[186].mxu1 }
 0x87a   :  { %v3630_v63 = vadd.f32 %v9120_v57, %v3614_v58  ;;  %v3615_v56 = vadd.f32 %v3579_v62, %v3454_v60  ;;  %v6657_v9 = vpop.f32.mrb[187].mxu1 }
 0x87c   :  { %v3639_v25 = vmax.f32 %v3630_v63, 0.0  ;;  %v3631_v15 = vadd.f32 %v9120_v57, %v3615_v56 }
 0x87e   :  { %6683 = vmatmul.mubr.msk.f32.vlgmr.msra.gmra.mrb[150].mxu0 %vm3652_vm10, %v3639_v25  ;;  %6718 = vmatmul.mubr.msk.f32.vlgmr.msra.gmra.mrb[162].mxu1 %vm3652_vm10, %v3639_v25  ;;  %v3640_v0 = vmax.f32 %v3631_v15, 0.0 }
 0x87f   :  { %v3584_v22 = vpop.f32.mrb[188].mxu1  ;;  %6685 = vmatprep.mubr.msk.f32.mxu0 %vm7349_vm4, %v7350_v59  ;;  %6720 = vmatprep.mubr.msk.f32.mxu1 %vm7349_vm4, %v7350_v59 }
 0x880   :  { %v3616_v38 = vadd.f32 %v3584_v22, %v3459_v39  ;;  %v6660_v52 = vpop.f32.mrb[189].mxu1 }
 0x881   :  { %v3587_v6 = vpop.f32.mrb[190].mxu1 }
 0x882   :  { %v3632_v48 = vadd.f32 %v9120_v57, %v3616_v38  ;;  %v3617_v50 = vadd.f32 %v3587_v6, %v3462_v37  ;;  %v6661_v14 = vpop.f32.mrb[191].mxu1  ;;  %6686 = vmatmul.mubr.msk.f32.gmra.mrb[172].mxu0 %vm3652_vm10, %v3640_v0  ;;  %6721 = vmatmul.mubr.msk.f32.gmra.mrb[204].mxu1 %vm3652_vm10, %v3640_v0 }
 0x883   :  { %6688 = vmatprep.mubr.msk.f32.mxu0 %vm7349_vm4, %v7350_v59  ;;  %6723 = vmatprep.mubr.msk.f32.mxu1 %vm7349_vm4, %v7350_v59 }
 0x884   :  { %v3641_v16 = vmax.f32 %v3632_v48, 0.0  ;;  %v3633_v51 = vadd.f32 %v9120_v57, %v3617_v50 }
 0x886   :  { %6689 = vmatmul.mubr.msk.f32.gmra.mrb[174].mxu0 %vm3652_vm10, %v3641_v16  ;;  %6724 = vmatmul.mubr.msk.f32.gmra.mrb[206].mxu1 %vm3652_vm10, %v3641_v16  ;;  %v3642_v20 = vmax.f32 %v3633_v51, 0.0 }
 0x887   :  { %v3592_v19 = vpop.f32.mrb[192].mxu1  ;;  %6691 = vmatprep.mubr.msk.f32.mxu0 %vm7349_vm4, %v7350_v59  ;;  %6726 = vmatprep.mubr.msk.f32.mxu1 %vm7349_vm4, %v7350_v59 }
 0x888   :  { %v3618_v28 = vadd.f32 %v3592_v19, %v3467_v46  ;;  %v6664_v35 = vpop.f32.mrb[193].mxu1 }
 0x889   :  { %v3595_v43 = vpop.f32.mrb[194].mxu1 }
 0x88a   :  { %v3634_v60 = vadd.f32 %v9120_v57, %v3618_v28  ;;  %v3619_v34 = vadd.f32 %v3595_v43, %v3470_v41  ;;  %v6665_v7 = vpop.f32.mrb[195].mxu1  ;;  %6692 = vmatmul.mubr.msk.f32.gmra.mrb[176].mxu0 %vm3652_vm10, %v3642_v20  ;;  %6727 = vmatmul.mubr.msk.f32.gmra.mrb[208].mxu1 %vm3652_vm10, %v3642_v20 }
 0x88b   :  { %6694 = vmatprep.mubr.msk.f32.mxu0 %vm7349_vm4, %v7350_v59  ;;  %6729 = vmatprep.mubr.msk.f32.mxu1 %vm7349_vm4, %v7350_v59 }
 0x88c   :  { %v3643_v12 = vmax.f32 %v3634_v60, 0.0  ;;  %v3635_v2 = vadd.f32 %v9120_v57, %v3619_v34 }
 0x88e   :  { %6695 = vmatmul.mubr.msk.f32.gmra.mrb[178].mxu0 %vm3652_vm10, %v3643_v12  ;;  %6730 = vmatmul.mubr.msk.f32.gmra.mrb[210].mxu1 %vm3652_vm10, %v3643_v12  ;;  %v3644_v24 = vmax.f32 %v3635_v2, 0.0 }
 0x88f   :  { %v3600_v39 = vpop.f32.mrb[196].mxu1  ;;  %6697 = vmatprep.mubr.msk.f32.mxu0 %vm7349_vm4, %v7350_v59  ;;  %6732 = vmatprep.mubr.msk.f32.mxu1 %vm7349_vm4, %v7350_v59 }
 0x890   :  { %v3620_v29 = vadd.f32 %v3600_v39, %v9111_v18  ;;  %v6668_v21 = vpop.f32.mrb[197].mxu1 }
 0x891   :  { %v3603_v42 = vpop.f32.mrb[198].mxu1 }
 0x892   :  { %v3636_v37 = vadd.f32 %v9120_v57, %v3620_v29  ;;  %v3621_v55 = vadd.f32 %v3603_v42, %v9113_v40  ;;  %v6669_v30 = vpop.f32.mrb[199].mxu1  ;;  %6698 = vmatmul.mubr.msk.f32.gmra.mrb[180].mxu0 %vm3652_vm10, %v3644_v24  ;;  %6733 = vmatmul.mubr.msk.f32.gmra.mrb[212].mxu1 %vm3652_vm10, %v3644_v24 }
 0x893   :  { %6700 = vmatprep.mubr.msk.f32.mxu0 %vm7349_vm4, %v7350_v59  ;;  %6735 = vmatprep.mubr.msk.f32.mxu1 %vm7349_vm4, %v7350_v59  ;;  %v3915_v30 = vld [vmem:[%s9415_s12 + $0x8] sm:$0xff] }
 0x894   :  { %v3645_v36 = vmax.f32 %v3636_v37, 0.0  ;;  %v3637_v11 = vadd.f32 %v9120_v57, %v3621_v55  ;;  %v3914_v37 = vld [vmem:[%s9415_s12] sm:$0xff]  ;;  %v5496_v55 = vld [vmem:[%s9415_s12 + $0x38] sm:$0xff] }
 0x896   :  { %6701 = vmatmul.mubr.msk.f32.gmra.mrb[182].mxu0 %vm3652_vm10, %v3645_v36  ;;  %6736 = vmatmul.mubr.msk.f32.gmra.mrb[214].mxu1 %vm3652_vm10, %v3645_v36  ;;  %v3646_v23 = vmax.f32 %v3637_v11, 0.0  ;;  %v5497_v36 = vld [vmem:[%s9415_s12 + $0x40] sm:$0xff]  ;;  %v3916_v11 = vld [vmem:[%s9415_s12 + $0x10] sm:$0xff] }
 0x897   :  { %v3608_v46 = vpop.f32.mrb[200].mxu1  ;;  %6703 = vmatprep.mubr.msk.f32.mxu0 %vm7349_vm4, %v7350_v59  ;;  %6738 = vmatprep.mubr.msk.f32.mxu1 %vm7349_vm4, %v7350_v59 }
 0x898   :  { %v3622_v32 = vadd.f32 %v3608_v46, %v9115_v5  ;;  %v6672_v45 = vpop.f32.mrb[201].mxu1  ;;  %v5498_v46 = vld [vmem:[%s9415_s12 + $0x48] sm:$0xff] }
 0x899   :  { %v3611_v8 = vpop.f32.mrb[202].mxu1  ;;  %v3918_v45 = vld [vmem:[%s9415_s12 + $0x20] sm:$0xff] }
 0x89a   :  { %v3638_v41 = vadd.f32 %v9120_v57, %v3622_v32  ;;  %v6673_v33 = vpop.f32.mrb[203].mxu1  ;;  %6704 = vmatmul.mubr.msk.f32.gmra.mrb[184].mxu0 %vm3652_vm10, %v3646_v23  ;;  %6739 = vmatmul.mubr.msk.f32.gmra.mrb[216].mxu1 %vm3652_vm10, %v3646_v23  ;;  %v3917_v23 = vld [vmem:[%s9415_s12 + $0x18] sm:$0xff]  ;;  %v5499_v32 = vld [vmem:[%s9415_s12 + $0x50] sm:$0xff] }
 0x89b   :  { %6706 = vmatprep.mubr.msk.f32.mxu0 %vm7349_vm4, %v7350_v59  ;;  %6741 = vmatprep.mubr.msk.f32.mxu1 %vm7349_vm4, %v7350_v59  ;;  %v5500_v8 = vld [vmem:[%s9415_s12 + $0x58] sm:$0xff]  ;;  %v5501_v33 = vld [vmem:[%s9415_s12 + $0x60] sm:$0xff] }
 0x89c   :  { %v3647_v1 = vmax.f32 %v3638_v41, 0.0  ;;  %v3919_v41 = vld [vmem:[%s9415_s12 + $0x28] sm:$0xff] }
 0x89e   :  { %6707 = vmatmul.mubr.msk.f32.gmra.mrb[186].mxu0 %vm3652_vm10, %v3647_v1  ;;  %6742 = vmatmul.mubr.msk.f32.gmra.mrb[218].mxu1 %vm3652_vm10, %v3647_v1  ;;  %v3920_v1 = vld [vmem:[%s9415_s12 + $0x30] sm:$0x3] }
 0x89f   :  { %6762 = vmatprep.mubr.msk.f32.mxu0 %vm7349_vm4, %v7350_v59  ;;  %6801 = vmatprep.mubr.msk.f32.mxu1 %vm7349_vm4, %v7350_v59 }
 0x951   :  { %v3746_v13 = vpop.f32.mrb[150].mxu0  ;;  %v3861_v10 = vpop.f32.mrb[162].mxu1 }
 0x952   :  { %v3905_v18 = vmax.f32 %v3746_v13, %v3861_v10  ;;  %v6684_v27 = vpop.f32.mrb[151].mxu0  ;;  %v6719_v17 = vpop.f32.mrb[163].mxu1  ;;  %v5502_v13 = vld [vmem:[%s9415_s12 + $0x68] sm:$0x3]  ;;  %v7342_v10 = vld [vmem:[%s9416_s13 + $0x10] sm:$0xff]  }
 0x953   :  { %v7344_v27 = vld [vmem:[%s9416_s13 + $0x8] sm:$0xff]   ;;  %v7345_v17 = vld [vmem:[%s9416_s13 + $0x18] sm:$0xff]  }
 0x955   :  { %v3751_v44 = vpop.f32.mrb[172].mxu0  ;;  %v3866_v49 = vpop.f32.mrb[204].mxu1 }
 0x956   :  { %v3906_v40 = vmax.f32 %v3751_v44, %v3866_v49  ;;  %v6687_v53 = vpop.f32.mrb[173].mxu0  ;;  %v6722_v47 = vpop.f32.mrb[205].mxu1 }
 0x958   :  { %v7164_v5 = vpack.c.bf16 %v3906_v40, %v3905_v18  ;;  %v7343_v18 = vld [vmem:[%s9416_s13] sm:$0xff]  }
 0x959   :  { %v3756_v3 = vpop.f32.mrb[174].mxu0  ;;  %v3871_v61 = vpop.f32.mrb[206].mxu1 }
 0x95a   :  { %v3907_v54 = vmax.f32 %v3756_v3, %v3871_v61  ;;  %v6690_v4 = vpop.f32.mrb[175].mxu0  ;;  %v6725_v57 = vpop.f32.mrb[207].mxu1  ;;  %7165 = vmatpush3.bf16.msra.mxu0 %v7164_v5  ;;  %7177 = vmatpush3.bf16.msra.mxu1 %v7164_v5 }
 0x95b   :  { %7166 = vmatprep.subr.bf16.mxu0 %v7348_v26  ;;  %7178 = vmatprep.subr.bf16.mxu1 %v7348_v26 }
 0x95d   :  { %v3761_v58 = vpop.f32.mrb[176].mxu0  ;;  %v3876_v31 = vpop.f32.mrb[208].mxu1 }
 0x95e   :  { %v3908_v62 = vmax.f32 %v3761_v58, %v3876_v31  ;;  %v6693_v63 = vpop.f32.mrb[177].mxu0  ;;  %v6728_v56 = vpop.f32.mrb[209].mxu1 }
 0x960   :  { %v7167_v9 = vpack.c.bf16 %v3908_v62, %v3907_v54 }
 0x961   :  { %v3766_v25 = vpop.f32.mrb[178].mxu0  ;;  %v3881_v15 = vpop.f32.mrb[210].mxu1 }
 0x962   :  { %v3909_v22 = vmax.f32 %v3766_v25, %v3881_v15  ;;  %v6696_v0 = vpop.f32.mrb[179].mxu0  ;;  %v6731_v38 = vpop.f32.mrb[211].mxu1  ;;  %7168 = vmatpush3.bf16.msra.mxu0 %v7167_v9  ;;  %7180 = vmatpush3.bf16.msra.mxu1 %v7167_v9 }
 0x963   :  { %7169 = vmatprep.subr.bf16.mxu0 %v7348_v26  ;;  %7181 = vmatprep.subr.bf16.mxu1 %v7348_v26 }
 0x965   :  { %v3771_v52 = vpop.f32.mrb[180].mxu0  ;;  %v3886_v6 = vpop.f32.mrb[212].mxu1 }
 0x966   :  { %v3910_v48 = vmax.f32 %v3771_v52, %v3886_v6  ;;  %v6699_v50 = vpop.f32.mrb[181].mxu0  ;;  %v6734_v14 = vpop.f32.mrb[213].mxu1 }
 0x968   :  { %v7170_v16 = vpack.c.bf16 %v3910_v48, %v3909_v22 }
 0x969   :  { %v3776_v51 = vpop.f32.mrb[182].mxu0  ;;  %v3891_v19 = vpop.f32.mrb[214].mxu1 }
 0x96a   :  { %v3911_v20 = vmax.f32 %v3776_v51, %v3891_v19  ;;  %v6702_v28 = vpop.f32.mrb[183].mxu0  ;;  %v6737_v35 = vpop.f32.mrb[215].mxu1  ;;  %7171 = vmatpush3.bf16.msra.mxu0 %v7170_v16  ;;  %7183 = vmatpush3.bf16.msra.mxu1 %v7170_v16 }
 0x96b   :  { %7172 = vmatprep.subr.bf16.mxu0 %v7348_v26  ;;  %7184 = vmatprep.subr.bf16.mxu1 %v7348_v26 }
 0x96d   :  { %v3781_v43 = vpop.f32.mrb[184].mxu0  ;;  %v3896_v60 = vpop.f32.mrb[216].mxu1 }
 0x96e   :  { %v3912_v34 = vmax.f32 %v3781_v43, %v3896_v60  ;;  %v6705_v7 = vpop.f32.mrb[185].mxu0  ;;  %v6740_v12 = vpop.f32.mrb[217].mxu1 }
 0x970   :  { %v7173_v2 = vpack.c.bf16 %v3912_v34, %v3911_v20  ;;  %v7346_v34 = vld [vmem:[%s9416_s13 + $0x20] sm:$0xff]  }
 0x971   :  { %v3786_v39 = vpop.f32.mrb[186].mxu0  ;;  %v3901_v24 = vpop.f32.mrb[218].mxu1 }
 0x972   :  { %v3913_v29 = vmax.f32 %v3786_v39, %v3901_v24  ;;  %v6708_v21 = vpop.f32.mrb[187].mxu0  ;;  %v6743_v42 = vpop.f32.mrb[219].mxu1  ;;  %7174 = vmatpush3.bf16.msra.mxu0 %v7173_v2  ;;  %7186 = vmatpush3.bf16.msra.mxu1 %v7173_v2 }
 0x973   :  { %6760 = vmatprep.subr.mxu0 %v7350_v59  ;;  %6799 = vmatprep.subr.mxu1 %v7350_v59 }
 0x976   :  { %6761 = vmatpush3.msra.mxu0 %v3913_v29  ;;  %6800 = vmatpush3.msra.mxu1 %v3913_v29 }
 0x977   :  { %6763 = vmatmul.mubr.msk.f32.vlgmr.msra.gmra.mrb[188].mxu0 %vm3921_vm11, %v3914_v37  ;;  %6802 = vmatmul.mubr.msk.f32.vlgmr.msra.gmra.mrb[220].mxu1 %vm3921_vm11, %v5496_v55  ;;  %v7347_v37 = vld [vmem:[%s9416_s13 + $0x28] sm:$0xff]  }
 0x978   :  { %6765 = vmatprep.mubr.msk.f32.mxu0 %vm7349_vm4, %v7350_v59  ;;  %6804 = vmatprep.mubr.msk.f32.mxu1 %vm7349_vm4, %v7350_v59 }
 0x979   :  { %6822 = vmatprep.subr.bf16.mxu0 %v7350_v59  ;;  %6838 = vmatprep.subr.bf16.mxu1 %v7350_v59 }
 0x97a   :  { %6823 = vmatpush3.bf16.msra.mxu0 %v7342_v10  ;;  %6839 = vmatpush3.bf16.msra.mxu1 %v7343_v18 }
 0x97b   :  { %6766 = vmatmul.mubr.msk.f32.gmra.mrb[190].mxu0 %vm3921_vm11, %v3915_v30  ;;  %6805 = vmatmul.mubr.msk.f32.gmra.mrb[222].mxu1 %vm3921_vm11, %v5497_v36 }
 0x97c   :  { %6768 = vmatprep.mubr.msk.f32.mxu0 %vm7349_vm4, %v7350_v59  ;;  %6807 = vmatprep.mubr.msk.f32.mxu1 %vm7349_vm4, %v7350_v59 }
 0x97d   :  { %6824 = vmatprep.subr.bf16.mxu0 %v7350_v59  ;;  %6840 = vmatprep.subr.bf16.mxu1 %v7350_v59 }
 0x97e   :  { %6841 = vmatpush3.bf16.msra.mxu1 %v7344_v27  ;;  %6825 = vmatpush3.bf16.msra.mxu0 %v7345_v17 }
 0x97f   :  { %6769 = vmatmul.mubr.msk.f32.gmra.mrb[192].mxu0 %vm3921_vm11, %v3916_v11  ;;  %6808 = vmatmul.mubr.msk.f32.gmra.mrb[224].mxu1 %vm3921_vm11, %v5498_v46 }
 0x980   :  { %6771 = vmatprep.mubr.msk.f32.mxu0 %vm7349_vm4, %v7350_v59  ;;  %6810 = vmatprep.mubr.msk.f32.mxu1 %vm7349_vm4, %v7350_v59 }
 0x981   :  { %6854 = vmatprep.subr.bf16.mxu0 %v7350_v59 }
 0x983   :  { %6772 = vmatmul.mubr.msk.f32.gmra.mrb[194].mxu0 %vm3921_vm11, %v3917_v23  ;;  %6811 = vmatmul.mubr.msk.f32.gmra.mrb[226].mxu1 %vm3921_vm11, %v5499_v32 }
 0x984   :  { %6774 = vmatprep.mubr.msk.f32.mxu0 %vm7349_vm4, %v7350_v59  ;;  %6813 = vmatprep.mubr.msk.f32.mxu1 %vm7349_vm4, %v7350_v59 }
 0x987   :  { %6775 = vmatmul.mubr.msk.f32.gmra.mrb[196].mxu0 %vm3921_vm11, %v3918_v45  ;;  %6814 = vmatmul.mubr.msk.f32.gmra.mrb[228].mxu1 %vm3921_vm11, %v5500_v8 }
 0x988   :  { %6777 = vmatprep.mubr.msk.f32.mxu0 %vm7349_vm4, %v7350_v59  ;;  %6816 = vmatprep.mubr.msk.f32.mxu1 %vm7349_vm4, %v7350_v59 }
 0x98b   :  { %6778 = vmatmul.mubr.msk.f32.gmra.mrb[198].mxu0 %vm3921_vm11, %v3919_v41  ;;  %6817 = vmatmul.mubr.msk.f32.gmra.mrb[230].mxu1 %vm3921_vm11, %v5501_v33 }
 0x98c   :  { %6780 = vmatprep.mubr.msk.f32.mxu0 %vm7349_vm4, %v7350_v59  ;;  %6819 = vmatprep.mubr.msk.f32.mxu1 %vm7349_vm4, %v7350_v59 }
 0x98f   :  { %6781 = vmatmul.mubr.msk.f32.gmra.mrb[200].mxu0 %vm3921_vm11, %v3920_v1  ;;  %6820 = vmatmul.mubr.msk.f32.gmra.mrb[232].mxu1 %vm3921_vm11, %v5502_v13 }
 0x990   :  { %6842 = vmatprep.mubr.msk.bf16.mxu1 %vm7349_vm4, %v7350_v59  ;;  %6826 = vmatprep.mubr.msk.bf16.mxu0 %vm7349_vm4, %v7350_v59 }
 0xa4a   :  { %v4009_v44 = vpop.f32.mrb[188].mxu0  ;;  %v4138_v49 = vpop.f32.mrb[220].mxu1 }
 0xa4b   :  { %v4172_v40 = vmax.f32 %v4009_v44, %v4138_v49  ;;  %v6764_v53 = vpop.f32.mrb[189].mxu0  ;;  %v6803_v47 = vpop.f32.mrb[221].mxu1 }
 0xa4c   :  { %v4492_v53 = vld [vmem:[%s9417_s15] sm:$0xff]  ;;  %v4493_v47 = vld [vmem:[%s9417_s15 + $0x8] sm:$0xff] }
 0xa4e   :  { %v4014_v5 = vpop.f32.mrb[190].mxu0  ;;  %v4143_v3 = vpop.f32.mrb[222].mxu1 }
 0xa4f   :  { %v4173_v61 = vmax.f32 %v4014_v5, %v4143_v3  ;;  %v6767_v54 = vpop.f32.mrb[191].mxu0  ;;  %v6806_v4 = vpop.f32.mrb[223].mxu1  ;;  %v5540_v5 = vld [vmem:[%s9417_s15 + $0x10] sm:$0xff]  ;;  %v7187_v3 = vpack.c.bf16 %v4493_v47, %v4492_v53 }
 0xa51   :  { %v4179_v57 = vpack.c.bf16 %v4173_v61, %v4172_v40  ;;  %v5541_v61 = vld [vmem:[%s9417_s15 + $0x18] sm:$0xff]  ;;  %7188 = vmatprep.subr.bf16.mxu1 %v7187_v3 }
 0xa52   :  { %v4019_v58 = vpop.f32.mrb[192].mxu0  ;;  %v4148_v31 = vpop.f32.mrb[224].mxu1  ;;  %v7191_v54 = vpack.c.bf16 %v5541_v61, %v5540_v5 }
 0xa53   :  { %v4174_v62 = vmax.f32 %v4019_v58, %v4148_v31  ;;  %6843 = vmatmul.mubr.msk.bf16.vlgmr.msra.gmra.mrb[236].mxu1 %vm3652_vm10, %v4179_v57  ;;  %v6770_v63 = vpop.f32.mrb[193].mxu0  ;;  %v6809_v56 = vpop.f32.mrb[225].mxu1  ;;  %v4195_v9 = vshll.u32 %v4179_v57, 16  ;;  %v4193_v48 = vshrl.u32 %v4179_v57, 16  ;;  %v4382_v16 = vrot.slane %v4179_v57, 1 }
 0xa54   :  { %6846 = vmatprep.mubr.msk.bf16.mxu1 %vm7349_vm4, %v7350_v59  ;;  %7190 = vmatpush3.bf16.msra.mxu1 %v7187_v3 }
 0xa55   :  { %v4197_v52 = vrot.slane %v4195_v9, 1 }
 0xa56   :  { %v4024_v25 = vpop.f32.mrb[194].mxu0  ;;  %v4153_v15 = vpop.f32.mrb[226].mxu1 }
 0xa57   :  { %v4175_v22 = vmax.f32 %v4024_v25, %v4153_v15  ;;  %v6773_v0 = vpop.f32.mrb[195].mxu0  ;;  %v6812_v38 = vpop.f32.mrb[227].mxu1  ;;  %v4198_v43 = vor.u32 %v4197_v52, %v4193_v48 }
 0xa59   :  { %v4180_v6 = vpack.c.bf16 %v4175_v22, %v4174_v62 }
 0xa5a   :  { %v4029_v50 = vpop.f32.mrb[196].mxu0  ;;  %v4158_v14 = vpop.f32.mrb[228].mxu1 }
 0xa5b   :  { %v4200_v51 = vshll.u32 %v4180_v6, 16  ;;  %v4383_v19 = vrot.slane %v4180_v6, 1  ;;  %v4176_v20 = vmax.f32 %v4029_v50, %v4158_v14  ;;  %6847 = vmatmul.mubr.msk.bf16.gmra.mrb[240].mxu1 %vm3652_vm10, %v4180_v6  ;;  %v6776_v28 = vpop.f32.mrb[197].mxu0  ;;  %v6815_v35 = vpop.f32.mrb[229].mxu1  ;;  %v4204_v11 = vshrl.u32 %v4180_v6, 16 }
 0xa5c   :  { %6850 = vmatprep.mubr.msk.bf16.mxu1 %vm7349_vm4, %v7350_v59 }
 0xa5d   :  { %v4202_v60 = vrot.slane %v4200_v51, 1  ;;  %v4384_v7 = vsel %vm666_vm3, %v4382_v16, %v4383_v19 }
 0xa5e   :  { %v4034_v12 = vpop.f32.mrb[198].mxu0  ;;  %v4163_v2 = vpop.f32.mrb[230].mxu1 }
 0xa5f   :  { %v4177_v39 = vmax.f32 %v4034_v12, %v4163_v2  ;;  %v4203_v24 = vsel %vm123_vm1, %v4198_v43, %v4202_v60  ;;  %v6779_v29 = vpop.f32.mrb[199].mxu0  ;;  %v6818_v21 = vpop.f32.mrb[231].mxu1  ;;  %v4206_v41 = vor.u32 %v4204_v11, %v4202_v60 }
 0xa60   :  { %6827 = vmatmul.mubr.msk.bf16.vlgmr.msra.gmra.mrb[204].mxu0 %vm3652_vm10, %v4203_v24  ;;  %v5533_v24 = vld [vmem:[%s9418_s14] ss:$0 sm:$0xff] }
 0xa61   :  { %v4181_v42 = vpack.c.bf16 %v4177_v39, %v4176_v20  ;;  %6830 = vmatprep.mubr.msk.bf16.mxu0 %vm7349_vm4, %v7350_v59  ;;  %6855 = vmatpush3.bf16.msra.mxu0 %v7346_v34 }
 0xa62   :  { %v4039_v55 = vpop.f32.mrb[200].mxu0  ;;  %v4168_v30 = vpop.f32.mrb[232].mxu1  ;;  %6856 = vmatprep.subr.bf16.mxu0 %v7350_v59 }
 0xa63   :  { %v4178_v36 = vmax.f32 %v4039_v55, %v4168_v30  ;;  %6851 = vmatmul.mubr.msk.bf16.gmra.mrb[244].mxu1 %vm3652_vm10, %v4181_v42  ;;  %v4208_v46 = vshll.u32 %v4181_v42, 16  ;;  %v6782_v23 = vpop.f32.mrb[201].mxu0  ;;  %v6821_v32 = vpop.f32.mrb[233].mxu1  ;;  %v4385_v45 = vrot.slane %v4181_v42, 1  ;;  %v4212_v27 = vshrl.u32 %v4181_v42, 16 }
 0xa65   :  { %v4186_v8 = vpack.c.bf16 %v4178_v36, %v4178_v36  ;;  %v4210_v33 = vrot.slane %v4208_v46, 1  ;;  %6857 = vmatpush3.bf16.msra.mxu0 %v7347_v37  ;;  %v4386_v1 = vsel %vm666_vm3, %v4383_v19, %v4385_v45 }
 0xa66   :  { %7192 = vmatprep.subr.bf16.mxu0 %v7191_v54 }
 0xa67   :  { %v4216_v13 = vshll.u32 %v4186_v8, 16  ;;  %v4387_v10 = vrot.slane %v4186_v8, 1  ;;  %v4211_v18 = vsel %vm123_vm1, %v4206_v41, %v4210_v33  ;;  %v4214_v44 = vor.u32 %v4212_v27, %v4210_v33 }
 0xa68   :  { %6831 = vmatmul.mubr.msk.bf16.gmra.mrb[208].mxu0 %vm3652_vm10, %v4211_v18 }
 0xa69   :  { %v4218_v17 = vrot.slane %v4216_v13, 1  ;;  %6834 = vmatprep.mubr.msk.bf16.mxu0 %vm7349_vm4, %v7350_v59  ;;  %v4388_v49 = vsel %vm666_vm3, %v4385_v45, %v4387_v10  ;;  %vm5115_vm3 = vcmask 62464  }
 0xa6b   :  { %v4219_v40 = vsel %vm123_vm1, %v4214_v44, %v4218_v17  ;;  %vm7221_vm1 = vmpackc.low %vm4890_vm14, %vm7351_vm0 }
 0xa70   :  { %6835 = vmatmul.mubr.msk.bf16.gmra.mrb[212].mxu0 %vm3652_vm10, %v4219_v40 }
 0xa71   :  { %6858 = vmatprep.mubr.msk.bf16.mxu0 %vm7349_vm4, %v7350_v59 }
 0xa78   :  { %6859 = vmatmul.mubr.msk.bf16.vlgmr.msra.gmra.mrb[216].mxu0 %vm3652_vm10, %v4384_v7 }
 0xa79   :  { %6862 = vmatprep.mubr.msk.bf16.mxu0 %vm7349_vm4, %v7350_v59  ;;  %7194 = vmatpush3.bf16.msra.mxu0 %v7191_v54  ;;  %v4712_v54 = vld [vmem:[%s9419_s16] sm:$0xff] }
 0xa80   :  { %6863 = vmatmul.mubr.msk.bf16.gmra.mrb[220].mxu0 %vm3652_vm10, %v4386_v1 }
 0xa81   :  { %6866 = vmatprep.mubr.msk.bf16.mxu0 %vm7349_vm4, %v7350_v59 }
 0xa88   :  { %6867 = vmatmul.mubr.msk.bf16.gmra.mrb[224].mxu0 %vm3652_vm10, %v4388_v49 }
 0xb26   :  { %v4350_v4 = vpop.f32.mrb[236].mxu1 }
 0xb27   :  { %v6844_v57 = vpop.f32.mrb[237].mxu1 }
 0xb28   :  { %v4353_v58 = vpop.f32.mrb[238].mxu1 }
 0xb29   :  { %v6845_v31 = vpop.f32.mrb[239].mxu1 }
 0xb2e   :  { %v4358_v62 = vpop.f32.mrb[240].mxu1 }
 0xb2f   :  { %v6848_v63 = vpop.f32.mrb[241].mxu1 }
 0xb30   :  { %v4361_v56 = vpop.f32.mrb[242].mxu1 }
 0xb31   :  { %v6849_v9 = vpop.f32.mrb[243].mxu1 }
 0xb33   :  { %v4275_v25 = vpop.f32.mrb[204].mxu0 }
 0xb34   :  { %v4351_v15 = vadd.f32 %v4350_v4, %v4275_v25  ;;  %v6828_v22 = vpop.f32.mrb[205].mxu0  ;;  %v5550_v4 = vld [vmem:[%s9419_s16 + $0x10] sm:$0xff] }
 0xb35   :  { %v4278_v0 = vpop.f32.mrb[206].mxu0 }
 0xb36   :  { %v4354_v38 = vadd.f32 %v4353_v58, %v4278_v0  ;;  %v6829_v52 = vpop.f32.mrb[207].mxu0  ;;  %v4366_v6 = vpop.f32.mrb[244].mxu1 }
 0xb37   :  { %v6852_v48 = vpop.f32.mrb[245].mxu1 }
 0xb38   :  { %v4369_v50 = vpop.f32.mrb[246].mxu1 }
 0xb39   :  { %v6853_v14 = vpop.f32.mrb[247].mxu1 }
 0xb3b   :  { %v4283_v16 = vpop.f32.mrb[208].mxu0 }
 0xb3c   :  { %v4359_v51 = vadd.f32 %v4358_v62, %v4283_v16  ;;  %v6832_v19 = vpop.f32.mrb[209].mxu0 }
 0xb3d   :  { %v4286_v20 = vpop.f32.mrb[210].mxu0 }
 0xb3e   :  { %v4362_v28 = vadd.f32 %v4361_v56, %v4286_v20  ;;  %v6833_v35 = vpop.f32.mrb[211].mxu0 }
 0xb3f   :  { %v5551_v35 = vld [vmem:[%s9419_s16 + $0x18] sm:$0xf] }
 0xb43   :  { %v4291_v43 = vpop.f32.mrb[212].mxu0 }
 0xb44   :  { %v4367_v60 = vadd.f32 %v4366_v6, %v4291_v43  ;;  %v6836_v34 = vpop.f32.mrb[213].mxu0 }
 0xb45   :  { %v4294_v7 = vpop.f32.mrb[214].mxu0 }
 0xb46   :  { %v4370_v12 = vadd.f32 %v4369_v50, %v4294_v7  ;;  %v6837_v2 = vpop.f32.mrb[215].mxu0 }
 0xb4b   :  { %v4444_v39 = vpop.f32.mrb[216].mxu0 }
 0xb4c   :  { %v4467_v29 = vadd.f32 %v4444_v39, %v4351_v15  ;;  %v6860_v21 = vpop.f32.mrb[217].mxu0  ;;  %v4885_v39 = vld [vmem:[%s9421_s17] sm:$0x7] }
 0xb4d   :  { %v4447_v42 = vpop.f32.mrb[218].mxu0 }
 0xb4e   :  { %v4480_v37 = vadd.f32 %v5533_v24, %v4467_v29  ;;  %v4468_v55 = vadd.f32 %v4447_v42, %v4354_v38  ;;  %v6861_v30 = vpop.f32.mrb[219].mxu0 }
 0xb50   :  { %v4486_v36 = vmax.f32 %v4480_v37, 0.0  ;;  %v4481_v11 = vadd.f32 %v5533_v24, %v4468_v55 }
 0xb52   :  { %v4487_v46 = vmax.f32 %v4481_v11, 0.0  ;;  %6874 = vmatprep.mubr.msk.f32.mxu1 %vm4494_vm12, %v4486_v36  ;;  %6887 = vmatprep.mubr.msk.f32.mxu0 %vm4494_vm12, %v4486_v36 }
 0xb53   :  { %v4452_v23 = vpop.f32.mrb[220].mxu0 }
 0xb54   :  { %v4469_v32 = vadd.f32 %v4452_v23, %v4359_v51  ;;  %v6864_v45 = vpop.f32.mrb[221].mxu0  ;;  %6875 = vmatmul.mubr.msk.f32.vlgmr.msra.gmra.mrb[234].mxu1 %vm4494_vm12, %v4487_v46  ;;  %6888 = vmatmul.mubr.msk.f32.vlgmr.msra.gmra.mrb[202].mxu0 %vm4494_vm12, %v4487_v46  ;;  %v5127_v46 = vlaneseq }
 0xb55   :  { %v4455_v8 = vpop.f32.mrb[222].mxu0 }
 0xb56   :  { %v4482_v41 = vadd.f32 %v5533_v24, %v4469_v32  ;;  %v4470_v33 = vadd.f32 %v4455_v8, %v4362_v28  ;;  %v6865_v1 = vpop.f32.mrb[223].mxu0  ;;  %v4713_v28 = vld [vmem:[%s9419_s16 + $0x8] sm:$0xf]  ;;  %v5128_v32 = vand.u32 127, %v5127_v46 }
 0xb58   :  { %v4488_v13 = vmax.f32 %v4482_v41, 0.0  ;;  %v4483_v10 = vadd.f32 %v5533_v24, %v4470_v33 }
 0xb5a   :  { %v4489_v18 = vmax.f32 %v4483_v10, 0.0  ;;  %6877 = vmatprep.mubr.msk.f32.mxu1 %vm4494_vm12, %v4488_v13  ;;  %6890 = vmatprep.mubr.msk.f32.mxu0 %vm4494_vm12, %v4488_v13 }
 0xb5b   :  { %v4460_v27 = vpop.f32.mrb[224].mxu0 }
 0xb5c   :  { %v4471_v17 = vadd.f32 %v4460_v27, %v4367_v60  ;;  %v6868_v44 = vpop.f32.mrb[225].mxu0  ;;  %6878 = vmatmul.mubr.msk.f32.gmra.mrb[248].mxu1 %vm4494_vm12, %v4489_v18  ;;  %6891 = vmatmul.mubr.msk.f32.gmra.mrb[228].mxu0 %vm4494_vm12, %v4489_v18 }
 0xb5d   :  { %v4463_v49 = vpop.f32.mrb[226].mxu0 }
 0xb5e   :  { %v4484_v40 = vadd.f32 %v5533_v24, %v4471_v17  ;;  %v4472_v53 = vadd.f32 %v4463_v49, %v4370_v12  ;;  %v6869_v47 = vpop.f32.mrb[227].mxu0 }
 0xb60   :  { %v4490_v5 = vmax.f32 %v4484_v40, 0.0  ;;  %v4485_v3 = vadd.f32 %v5533_v24, %v4472_v53  ;;  %v4964_v24 = vld [vmem:[%s9422_s18] sm:$0x3f] }
 0xb62   :  { %v4491_v61 = vmax.f32 %v4485_v3, 0.0  ;;  %6880 = vmatprep.mubr.msk.f32.mxu1 %vm4494_vm12, %v4490_v5  ;;  %6893 = vmatprep.mubr.msk.f32.mxu0 %vm4494_vm12, %v4490_v5 }
 0xb64   :  { %6881 = vmatmul.mubr.msk.f32.gmra.mrb[250].mxu1 %vm4494_vm12, %v4491_v61  ;;  %6894 = vmatmul.mubr.msk.f32.gmra.mrb[230].mxu0 %vm4494_vm12, %v4491_v61 }
 0xb65   :  { %6908 = vmatprep.mubr.msk.f32.mxu1 %vm3299_vm9, %v4712_v54  ;;  %6923 = vmatprep.mubr.msk.f32.mxu0 %vm3299_vm9, %v5550_v4 }
 0xc27   :  { %v6876_v57 = vpop.f32.mrb[234].mxu1  ;;  %v6889_v58 = vpop.f32.mrb[202].mxu0 }
 0xc28   :  { %v4707_v31 = vmax.f32 %v6876_v57, %v6889_v58  ;;  %v4579_v62 = vpop.f32.mrb[235].mxu1  ;;  %v4677_v63 = vpop.f32.mrb[203].mxu0 }
 0xc29   :  { %v4706_v56 = vmax.f32 %v4579_v62, %v4677_v63 }
 0xc2b   :  { %v7195_v9 = vpack.c.bf16 %v4707_v31, %v4706_v56 }
 0xc2d   :  { %7196 = vmatprep.subr.bf16.mxu1 %v7195_v9  ;;  %7208 = vmatprep.subr.bf16.mxu0 %v7195_v9 }
 0xc2e   :  { %7198 = vmatpush3.bf16.msra.mxu1 %v7195_v9  ;;  %7210 = vmatpush3.bf16.msra.mxu0 %v7195_v9 }
 0xc2f   :  { %v6879_v25 = vpop.f32.mrb[248].mxu1  ;;  %v6892_v15 = vpop.f32.mrb[228].mxu0 }
 0xc30   :  { %v4709_v22 = vmax.f32 %v6879_v25, %v6892_v15  ;;  %v4589_v0 = vpop.f32.mrb[249].mxu1  ;;  %v4687_v38 = vpop.f32.mrb[229].mxu0 }
 0xc31   :  { %v4708_v52 = vmax.f32 %v4589_v0, %v4687_v38 }
 0xc33   :  { %v7199_v6 = vpack.c.bf16 %v4709_v22, %v4708_v52 }
 0xc35   :  { %7200 = vmatprep.subr.bf16.mxu1 %v7199_v6  ;;  %7212 = vmatprep.subr.bf16.mxu0 %v7199_v6 }
 0xc36   :  { %7202 = vmatpush3.bf16.msra.mxu1 %v7199_v6  ;;  %7214 = vmatpush3.bf16.msra.mxu0 %v7199_v6 }
 0xc37   :  { %v6882_v48 = vpop.f32.mrb[250].mxu1  ;;  %v6895_v50 = vpop.f32.mrb[230].mxu0 }
 0xc38   :  { %v4711_v14 = vmax.f32 %v6882_v48, %v6895_v50  ;;  %v4599_v16 = vpop.f32.mrb[251].mxu1  ;;  %v4697_v51 = vpop.f32.mrb[231].mxu0 }
 0xc39   :  { %v4710_v19 = vmax.f32 %v4599_v16, %v4697_v51 }
 0xc3b   :  { %v7203_v20 = vpack.c.bf16 %v4711_v14, %v4710_v19 }
 0xc3d   :  { %7204 = vmatprep.subr.bf16.mxu1 %v7203_v20  ;;  %7216 = vmatprep.subr.bf16.mxu0 %v7203_v20 }
 0xc3e   :  { %7206 = vmatpush3.bf16.msra.mxu1 %v7203_v20  ;;  %7218 = vmatpush3.bf16.msra.mxu0 %v7203_v20 }
 0xc3f   :  { %7219 = vmatprep.subr.bf16.mxu1 %v7348_v26  ;;  %7223 = vmatprep.subr.bf16.mxu0 %v7348_v26 }
 0xc41   :  { %6909 = vmatmul.mubr.msk.f32.vlgmr.msra.gmra.mrb[252].mxu1 %vm3299_vm9, %v4713_v28  ;;  %6924 = vmatmul.mubr.msk.f32.vlgmr.msra.gmra.mrb[232].mxu0 %vm3299_vm9, %v5551_v35 }
 0xc42   :  { %6930 = vmatprep.mubr.msk.f32.mxu1 %vm7349_vm4, %v7350_v59  ;;  %6937 = vmatprep.mubr.msk.f32.mxu0 %vm7349_vm4, %v7350_v59 }
 0xd14   :  { %v6910_v43 = vpop.f32.mrb[252].mxu1  ;;  %v6925_v60 = vpop.f32.mrb[232].mxu0 }
 0xd15   :  { %v4880_v34 = vmax.f32 %v6910_v43, %v6925_v60  ;;  %v4786_v7 = vpop.f32.mrb[253].mxu1  ;;  %v4870_v12 = vpop.f32.mrb[233].mxu0 }
 0xd16   :  { %v4879_v2 = vmax.f32 %v4786_v7, %v4870_v12 }
 0xd17   :  { %4884 = vst.msk [vmem:[%s9420_s19 + $0x8] sm:$0xf] %vm4883_vm13, %v4880_v34 }
 0xd18   :  { %4882 = vst.msk [vmem:[%s9420_s19] sm:$0xff] %vm4881_vm15, %v4879_v2  ;;  %v7220_v26 = vpack.c.bf16 %v4880_v34, %v4879_v2 }
 0xd1a   :  { %7222 = vmatpush3.bf16.msk.msra.mxu1 %vm7221_vm1, %v7220_v26  ;;  %7226 = vmatpush3.bf16.msk.msra.mxu0 %vm7221_vm1, %v7220_v26 }
 0xd1b   :  { %6940 = vmatprep.subr.mxu1 %v7350_v59 }
 0xd1d   :  { %6931 = vmatmul.mubr.msk.f32.vlgmr.msra.gmra.mrb[254].mxu1 %vm4886_vm2, %v4885_v39  ;;  %6938 = vmatmul.mubr.msk.f32.vlgmr.msra.gmra.mrb[234].mxu0 %vm4886_vm2, %v4964_v24 }
 0xd1e   :  { %6942 = vmatprep.mubr.msk.f32.mxu1 %vm7349_vm4, %v7350_v59  ;;  %v5130_v59 = vshrl.u32 %v5127_v46, 7  ;;  %vm5143_vm4 = vcmask 21504  }
 0xd20   :  { %v5131_v45 = vsub.s32 %v5128_v32, %v5130_v59 }
 0xdf0   :  { %v4960_v29 = vpop.f32.mrb[254].mxu1  ;;  %v5034_v21 = vpop.f32.mrb[234].mxu0 }
 0xdf1   :  { %6941 = vmatpush3.xpose.msk.msra.mxu1 %vm4881_vm15, %v4960_v29  ;;  %v5114_v42 = vmul.f32 %v5034_v21, %v5034_v21  ;;  %v6932_v37 = vpop.f32.mrb[255].mxu1  ;;  %v6939_v55 = vpop.f32.mrb[235].mxu0  ;;  %v5119_v30 = vmul.f32 %v4960_v29, %v4960_v29 }
 0xdf3   :  { %v5116_v36 = vsel %vm5115_vm3, %v5114_v42, 0.0  ;;  %v5121_v11 = vsel %vm5120_vm5, %v5119_v30, 0.0 }
 0xdf4   :  { %6943 = vmatmul.mubr.msk.f32.vlgmr.msra.gmra.mrb[0].mxu1 %vm4881_vm15, %v5034_v21  ;;  %5117 = vadd.xlane.f32.xlu0 %v5116_v36 }
 0xdf8   :  { %5122 = vadd.xlane.f32.xlu0 %v5121_v11 }
 0xe81   :  { %v5118_v23 = vpop.xlane.xlu0 %5117 }
 0xe85   :  { %v5123_v8 = vpop.xlane.xlu0 %5122 }
 0xe86   :  { %v5132_v13 = vrot.slane %v5123_v8, %v5131_v45 }
 0xec7   :  { %v5110_v41 = vpop.f32.mrb[0].mxu1 }
 0xec8   :  { %v5124_v33 = vmul.f32 2.0, %v5110_v41  ;;  %v6944_v1 = vpop.f32.mrb[1].mxu1 }
 0xeca   :  { %v5125_v10 = vsub.f32 %v5124_v33, %v5118_v23 }
 0xecc   :  { %v5142_v18 = vsub.f32 %v5125_v10, %v5132_v13 }
 0xece   :  { %5144 = vst.msk [vmem:[%s9423_s20] sm:$0x3f] %vm5143_vm4, %v5142_v18 }

</bundles_post_ra>
